<compile_context>
chip_gen: v7x
topology: tpu7x:2x2x1
jax: 0.10.0
libtpu: 0.0.40
codegen_flags: <defaults>
</compile_context>

<pallas_src>
import math
import jax
import jax.numpy as jnp
from jax.experimental import pallas as pl
from jax.experimental.pallas import tpu as pltpu

# ---------------- scaled DistilBERT config ----------------
VOCAB      = 100
MAX_POS    = 64
HIDDEN     = 128
N_HEADS    = 4
HEAD_DIM   = HIDDEN // N_HEADS
FFN        = 256
N_LAYERS   = 2
N_CLASSES  = 2
LN_EPS     = 1e-12
ATTN_SCALE = 1.0 / math.sqrt(HEAD_DIM)
NEG_INF    = -1e30


# ---------------- in-kernel helpers (traced inside the Pallas body) ----------------
def _ln(x, g, b):
    mu = jnp.mean(x, axis=-1, keepdims=True)
    xc = x - mu
    var = jnp.mean(xc * xc, axis=-1, keepdims=True)
    return xc * jax.lax.rsqrt(var + LN_EPS) * g + b


def _gelu(y):
    # TODO(synk): HF DistilBERT uses exact (erf) GELU; tanh approximation kept
    # for guaranteed Mosaic lowering (EUP tanh), f32 throughout (v5e-safe).
    c = 0.7978845608028654  # sqrt(2/pi)
    return 0.5 * y * (1.0 + jnp.tanh(c * (y + 0.044715 * y * y * y)))


# ---------------- fused whole-encoder Pallas kernel ----------------
def _encoder_kernel(x_ref, bias_ref,
                    emb_g_ref, emb_b_ref,
                    wqkv_ref, bqkv_ref, wo_ref, bo_ref,
                    ln1_g_ref, ln1_b_ref,
                    w1_ref, b1_ref, w2_ref, b2_ref,
                    ln2_g_ref, ln2_b_ref,
                    o_ref, ctx_ref):
    # x_ref    : (B*S, H) f32   word+pos embeddings (batch folded into rows)
    # bias_ref : (B*S, B*S) f32 additive attention bias: 0 where the key is a
    #            non-padded token of the SAME sequence, -1e30 otherwise
    #            (padding mask + block-diagonal batch separation, precomputed).
    # ctx_ref  : (B*S, H) f32   VMEM scratch for per-head attention outputs.
    attn_bias = bias_ref[...]                                   # hoisted out of loops

    # Embedding LayerNorm (fused; no standalone pallas_call).
    h = _ln(x_ref[...], emb_g_ref[...], emb_b_ref[...])         # (B*S, H) f32

    for l in range(N_LAYERS):                                   # static unroll
        # ---- fused QKV projection: one lane-dense (B*S,H) x (H,3H) MXU matmul ----
        qkv = jnp.dot(h.astype(jnp.bfloat16), wqkv_ref[l],
                      preferred_element_type=jnp.float32) + bqkv_ref[l]
        # ATTN_SCALE already folded into the Q columns of wqkv/bqkv at init.
        q = qkv[:, 0:HIDDEN].astype(jnp.bfloat16)
        k = qkv[:, HIDDEN:2 * HIDDEN].astype(jnp.bfloat16)
        v = qkv[:, 2 * HIDDEN:3 * HIDDEN].astype(jnp.bfloat16)

        # ---- per-head softmax attention over the flattened (B*S, B*S) scores ----
        # Cross-sequence / padded entries are killed by the additive bias, so
        # batch-folding is exact.  Each head writes straight into ctx_ref at its
        # static lane offset (no concat).
        for hh in range(N_HEADS):
            lo = hh * HEAD_DIM
            hi = lo + HEAD_DIM
            # q @ k^T: contract last dim of both operands (== trans_b=True);
            # no explicit transpose op is emitted.
            s = jax.lax.dot_general(q[:, lo:hi], k[:, lo:hi],
                                    (((1,), (1,)), ((), ())),
                                    preferred_element_type=jnp.float32)
            s = s + attn_bias                                    # (B*S, B*S)
            mmax = jnp.max(s, axis=-1, keepdims=True)
            e = jnp.exp(s - mmax)      # max-subtraction keeps fully-masked rows finite
            p = e * pl.reciprocal(jnp.sum(e, axis=-1, keepdims=True), approx=True)
            ctx_ref[:, lo:hi] = jnp.dot(p.astype(jnp.bfloat16), v[:, lo:hi],
                                        preferred_element_type=jnp.float32)

        # ---- output projection + fused residual + LayerNorm ----
        sa = jnp.dot(ctx_ref[...].astype(jnp.bfloat16), wo_ref[l],
                     preferred_element_type=jnp.float32) + bo_ref[l]
        h1 = _ln(sa + h, ln1_g_ref[l], ln1_b_ref[l])

        # ---- fused FFN1 + GELU + FFN2 (intermediate never leaves the kernel) ----
        ff = jnp.dot(h1.astype(jnp.bfloat16), w1_ref[l],
                     preferred_element_type=jnp.float32) + b1_ref[l]
        ff = _gelu(ff)
        ff = jnp.dot(ff.astype(jnp.bfloat16), w2_ref[l],
                     preferred_element_type=jnp.float32) + b2_ref[l]

        # ---- fused residual + LayerNorm; h stays resident for the next layer ----
        h = _ln(ff + h1, ln2_g_ref[l], ln2_b_ref[l])

    # Single lane-dense (B*S, H) store of the final hidden state.
    o_ref[...] = h


# ---------------- pallas_call wrapper (one call for the whole encoder) ----------------
def fused_encoder(x, attn_bias, p):
    BS, H = x.shape
    L = p["qkv_w"].shape[0]

    def full(shape):
        return pl.BlockSpec(shape, lambda i: (0,) * len(shape))

    # TODO(synk): at real DistilBERT size (H=768, S>=128), stream weights with a
    # layer grid axis ("arbitrary"), use pipeline_mode=pl.Buffered(1) on
    # constant-index weights, set vmem_limit_bytes explicitly, and tile the
    # attention over KV (flash-style) to stay inside v7x's 64 MiB VMEM.
    return pl.pallas_call(
        _encoder_kernel,
        out_shape=jax.ShapeDtypeStruct((BS, H), jnp.float32),
        grid=(1,),
        in_specs=[
            full((BS, H)),                                   # embeddings (batch-folded)
            full((BS, BS)),                                  # additive attention bias
            full((1, H)), full((1, H)),                      # embedding LN gamma/beta
            full((L, H, 3 * H)), full((L, 1, 3 * H)),        # fused QKV (bf16) + bias
            full((L, H, H)), full((L, 1, H)),                # out proj (bf16) + bias
            full((L, 1, H)), full((L, 1, H)),                # sa LayerNorm gamma/beta
            full((L, H, FFN)), full((L, 1, FFN)),            # FFN1 (bf16) + bias
            full((L, FFN, H)), full((L, 1, H)),              # FFN2 (bf16) + bias
            full((L, 1, H)), full((L, 1, H)),                # out LayerNorm gamma/beta
        ],
        out_specs=pl.BlockSpec((BS, H), lambda i: (0, 0)),
        scratch_shapes=[pltpu.VMEM((BS, H), jnp.float32)],   # per-head ctx scratch
        compiler_params=pltpu.CompilerParams(dimension_semantics=("arbitrary",)),
    )(x, attn_bias,
      p["emb_ln_g"], p["emb_ln_b"],
      p["qkv_w"], p["qkv_b"], p["o_w"], p["o_b"],
      p["sa_ln_g"], p["sa_ln_b"],
      p["ffn1_w"], p["ffn1_b"], p["ffn2_w"], p["ffn2_b"],
      p["out_ln_g"], p["out_ln_b"])


# ---------------- additive attention bias (padding mask + batch separation) ----------------
def build_attn_bias(mask):
    # mask: (B, S) int, 1 = keep, 0 = pad.  Returns (B*S, B*S) f32 with 0 for
    # allowed (same-sequence, non-padded key) pairs and -1e30 otherwise.
    B, S = mask.shape
    seq_id = jnp.arange(B * S, dtype=jnp.int32) // S
    same_seq = seq_id[:, None] == seq_id[None, :]
    key_keep = mask.reshape(-1) > 0
    allowed = jnp.logical_and(same_seq, key_keep[None, :])
    return jnp.where(allowed, 0.0, NEG_INF).astype(jnp.float32)


# ---------------- parameter init (deterministic, synthetic) ----------------
def init_params(key):
    def normal(k, shape):
        return 0.02 * jax.random.normal(k, shape, dtype=jnp.float32)

    keys = iter(jax.random.split(key, 3 + 4 * N_LAYERS))
    word_emb = normal(next(keys), (VOCAB, HIDDEN))
    pos_emb = normal(next(keys), (MAX_POS, HIDDEN))
    fc_w = normal(next(keys), (HIDDEN, N_CLASSES))

    qkv_w, o_w, ffn1_w, ffn2_w = [], [], [], []
    for _ in range(N_LAYERS):
        w = normal(next(keys), (HIDDEN, 3 * HIDDEN))
        # Fold 1/sqrt(head_dim) into the Q third of the fused QKV weight so the
        # kernel never multiplies by ATTN_SCALE.
        w = w.at[:, :HIDDEN].multiply(ATTN_SCALE)
        qkv_w.append(w.astype(jnp.bfloat16))
        o_w.append(normal(next(keys), (HIDDEN, HIDDEN)).astype(jnp.bfloat16))
        ffn1_w.append(normal(next(keys), (HIDDEN, FFN)).astype(jnp.bfloat16))
        ffn2_w.append(normal(next(keys), (FFN, HIDDEN)).astype(jnp.bfloat16))

    L = N_LAYERS
    qkv_b = jnp.zeros((L, 1, 3 * HIDDEN), jnp.float32)
    # (Q third of the bias would also carry the folded ATTN_SCALE; zeros here.)
    qkv_b = qkv_b.at[:, :, :HIDDEN].multiply(ATTN_SCALE)

    return {
        "word_emb": word_emb,
        "pos_emb": pos_emb,
        "emb_ln_g": jnp.ones((1, HIDDEN), jnp.float32),
        "emb_ln_b": jnp.zeros((1, HIDDEN), jnp.float32),
        "qkv_w": jnp.stack(qkv_w),                      # (L, H, 3H) bf16, Q pre-scaled
        "qkv_b": qkv_b,                                 # (L, 1, 3H) f32
        "o_w": jnp.stack(o_w),                          # (L, H, H)  bf16
        "o_b": jnp.zeros((L, 1, HIDDEN), jnp.float32),
        "sa_ln_g": jnp.ones((L, 1, HIDDEN), jnp.float32),
        "sa_ln_b": jnp.zeros((L, 1, HIDDEN), jnp.float32),
        "ffn1_w": jnp.stack(ffn1_w),                    # (L, H, FFN) bf16
        "ffn1_b": jnp.zeros((L, 1, FFN), jnp.float32),
        "ffn2_w": jnp.stack(ffn2_w),                    # (L, FFN, H) bf16
        "ffn2_b": jnp.zeros((L, 1, HIDDEN), jnp.float32),
        "out_ln_g": jnp.ones((L, 1, HIDDEN), jnp.float32),
        "out_ln_b": jnp.zeros((L, 1, HIDDEN), jnp.float32),
        "fc_w": fc_w,
        "fc_b": jnp.zeros((N_CLASSES,), jnp.float32),
    }


# ---------------- full forward pass ----------------
def distilbert_forward(params, text, mask):
    B, S = text.shape
    # Embeddings: gather kept in plain XLA (data-dependent, lane-sparse indices).
    we = jnp.take(params["word_emb"], text, axis=0)                 # (B, S, H)
    pe = params["pos_emb"][:S][None, :, :]                          # (1, S, H)
    x = (we + pe).astype(jnp.float32).reshape(B * S, HIDDEN)        # batch folded into M
    # embedding dropout: identity (eval mode)

    attn_bias = build_attn_bias(mask)                               # (B*S, B*S)
    h = fused_encoder(x, attn_bias, params)                         # ONE pallas_call

    pooled = h.reshape(B, S, HIDDEN)[:, 0]                          # hidden_state[:, 0]
    # dropout(0.5): identity in eval / inference mode
    # (B, 2) classifier left in plain XLA: lane occupancy 2/128, a pallas_call
    # would be pure launch overhead (per perf review).
    logits = jnp.dot(pooled, params["fc_w"]) + params["fc_b"]       # (B, 2)
    return logits


if __name__ == "__main__":
    B, S = 2, 16
    key = jax.random.PRNGKey(0)
    k_params, k_text = jax.random.split(key)

    params = init_params(k_params)
    text = jax.random.randint(k_text, (B, S), 0, VOCAB, dtype=jnp.int32)
    mask = jnp.ones((B, S), dtype=jnp.int32).at[1, S - 4:].set(0)   # pad tail of seq 1

    fwd = jax.jit(distilbert_forward)
    logits = fwd(params, text, mask)
    jax.block_until_ready(logits)
    assert logits.shape == (B, N_CLASSES) and logits.dtype == jnp.float32
    assert bool(jnp.all(jnp.isfinite(logits)))
    print("KERNEL_OK")
</pallas_src>

<mosaic_0001>
module attributes {stable_mosaic.version = 11 : i64} {
  func.func @_encoder_kernel(%arg0: i32, %arg1: memref<32x128xf32, #tpu.memory_space<vmem>>, %arg2: memref<32x32xf32, #tpu.memory_space<vmem>>, %arg3: memref<1x128xf32, #tpu.memory_space<vmem>>, %arg4: memref<1x128xf32, #tpu.memory_space<vmem>>, %arg5: memref<2x128x384xbf16, #tpu.memory_space<vmem>>, %arg6: memref<2x1x384xf32, #tpu.memory_space<vmem>>, %arg7: memref<2x128x128xbf16, #tpu.memory_space<vmem>>, %arg8: memref<2x1x128xf32, #tpu.memory_space<vmem>>, %arg9: memref<2x1x128xf32, #tpu.memory_space<vmem>>, %arg10: memref<2x1x128xf32, #tpu.memory_space<vmem>>, %arg11: memref<2x128x256xbf16, #tpu.memory_space<vmem>>, %arg12: memref<2x1x256xf32, #tpu.memory_space<vmem>>, %arg13: memref<2x256x128xbf16, #tpu.memory_space<vmem>>, %arg14: memref<2x1x128xf32, #tpu.memory_space<vmem>>, %arg15: memref<2x1x128xf32, #tpu.memory_space<vmem>>, %arg16: memref<2x1x128xf32, #tpu.memory_space<vmem>>, %arg17: memref<32x128xf32, #tpu.memory_space<vmem>>, %arg18: memref<32x128xf32, #tpu.memory_space<vmem>>) attributes {dimension_semantics = [#tpu.dimension_semantics<arbitrary>], iteration_bounds = array<i64: 1>, scalar_prefetch = 0 : i64, scratch_operands = 1 : i64, tpu.core_type = #tpu.core_type<tc>, window_params = [{pipeline_mode = #tpu.pipeline_mode<synchronous>, transform_indices = @transform_0, window_bounds = array<i64: 32, 128>}, {pipeline_mode = #tpu.pipeline_mode<synchronous>, transform_indices = @transform_1, window_bounds = array<i64: 32, 32>}, {pipeline_mode = #tpu.pipeline_mode<synchronous>, transform_indices = @transform_2, window_bounds = array<i64: 1, 128>}, {pipeline_mode = #tpu.pipeline_mode<synchronous>, transform_indices = @transform_3, window_bounds = array<i64: 1, 128>}, {pipeline_mode = #tpu.pipeline_mode<synchronous>, transform_indices = @transform_4, window_bounds = array<i64: 2, 128, 384>}, {pipeline_mode = #tpu.pipeline_mode<synchronous>, transform_indices = @transform_5, window_bounds = array<i64: 2, 1, 384>}, {pipeline_mode = #tpu.pipeline_mode<synchronous>, transform_indices = @transform_6, window_bounds = array<i64: 2, 128, 128>}, {pipeline_mode = #tpu.pipeline_mode<synchronous>, transform_indices = @transform_7, window_bounds = array<i64: 2, 1, 128>}, {pipeline_mode = #tpu.pipeline_mode<synchronous>, transform_indices = @transform_8, window_bounds = array<i64: 2, 1, 128>}, {pipeline_mode = #tpu.pipeline_mode<synchronous>, transform_indices = @transform_9, window_bounds = array<i64: 2, 1, 128>}, {pipeline_mode = #tpu.pipeline_mode<synchronous>, transform_indices = @transform_10, window_bounds = array<i64: 2, 128, 256>}, {pipeline_mode = #tpu.pipeline_mode<synchronous>, transform_indices = @transform_11, window_bounds = array<i64: 2, 1, 256>}, {pipeline_mode = #tpu.pipeline_mode<synchronous>, transform_indices = @transform_12, window_bounds = array<i64: 2, 256, 128>}, {pipeline_mode = #tpu.pipeline_mode<synchronous>, transform_indices = @transform_13, window_bounds = array<i64: 2, 1, 128>}, {pipeline_mode = #tpu.pipeline_mode<synchronous>, transform_indices = @transform_14, window_bounds = array<i64: 2, 1, 128>}, {pipeline_mode = #tpu.pipeline_mode<synchronous>, transform_indices = @transform_15, window_bounds = array<i64: 2, 1, 128>}, {pipeline_mode = #tpu.pipeline_mode<synchronous>, transform_indices = @transform_16, window_bounds = array<i64: 32, 128>}]} {
    %c0 = arith.constant 0 : index
    %c0_0 = arith.constant 0 : index
    %0 = vector.load %arg2[%c0, %c0_0] : memref<32x32xf32, #tpu.memory_space<vmem>>, vector<32x32xf32>
    %c0_1 = arith.constant 0 : index
    %c0_2 = arith.constant 0 : index
    %1 = vector.load %arg1[%c0_1, %c0_2] : memref<32x128xf32, #tpu.memory_space<vmem>>, vector<32x128xf32>
    %c0_3 = arith.constant 0 : index
    %c0_4 = arith.constant 0 : index
    %2 = vector.load %arg3[%c0_3, %c0_4] : memref<1x128xf32, #tpu.memory_space<vmem>>, vector<1x128xf32>
    %c0_5 = arith.constant 0 : index
    %c0_6 = arith.constant 0 : index
    %3 = vector.load %arg4[%c0_5, %c0_6] : memref<1x128xf32, #tpu.memory_space<vmem>>, vector<1x128xf32>
    %cst = arith.constant dense<0.000000e+00> : vector<32xf32>
    %4 = vector.multi_reduction <add>, %1, %cst [1] : vector<32x128xf32> to vector<32xf32>
    %5 = vector.shape_cast %4 : vector<32xf32> to vector<32x1xf32>
    %cst_7 = arith.constant 1.280000e+02 : f32
    %6 = vector.broadcast %cst_7 : f32 to vector<32x1xf32>
    %7 = arith.divf %5, %6 : vector<32x1xf32>
    %8 = vector.broadcast %7 : vector<32x1xf32> to vector<32x128xf32>
    %9 = arith.subf %1, %8 : vector<32x128xf32>
    %10 = arith.mulf %9, %9 : vector<32x128xf32>
    %cst_8 = arith.constant dense<0.000000e+00> : vector<32xf32>
    %11 = vector.multi_reduction <add>, %10, %cst_8 [1] : vector<32x128xf32> to vector<32xf32>
    %12 = vector.shape_cast %11 : vector<32xf32> to vector<32x1xf32>
    %cst_9 = arith.constant 1.280000e+02 : f32
    %13 = vector.broadcast %cst_9 : f32 to vector<32x1xf32>
    %14 = arith.divf %12, %13 : vector<32x1xf32>
    %cst_10 = arith.constant 9.99999996E-13 : f32
    %15 = vector.broadcast %cst_10 : f32 to vector<32x1xf32>
    %16 = arith.addf %14, %15 : vector<32x1xf32>
    %17 = math.rsqrt %16 : vector<32x1xf32>
    %18 = vector.broadcast %17 : vector<32x1xf32> to vector<32x128xf32>
    %19 = arith.mulf %9, %18 : vector<32x128xf32>
    %20 = vector.broadcast %2 : vector<1x128xf32> to vector<32x128xf32>
    %21 = arith.mulf %19, %20 : vector<32x128xf32>
    %22 = vector.broadcast %3 : vector<1x128xf32> to vector<32x128xf32>
    %23 = arith.addf %21, %22 : vector<32x128xf32>
    %24 = arith.truncf %23 : vector<32x128xf32> to vector<32x128xbf16>
    %c0_11 = arith.constant 0 : index
    %c0_12 = arith.constant 0 : index
    %c0_13 = arith.constant 0 : index
    %25 = vector.load %arg5[%c0_11, %c0_12, %c0_13] : memref<2x128x384xbf16, #tpu.memory_space<vmem>>, vector<1x128x384xbf16>
    %26 = vector.shape_cast %25 : vector<1x128x384xbf16> to vector<128x384xbf16>
    %cst_14 = arith.constant dense<0.000000e+00> : vector<32x384xf32>
    %27 = tpu.matmul %24, %26, %cst_14 {dimension_numbers = #tpu.dot_dimension_numbers<[1], [0], [0], [1], [0, 0, 1, 1], [], []>} : vector<32x128xbf16>, vector<128x384xbf16>, vector<32x384xf32> -> vector<32x384xf32>
    %c0_15 = arith.constant 0 : index
    %c0_16 = arith.constant 0 : index
    %c0_17 = arith.constant 0 : index
    %28 = vector.load %arg6[%c0_15, %c0_16, %c0_17] : memref<2x1x384xf32, #tpu.memory_space<vmem>>, vector<1x1x384xf32>
    %29 = vector.shape_cast %28 : vector<1x1x384xf32> to vector<1x384xf32>
    %30 = vector.broadcast %29 : vector<1x384xf32> to vector<32x384xf32>
    %31 = arith.addf %27, %30 : vector<32x384xf32>
    %32 = vector.extract_strided_slice %31 {offsets = [0, 0], sizes = [32, 128], strides = [1, 1]} : vector<32x384xf32> to vector<32x128xf32>
    %33 = arith.truncf %32 : vector<32x128xf32> to vector<32x128xbf16>
    %34 = vector.extract_strided_slice %31 {offsets = [0, 128], sizes = [32, 128], strides = [1, 1]} : vector<32x384xf32> to vector<32x128xf32>
    %35 = arith.truncf %34 : vector<32x128xf32> to vector<32x128xbf16>
    %36 = vector.extract_strided_slice %31 {offsets = [0, 256], sizes = [32, 128], strides = [1, 1]} : vector<32x384xf32> to vector<32x128xf32>
    %37 = arith.truncf %36 : vector<32x128xf32> to vector<32x128xbf16>
    %38 = vector.extract_strided_slice %33 {offsets = [0, 0], sizes = [32, 32], strides = [1, 1]} : vector<32x128xbf16> to vector<32x32xbf16>
    %39 = vector.extract_strided_slice %35 {offsets = [0, 0], sizes = [32, 32], strides = [1, 1]} : vector<32x128xbf16> to vector<32x32xbf16>
    %cst_18 = arith.constant dense<0.000000e+00> : vector<32x32xf32>
    %40 = tpu.matmul %38, %39, %cst_18 {dimension_numbers = #tpu.dot_dimension_numbers<[1], [1], [0], [0], [0, 0, 1, 0], [], []>} : vector<32x32xbf16>, vector<32x32xbf16>, vector<32x32xf32> -> vector<32x32xf32>
    %41 = arith.addf %40, %0 : vector<32x32xf32>
    %cst_19 = arith.constant dense<0xFF800000> : vector<32xf32>
    %42 = vector.multi_reduction <maximumf>, %41, %cst_19 [1] : vector<32x32xf32> to vector<32xf32>
    %43 = vector.shape_cast %42 : vector<32xf32> to vector<32x1xf32>
    %44 = vector.broadcast %43 : vector<32x1xf32> to vector<32x32xf32>
    %45 = arith.subf %41, %44 : vector<32x32xf32>
    %46 = math.exp %45 : vector<32x32xf32>
    %cst_20 = arith.constant dense<0.000000e+00> : vector<32xf32>
    %47 = vector.multi_reduction <add>, %46, %cst_20 [1] : vector<32x32xf32> to vector<32xf32>
    %48 = vector.shape_cast %47 : vector<32xf32> to vector<32x1xf32>
    %49 = tpu.reciprocal %48 {approx = true} : vector<32x1xf32> -> vector<32x1xf32>
    %50 = vector.broadcast %49 : vector<32x1xf32> to vector<32x32xf32>
    %51 = arith.mulf %46, %50 : vector<32x32xf32>
    %52 = arith.truncf %51 : vector<32x32xf32> to vector<32x32xbf16>
    %53 = vector.extract_strided_slice %37 {offsets = [0, 0], sizes = [32, 32], strides = [1, 1]} : vector<32x128xbf16> to vector<32x32xbf16>
    %cst_21 = arith.constant dense<0.000000e+00> : vector<32x32xf32>
    %54 = tpu.matmul %52, %53, %cst_21 {dimension_numbers = #tpu.dot_dimension_numbers<[1], [0], [0], [1], [0, 0, 1, 1], [], []>} : vector<32x32xbf16>, vector<32x32xbf16>, vector<32x32xf32> -> vector<32x32xf32>
    %c0_22 = arith.constant 0 : index
    %c0_23 = arith.constant 0 : index
    %55 = vector.load %arg18[%c0_22, %c0_23] : memref<32x128xf32, #tpu.memory_space<vmem>>, vector<32x32xf32>
    tpu.vector_store %arg18[%c0_22, %c0_23], %54 {strides = array<i32>} : memref<32x128xf32, #tpu.memory_space<vmem>>, vector<32x32xf32>,
    %56 = vector.extract_strided_slice %33 {offsets = [0, 32], sizes = [32, 32], strides = [1, 1]} : vector<32x128xbf16> to vector<32x32xbf16>
    %57 = vector.extract_strided_slice %35 {offsets = [0, 32], sizes = [32, 32], strides = [1, 1]} : vector<32x128xbf16> to vector<32x32xbf16>
    %cst_24 = arith.constant dense<0.000000e+00> : vector<32x32xf32>
    %58 = tpu.matmul %56, %57, %cst_24 {dimension_numbers = #tpu.dot_dimension_numbers<[1], [1], [0], [0], [0, 0, 1, 0], [], []>} : vector<32x32xbf16>, vector<32x32xbf16>, vector<32x32xf32> -> vector<32x32xf32>
    %59 = arith.addf %58, %0 : vector<32x32xf32>
    %cst_25 = arith.constant dense<0xFF800000> : vector<32xf32>
    %60 = vector.multi_reduction <maximumf>, %59, %cst_25 [1] : vector<32x32xf32> to vector<32xf32>
    %61 = vector.shape_cast %60 : vector<32xf32> to vector<32x1xf32>
    %62 = vector.broadcast %61 : vector<32x1xf32> to vector<32x32xf32>
    %63 = arith.subf %59, %62 : vector<32x32xf32>
    %64 = math.exp %63 : vector<32x32xf32>
    %cst_26 = arith.constant dense<0.000000e+00> : vector<32xf32>
    %65 = vector.multi_reduction <add>, %64, %cst_26 [1] : vector<32x32xf32> to vector<32xf32>
    %66 = vector.shape_cast %65 : vector<32xf32> to vector<32x1xf32>
    %67 = tpu.reciprocal %66 {approx = true} : vector<32x1xf32> -> vector<32x1xf32>
    %68 = vector.broadcast %67 : vector<32x1xf32> to vector<32x32xf32>
    %69 = arith.mulf %64, %68 : vector<32x32xf32>
    %70 = arith.truncf %69 : vector<32x32xf32> to vector<32x32xbf16>
    %71 = vector.extract_strided_slice %37 {offsets = [0, 32], sizes = [32, 32], strides = [1, 1]} : vector<32x128xbf16> to vector<32x32xbf16>
    %cst_27 = arith.constant dense<0.000000e+00> : vector<32x32xf32>
    %72 = tpu.matmul %70, %71, %cst_27 {dimension_numbers = #tpu.dot_dimension_numbers<[1], [0], [0], [1], [0, 0, 1, 1], [], []>} : vector<32x32xbf16>, vector<32x32xbf16>, vector<32x32xf32> -> vector<32x32xf32>
    %c0_28 = arith.constant 0 : index
    %c32 = arith.constant 32 : index
    %73 = vector.load %arg18[%c0_28, %c32] : memref<32x128xf32, #tpu.memory_space<vmem>>, vector<32x32xf32>
    tpu.vector_store %arg18[%c0_28, %c32], %72 {strides = array<i32>} : memref<32x128xf32, #tpu.memory_space<vmem>>, vector<32x32xf32>,
    %74 = vector.extract_strided_slice %33 {offsets = [0, 64], sizes = [32, 32], strides = [1, 1]} : vector<32x128xbf16> to vector<32x32xbf16>
    %75 = vector.extract_strided_slice %35 {offsets = [0, 64], sizes = [32, 32], strides = [1, 1]} : vector<32x128xbf16> to vector<32x32xbf16>
    %cst_29 = arith.constant dense<0.000000e+00> : vector<32x32xf32>
    %76 = tpu.matmul %74, %75, %cst_29 {dimension_numbers = #tpu.dot_dimension_numbers<[1], [1], [0], [0], [0, 0, 1, 0], [], []>} : vector<32x32xbf16>, vector<32x32xbf16>, vector<32x32xf32> -> vector<32x32xf32>
    %77 = arith.addf %76, %0 : vector<32x32xf32>
    %cst_30 = arith.constant dense<0xFF800000> : vector<32xf32>
    %78 = vector.multi_reduction <maximumf>, %77, %cst_30 [1] : vector<32x32xf32> to vector<32xf32>
    %79 = vector.shape_cast %78 : vector<32xf32> to vector<32x1xf32>
    %80 = vector.broadcast %79 : vector<32x1xf32> to vector<32x32xf32>
    %81 = arith.subf %77, %80 : vector<32x32xf32>
    %82 = math.exp %81 : vector<32x32xf32>
    %cst_31 = arith.constant dense<0.000000e+00> : vector<32xf32>
    %83 = vector.multi_reduction <add>, %82, %cst_31 [1] : vector<32x32xf32> to vector<32xf32>
    %84 = vector.shape_cast %83 : vector<32xf32> to vector<32x1xf32>
    %85 = tpu.reciprocal %84 {approx = true} : vector<32x1xf32> -> vector<32x1xf32>
    %86 = vector.broadcast %85 : vector<32x1xf32> to vector<32x32xf32>
    %87 = arith.mulf %82, %86 : vector<32x32xf32>
    %88 = arith.truncf %87 : vector<32x32xf32> to vector<32x32xbf16>
    %89 = vector.extract_strided_slice %37 {offsets = [0, 64], sizes = [32, 32], strides = [1, 1]} : vector<32x128xbf16> to vector<32x32xbf16>
    %cst_32 = arith.constant dense<0.000000e+00> : vector<32x32xf32>
    %90 = tpu.matmul %88, %89, %cst_32 {dimension_numbers = #tpu.dot_dimension_numbers<[1], [0], [0], [1], [0, 0, 1, 1], [], []>} : vector<32x32xbf16>, vector<32x32xbf16>, vector<32x32xf32> -> vector<32x32xf32>
    %c0_33 = arith.constant 0 : index
    %c64 = arith.constant 64 : index
    %91 = vector.load %arg18[%c0_33, %c64] : memref<32x128xf32, #tpu.memory_space<vmem>>, vector<32x32xf32>
    tpu.vector_store %arg18[%c0_33, %c64], %90 {strides = array<i32>} : memref<32x128xf32, #tpu.memory_space<vmem>>, vector<32x32xf32>,
    %92 = vector.extract_strided_slice %33 {offsets = [0, 96], sizes = [32, 32], strides = [1, 1]} : vector<32x128xbf16> to vector<32x32xbf16>
    %93 = vector.extract_strided_slice %35 {offsets = [0, 96], sizes = [32, 32], strides = [1, 1]} : vector<32x128xbf16> to vector<32x32xbf16>
    %cst_34 = arith.constant dense<0.000000e+00> : vector<32x32xf32>
    %94 = tpu.matmul %92, %93, %cst_34 {dimension_numbers = #tpu.dot_dimension_numbers<[1], [1], [0], [0], [0, 0, 1, 0], [], []>} : vector<32x32xbf16>, vector<32x32xbf16>, vector<32x32xf32> -> vector<32x32xf32>
    %95 = arith.addf %94, %0 : vector<32x32xf32>
    %cst_35 = arith.constant dense<0xFF800000> : vector<32xf32>
    %96 = vector.multi_reduction <maximumf>, %95, %cst_35 [1] : vector<32x32xf32> to vector<32xf32>
    %97 = vector.shape_cast %96 : vector<32xf32> to vector<32x1xf32>
    %98 = vector.broadcast %97 : vector<32x1xf32> to vector<32x32xf32>
    %99 = arith.subf %95, %98 : vector<32x32xf32>
    %100 = math.exp %99 : vector<32x32xf32>
    %cst_36 = arith.constant dense<0.000000e+00> : vector<32xf32>
    %101 = vector.multi_reduction <add>, %100, %cst_36 [1] : vector<32x32xf32> to vector<32xf32>
    %102 = vector.shape_cast %101 : vector<32xf32> to vector<32x1xf32>
    %103 = tpu.reciprocal %102 {approx = true} : vector<32x1xf32> -> vector<32x1xf32>
    %104 = vector.broadcast %103 : vector<32x1xf32> to vector<32x32xf32>
    %105 = arith.mulf %100, %104 : vector<32x32xf32>
    %106 = arith.truncf %105 : vector<32x32xf32> to vector<32x32xbf16>
    %107 = vector.extract_strided_slice %37 {offsets = [0, 96], sizes = [32, 32], strides = [1, 1]} : vector<32x128xbf16> to vector<32x32xbf16>
    %cst_37 = arith.constant dense<0.000000e+00> : vector<32x32xf32>
    %108 = tpu.matmul %106, %107, %cst_37 {dimension_numbers = #tpu.dot_dimension_numbers<[1], [0], [0], [1], [0, 0, 1, 1], [], []>} : vector<32x32xbf16>, vector<32x32xbf16>, vector<32x32xf32> -> vector<32x32xf32>
    %c0_38 = arith.constant 0 : index
    %c96 = arith.constant 96 : index
    %109 = vector.load %arg18[%c0_38, %c96] : memref<32x128xf32, #tpu.memory_space<vmem>>, vector<32x32xf32>
    tpu.vector_store %arg18[%c0_38, %c96], %108 {strides = array<i32>} : memref<32x128xf32, #tpu.memory_space<vmem>>, vector<32x32xf32>,
    %c0_39 = arith.constant 0 : index
    %c0_40 = arith.constant 0 : index
    %110 = vector.load %arg18[%c0_39, %c0_40] : memref<32x128xf32, #tpu.memory_space<vmem>>, vector<32x128xf32>
    %111 = arith.truncf %110 : vector<32x128xf32> to vector<32x128xbf16>
    %c0_41 = arith.constant 0 : index
    %c0_42 = arith.constant 0 : index
    %c0_43 = arith.constant 0 : index
    %112 = vector.load %arg7[%c0_41, %c0_42, %c0_43] : memref<2x128x128xbf16, #tpu.memory_space<vmem>>, vector<1x128x128xbf16>
    %113 = vector.shape_cast %112 : vector<1x128x128xbf16> to vector<128x128xbf16>
    %cst_44 = arith.constant dense<0.000000e+00> : vector<32x128xf32>
    %114 = tpu.matmul %111, %113, %cst_44 {dimension_numbers = #tpu.dot_dimension_numbers<[1], [0], [0], [1], [0, 0, 1, 1], [], []>} : vector<32x128xbf16>, vector<128x128xbf16>, vector<32x128xf32> -> vector<32x128xf32>
    %c0_45 = arith.constant 0 : index
    %c0_46 = arith.constant 0 : index
    %c0_47 = arith.constant 0 : index
    %115 = vector.load %arg8[%c0_45, %c0_46, %c0_47] : memref<2x1x128xf32, #tpu.memory_space<vmem>>, vector<1x1x128xf32>
    %116 = vector.shape_cast %115 : vector<1x1x128xf32> to vector<1x128xf32>
    %117 = vector.broadcast %116 : vector<1x128xf32> to vector<32x128xf32>
    %118 = arith.addf %114, %117 : vector<32x128xf32>
    %119 = arith.addf %118, %23 : vector<32x128xf32>
    %c0_48 = arith.constant 0 : index
    %c0_49 = arith.constant 0 : index
    %c0_50 = arith.constant 0 : index
    %120 = vector.load %arg9[%c0_48, %c0_49, %c0_50] : memref<2x1x128xf32, #tpu.memory_space<vmem>>, vector<1x1x128xf32>
    %121 = vector.shape_cast %120 : vector<1x1x128xf32> to vector<1x128xf32>
    %c0_51 = arith.constant 0 : index
    %c0_52 = arith.constant 0 : index
    %c0_53 = arith.constant 0 : index
    %122 = vector.load %arg10[%c0_51, %c0_52, %c0_53] : memref<2x1x128xf32, #tpu.memory_space<vmem>>, vector<1x1x128xf32>
    %123 = vector.shape_cast %122 : vector<1x1x128xf32> to vector<1x128xf32>
    %cst_54 = arith.constant dense<0.000000e+00> : vector<32xf32>
    %124 = vector.multi_reduction <add>, %119, %cst_54 [1] : vector<32x128xf32> to vector<32xf32>
    %125 = vector.shape_cast %124 : vector<32xf32> to vector<32x1xf32>
    %cst_55 = arith.constant 1.280000e+02 : f32
    %126 = vector.broadcast %cst_55 : f32 to vector<32x1xf32>
    %127 = arith.divf %125, %126 : vector<32x1xf32>
    %128 = vector.broadcast %127 : vector<32x1xf32> to vector<32x128xf32>
    %129 = arith.subf %119, %128 : vector<32x128xf32>
    %130 = arith.mulf %129, %129 : vector<32x128xf32>
    %cst_56 = arith.constant dense<0.000000e+00> : vector<32xf32>
    %131 = vector.multi_reduction <add>, %130, %cst_56 [1] : vector<32x128xf32> to vector<32xf32>
    %132 = vector.shape_cast %131 : vector<32xf32> to vector<32x1xf32>
    %cst_57 = arith.constant 1.280000e+02 : f32
    %133 = vector.broadcast %cst_57 : f32 to vector<32x1xf32>
    %134 = arith.divf %132, %133 : vector<32x1xf32>
    %cst_58 = arith.constant 9.99999996E-13 : f32
    %135 = vector.broadcast %cst_58 : f32 to vector<32x1xf32>
    %136 = arith.addf %134, %135 : vector<32x1xf32>
    %137 = math.rsqrt %136 : vector<32x1xf32>
    %138 = vector.broadcast %137 : vector<32x1xf32> to vector<32x128xf32>
    %139 = arith.mulf %129, %138 : vector<32x128xf32>
    %140 = vector.broadcast %121 : vector<1x128xf32> to vector<32x128xf32>
    %141 = arith.mulf %139, %140 : vector<32x128xf32>
    %142 = vector.broadcast %123 : vector<1x128xf32> to vector<32x128xf32>
    %143 = arith.addf %141, %142 : vector<32x128xf32>
    %144 = arith.truncf %143 : vector<32x128xf32> to vector<32x128xbf16>
    %c0_59 = arith.constant 0 : index
    %c0_60 = arith.constant 0 : index
    %c0_61 = arith.constant 0 : index
    %145 = vector.load %arg11[%c0_59, %c0_60, %c0_61] : memref<2x128x256xbf16, #tpu.memory_space<vmem>>, vector<1x128x256xbf16>
    %146 = vector.shape_cast %145 : vector<1x128x256xbf16> to vector<128x256xbf16>
    %cst_62 = arith.constant dense<0.000000e+00> : vector<32x256xf32>
    %147 = tpu.matmul %144, %146, %cst_62 {dimension_numbers = #tpu.dot_dimension_numbers<[1], [0], [0], [1], [0, 0, 1, 1], [], []>} : vector<32x128xbf16>, vector<128x256xbf16>, vector<32x256xf32> -> vector<32x256xf32>
    %c0_63 = arith.constant 0 : index
    %c0_64 = arith.constant 0 : index
    %c0_65 = arith.constant 0 : index
    %148 = vector.load %arg12[%c0_63, %c0_64, %c0_65] : memref<2x1x256xf32, #tpu.memory_space<vmem>>, vector<1x1x256xf32>
    %149 = vector.shape_cast %148 : vector<1x1x256xf32> to vector<1x256xf32>
    %150 = vector.broadcast %149 : vector<1x256xf32> to vector<32x256xf32>
    %151 = arith.addf %147, %150 : vector<32x256xf32>
    %cst_66 = arith.constant 5.000000e-01 : f32
    %152 = vector.broadcast %cst_66 : f32 to vector<32x256xf32>
    %153 = arith.mulf %152, %151 : vector<32x256xf32>
    %cst_67 = arith.constant 4.471500e-02 : f32
    %154 = vector.broadcast %cst_67 : f32 to vector<32x256xf32>
    %155 = arith.mulf %154, %151 : vector<32x256xf32>
    %156 = arith.mulf %155, %151 : vector<32x256xf32>
    %157 = arith.mulf %156, %151 : vector<32x256xf32>
    %158 = arith.addf %151, %157 : vector<32x256xf32>
    %cst_68 = arith.constant 0.797884583 : f32
    %159 = vector.broadcast %cst_68 : f32 to vector<32x256xf32>
    %160 = arith.mulf %159, %158 : vector<32x256xf32>
    %161 = math.tanh %160 : vector<32x256xf32>
    %cst_69 = arith.constant 1.000000e+00 : f32
    %162 = vector.broadcast %cst_69 : f32 to vector<32x256xf32>
    %163 = arith.addf %162, %161 : vector<32x256xf32>
    %164 = arith.mulf %153, %163 : vector<32x256xf32>
    %165 = arith.truncf %164 : vector<32x256xf32> to vector<32x256xbf16>
    %c0_70 = arith.constant 0 : index
    %c0_71 = arith.constant 0 : index
    %c0_72 = arith.constant 0 : index
    %166 = vector.load %arg13[%c0_70, %c0_71, %c0_72] : memref<2x256x128xbf16, #tpu.memory_space<vmem>>, vector<1x256x128xbf16>
    %167 = vector.shape_cast %166 : vector<1x256x128xbf16> to vector<256x128xbf16>
    %cst_73 = arith.constant dense<0.000000e+00> : vector<32x128xf32>
    %168 = tpu.matmul %165, %167, %cst_73 {dimension_numbers = #tpu.dot_dimension_numbers<[1], [0], [0], [1], [0, 0, 1, 1], [], []>} : vector<32x256xbf16>, vector<256x128xbf16>, vector<32x128xf32> -> vector<32x128xf32>
    %c0_74 = arith.constant 0 : index
    %c0_75 = arith.constant 0 : index
    %c0_76 = arith.constant 0 : index
    %169 = vector.load %arg14[%c0_74, %c0_75, %c0_76] : memref<2x1x128xf32, #tpu.memory_space<vmem>>, vector<1x1x128xf32>
    %170 = vector.shape_cast %169 : vector<1x1x128xf32> to vector<1x128xf32>
    %171 = vector.broadcast %170 : vector<1x128xf32> to vector<32x128xf32>
    %172 = arith.addf %168, %171 : vector<32x128xf32>
    %173 = arith.addf %172, %143 : vector<32x128xf32>
    %c0_77 = arith.constant 0 : index
    %c0_78 = arith.constant 0 : index
    %c0_79 = arith.constant 0 : index
    %174 = vector.load %arg15[%c0_77, %c0_78, %c0_79] : memref<2x1x128xf32, #tpu.memory_space<vmem>>, vector<1x1x128xf32>
    %175 = vector.shape_cast %174 : vector<1x1x128xf32> to vector<1x128xf32>
    %c0_80 = arith.constant 0 : index
    %c0_81 = arith.constant 0 : index
    %c0_82 = arith.constant 0 : index
    %176 = vector.load %arg16[%c0_80, %c0_81, %c0_82] : memref<2x1x128xf32, #tpu.memory_space<vmem>>, vector<1x1x128xf32>
    %177 = vector.shape_cast %176 : vector<1x1x128xf32> to vector<1x128xf32>
    %cst_83 = arith.constant dense<0.000000e+00> : vector<32xf32>
    %178 = vector.multi_reduction <add>, %173, %cst_83 [1] : vector<32x128xf32> to vector<32xf32>
    %179 = vector.shape_cast %178 : vector<32xf32> to vector<32x1xf32>
    %cst_84 = arith.constant 1.280000e+02 : f32
    %180 = vector.broadcast %cst_84 : f32 to vector<32x1xf32>
    %181 = arith.divf %179, %180 : vector<32x1xf32>
    %182 = vector.broadcast %181 : vector<32x1xf32> to vector<32x128xf32>
    %183 = arith.subf %173, %182 : vector<32x128xf32>
    %184 = arith.mulf %183, %183 : vector<32x128xf32>
    %cst_85 = arith.constant dense<0.000000e+00> : vector<32xf32>
    %185 = vector.multi_reduction <add>, %184, %cst_85 [1] : vector<32x128xf32> to vector<32xf32>
    %186 = vector.shape_cast %185 : vector<32xf32> to vector<32x1xf32>
    %cst_86 = arith.constant 1.280000e+02 : f32
    %187 = vector.broadcast %cst_86 : f32 to vector<32x1xf32>
    %188 = arith.divf %186, %187 : vector<32x1xf32>
    %cst_87 = arith.constant 9.99999996E-13 : f32
    %189 = vector.broadcast %cst_87 : f32 to vector<32x1xf32>
    %190 = arith.addf %188, %189 : vector<32x1xf32>
    %191 = math.rsqrt %190 : vector<32x1xf32>
    %192 = vector.broadcast %191 : vector<32x1xf32> to vector<32x128xf32>
    %193 = arith.mulf %183, %192 : vector<32x128xf32>
    %194 = vector.broadcast %175 : vector<1x128xf32> to vector<32x128xf32>
    %195 = arith.mulf %193, %194 : vector<32x128xf32>
    %196 = vector.broadcast %177 : vector<1x128xf32> to vector<32x128xf32>
    %197 = arith.addf %195, %196 : vector<32x128xf32>
    %198 = arith.truncf %197 : vector<32x128xf32> to vector<32x128xbf16>
    %c1 = arith.constant 1 : index
    %c0_88 = arith.constant 0 : index
    %c0_89 = arith.constant 0 : index
    %199 = vector.load %arg5[%c1, %c0_88, %c0_89] : memref<2x128x384xbf16, #tpu.memory_space<vmem>>, vector<1x128x384xbf16>
    %200 = vector.shape_cast %199 : vector<1x128x384xbf16> to vector<128x384xbf16>
    %cst_90 = arith.constant dense<0.000000e+00> : vector<32x384xf32>
    %201 = tpu.matmul %198, %200, %cst_90 {dimension_numbers = #tpu.dot_dimension_numbers<[1], [0], [0], [1], [0, 0, 1, 1], [], []>} : vector<32x128xbf16>, vector<128x384xbf16>, vector<32x384xf32> -> vector<32x384xf32>
    %c1_91 = arith.constant 1 : index
    %c0_92 = arith.constant 0 : index
    %c0_93 = arith.constant 0 : index
    %202 = vector.load %arg6[%c1_91, %c0_92, %c0_93] : memref<2x1x384xf32, #tpu.memory_space<vmem>>, vector<1x1x384xf32>
    %203 = vector.shape_cast %202 : vector<1x1x384xf32> to vector<1x384xf32>
    %204 = vector.broadcast %203 : vector<1x384xf32> to vector<32x384xf32>
    %205 = arith.addf %201, %204 : vector<32x384xf32>
    %206 = vector.extract_strided_slice %205 {offsets = [0, 0], sizes = [32, 128], strides = [1, 1]} : vector<32x384xf32> to vector<32x128xf32>
    %207 = arith.truncf %206 : vector<32x128xf32> to vector<32x128xbf16>
    %208 = vector.extract_strided_slice %205 {offsets = [0, 128], sizes = [32, 128], strides = [1, 1]} : vector<32x384xf32> to vector<32x128xf32>
    %209 = arith.truncf %208 : vector<32x128xf32> to vector<32x128xbf16>
    %210 = vector.extract_strided_slice %205 {offsets = [0, 256], sizes = [32, 128], strides = [1, 1]} : vector<32x384xf32> to vector<32x128xf32>
    %211 = arith.truncf %210 : vector<32x128xf32> to vector<32x128xbf16>
    %212 = vector.extract_strided_slice %207 {offsets = [0, 0], sizes = [32, 32], strides = [1, 1]} : vector<32x128xbf16> to vector<32x32xbf16>
    %213 = vector.extract_strided_slice %209 {offsets = [0, 0], sizes = [32, 32], strides = [1, 1]} : vector<32x128xbf16> to vector<32x32xbf16>
    %cst_94 = arith.constant dense<0.000000e+00> : vector<32x32xf32>
    %214 = tpu.matmul %212, %213, %cst_94 {dimension_numbers = #tpu.dot_dimension_numbers<[1], [1], [0], [0], [0, 0, 1, 0], [], []>} : vector<32x32xbf16>, vector<32x32xbf16>, vector<32x32xf32> -> vector<32x32xf32>
    %215 = arith.addf %214, %0 : vector<32x32xf32>
    %cst_95 = arith.constant dense<0xFF800000> : vector<32xf32>
    %216 = vector.multi_reduction <maximumf>, %215, %cst_95 [1] : vector<32x32xf32> to vector<32xf32>
    %217 = vector.shape_cast %216 : vector<32xf32> to vector<32x1xf32>
    %218 = vector.broadcast %217 : vector<32x1xf32> to vector<32x32xf32>
    %219 = arith.subf %215, %218 : vector<32x32xf32>
    %220 = math.exp %219 : vector<32x32xf32>
    %cst_96 = arith.constant dense<0.000000e+00> : vector<32xf32>
    %221 = vector.multi_reduction <add>, %220, %cst_96 [1] : vector<32x32xf32> to vector<32xf32>
    %222 = vector.shape_cast %221 : vector<32xf32> to vector<32x1xf32>
    %223 = tpu.reciprocal %222 {approx = true} : vector<32x1xf32> -> vector<32x1xf32>
    %224 = vector.broadcast %223 : vector<32x1xf32> to vector<32x32xf32>
    %225 = arith.mulf %220, %224 : vector<32x32xf32>
    %226 = arith.truncf %225 : vector<32x32xf32> to vector<32x32xbf16>
    %227 = vector.extract_strided_slice %211 {offsets = [0, 0], sizes = [32, 32], strides = [1, 1]} : vector<32x128xbf16> to vector<32x32xbf16>
    %cst_97 = arith.constant dense<0.000000e+00> : vector<32x32xf32>
    %228 = tpu.matmul %226, %227, %cst_97 {dimension_numbers = #tpu.dot_dimension_numbers<[1], [0], [0], [1], [0, 0, 1, 1], [], []>} : vector<32x32xbf16>, vector<32x32xbf16>, vector<32x32xf32> -> vector<32x32xf32>
    %c0_98 = arith.constant 0 : index
    %c0_99 = arith.constant 0 : index
    %229 = vector.load %arg18[%c0_98, %c0_99] : memref<32x128xf32, #tpu.memory_space<vmem>>, vector<32x32xf32>
    tpu.vector_store %arg18[%c0_98, %c0_99], %228 {strides = array<i32>} : memref<32x128xf32, #tpu.memory_space<vmem>>, vector<32x32xf32>,
    %230 = vector.extract_strided_slice %207 {offsets = [0, 32], sizes = [32, 32], strides = [1, 1]} : vector<32x128xbf16> to vector<32x32xbf16>
    %231 = vector.extract_strided_slice %209 {offsets = [0, 32], sizes = [32, 32], strides = [1, 1]} : vector<32x128xbf16> to vector<32x32xbf16>
    %cst_100 = arith.constant dense<0.000000e+00> : vector<32x32xf32>
    %232 = tpu.matmul %230, %231, %cst_100 {dimension_numbers = #tpu.dot_dimension_numbers<[1], [1], [0], [0], [0, 0, 1, 0], [], []>} : vector<32x32xbf16>, vector<32x32xbf16>, vector<32x32xf32> -> vector<32x32xf32>
    %233 = arith.addf %232, %0 : vector<32x32xf32>
    %cst_101 = arith.constant dense<0xFF800000> : vector<32xf32>
    %234 = vector.multi_reduction <maximumf>, %233, %cst_101 [1] : vector<32x32xf32> to vector<32xf32>
    %235 = vector.shape_cast %234 : vector<32xf32> to vector<32x1xf32>
    %236 = vector.broadcast %235 : vector<32x1xf32> to vector<32x32xf32>
    %237 = arith.subf %233, %236 : vector<32x32xf32>
    %238 = math.exp %237 : vector<32x32xf32>
    %cst_102 = arith.constant dense<0.000000e+00> : vector<32xf32>
    %239 = vector.multi_reduction <add>, %238, %cst_102 [1] : vector<32x32xf32> to vector<32xf32>
    %240 = vector.shape_cast %239 : vector<32xf32> to vector<32x1xf32>
    %241 = tpu.reciprocal %240 {approx = true} : vector<32x1xf32> -> vector<32x1xf32>
    %242 = vector.broadcast %241 : vector<32x1xf32> to vector<32x32xf32>
    %243 = arith.mulf %238, %242 : vector<32x32xf32>
    %244 = arith.truncf %243 : vector<32x32xf32> to vector<32x32xbf16>
    %245 = vector.extract_strided_slice %211 {offsets = [0, 32], sizes = [32, 32], strides = [1, 1]} : vector<32x128xbf16> to vector<32x32xbf16>
    %cst_103 = arith.constant dense<0.000000e+00> : vector<32x32xf32>
    %246 = tpu.matmul %244, %245, %cst_103 {dimension_numbers = #tpu.dot_dimension_numbers<[1], [0], [0], [1], [0, 0, 1, 1], [], []>} : vector<32x32xbf16>, vector<32x32xbf16>, vector<32x32xf32> -> vector<32x32xf32>
    %c0_104 = arith.constant 0 : index
    %c32_105 = arith.constant 32 : index
    %247 = vector.load %arg18[%c0_104, %c32_105] : memref<32x128xf32, #tpu.memory_space<vmem>>, vector<32x32xf32>
    tpu.vector_store %arg18[%c0_104, %c32_105], %246 {strides = array<i32>} : memref<32x128xf32, #tpu.memory_space<vmem>>, vector<32x32xf32>,
    %248 = vector.extract_strided_slice %207 {offsets = [0, 64], sizes = [32, 32], strides = [1, 1]} : vector<32x128xbf16> to vector<32x32xbf16>
    %249 = vector.extract_strided_slice %209 {offsets = [0, 64], sizes = [32, 32], strides = [1, 1]} : vector<32x128xbf16> to vector<32x32xbf16>
    %cst_106 = arith.constant dense<0.000000e+00> : vector<32x32xf32>
    %250 = tpu.matmul %248, %249, %cst_106 {dimension_numbers = #tpu.dot_dimension_numbers<[1], [1], [0], [0], [0, 0, 1, 0], [], []>} : vector<32x32xbf16>, vector<32x32xbf16>, vector<32x32xf32> -> vector<32x32xf32>
    %251 = arith.addf %250, %0 : vector<32x32xf32>
    %cst_107 = arith.constant dense<0xFF800000> : vector<32xf32>
    %252 = vector.multi_reduction <maximumf>, %251, %cst_107 [1] : vector<32x32xf32> to vector<32xf32>
    %253 = vector.shape_cast %252 : vector<32xf32> to vector<32x1xf32>
    %254 = vector.broadcast %253 : vector<32x1xf32> to vector<32x32xf32>
    %255 = arith.subf %251, %254 : vector<32x32xf32>
    %256 = math.exp %255 : vector<32x32xf32>
    %cst_108 = arith.constant dense<0.000000e+00> : vector<32xf32>
    %257 = vector.multi_reduction <add>, %256, %cst_108 [1] : vector<32x32xf32> to vector<32xf32>
    %258 = vector.shape_cast %257 : vector<32xf32> to vector<32x1xf32>
    %259 = tpu.reciprocal %258 {approx = true} : vector<32x1xf32> -> vector<32x1xf32>
    %260 = vector.broadcast %259 : vector<32x1xf32> to vector<32x32xf32>
    %261 = arith.mulf %256, %260 : vector<32x32xf32>
    %262 = arith.truncf %261 : vector<32x32xf32> to vector<32x32xbf16>
    %263 = vector.extract_strided_slice %211 {offsets = [0, 64], sizes = [32, 32], strides = [1, 1]} : vector<32x128xbf16> to vector<32x32xbf16>
    %cst_109 = arith.constant dense<0.000000e+00> : vector<32x32xf32>
    %264 = tpu.matmul %262, %263, %cst_109 {dimension_numbers = #tpu.dot_dimension_numbers<[1], [0], [0], [1], [0, 0, 1, 1], [], []>} : vector<32x32xbf16>, vector<32x32xbf16>, vector<32x32xf32> -> vector<32x32xf32>
    %c0_110 = arith.constant 0 : index
    %c64_111 = arith.constant 64 : index
    %265 = vector.load %arg18[%c0_110, %c64_111] : memref<32x128xf32, #tpu.memory_space<vmem>>, vector<32x32xf32>
    tpu.vector_store %arg18[%c0_110, %c64_111], %264 {strides = array<i32>} : memref<32x128xf32, #tpu.memory_space<vmem>>, vector<32x32xf32>,
    %266 = vector.extract_strided_slice %207 {offsets = [0, 96], sizes = [32, 32], strides = [1, 1]} : vector<32x128xbf16> to vector<32x32xbf16>
    %267 = vector.extract_strided_slice %209 {offsets = [0, 96], sizes = [32, 32], strides = [1, 1]} : vector<32x128xbf16> to vector<32x32xbf16>
    %cst_112 = arith.constant dense<0.000000e+00> : vector<32x32xf32>
    %268 = tpu.matmul %266, %267, %cst_112 {dimension_numbers = #tpu.dot_dimension_numbers<[1], [1], [0], [0], [0, 0, 1, 0], [], []>} : vector<32x32xbf16>, vector<32x32xbf16>, vector<32x32xf32> -> vector<32x32xf32>
    %269 = arith.addf %268, %0 : vector<32x32xf32>
    %cst_113 = arith.constant dense<0xFF800000> : vector<32xf32>
    %270 = vector.multi_reduction <maximumf>, %269, %cst_113 [1] : vector<32x32xf32> to vector<32xf32>
    %271 = vector.shape_cast %270 : vector<32xf32> to vector<32x1xf32>
    %272 = vector.broadcast %271 : vector<32x1xf32> to vector<32x32xf32>
    %273 = arith.subf %269, %272 : vector<32x32xf32>
    %274 = math.exp %273 : vector<32x32xf32>
    %cst_114 = arith.constant dense<0.000000e+00> : vector<32xf32>
    %275 = vector.multi_reduction <add>, %274, %cst_114 [1] : vector<32x32xf32> to vector<32xf32>
    %276 = vector.shape_cast %275 : vector<32xf32> to vector<32x1xf32>
    %277 = tpu.reciprocal %276 {approx = true} : vector<32x1xf32> -> vector<32x1xf32>
    %278 = vector.broadcast %277 : vector<32x1xf32> to vector<32x32xf32>
    %279 = arith.mulf %274, %278 : vector<32x32xf32>
    %280 = arith.truncf %279 : vector<32x32xf32> to vector<32x32xbf16>
    %281 = vector.extract_strided_slice %211 {offsets = [0, 96], sizes = [32, 32], strides = [1, 1]} : vector<32x128xbf16> to vector<32x32xbf16>
    %cst_115 = arith.constant dense<0.000000e+00> : vector<32x32xf32>
    %282 = tpu.matmul %280, %281, %cst_115 {dimension_numbers = #tpu.dot_dimension_numbers<[1], [0], [0], [1], [0, 0, 1, 1], [], []>} : vector<32x32xbf16>, vector<32x32xbf16>, vector<32x32xf32> -> vector<32x32xf32>
    %c0_116 = arith.constant 0 : index
    %c96_117 = arith.constant 96 : index
    %283 = vector.load %arg18[%c0_116, %c96_117] : memref<32x128xf32, #tpu.memory_space<vmem>>, vector<32x32xf32>
    tpu.vector_store %arg18[%c0_116, %c96_117], %282 {strides = array<i32>} : memref<32x128xf32, #tpu.memory_space<vmem>>, vector<32x32xf32>,
    %c0_118 = arith.constant 0 : index
    %c0_119 = arith.constant 0 : index
    %284 = vector.load %arg18[%c0_118, %c0_119] : memref<32x128xf32, #tpu.memory_space<vmem>>, vector<32x128xf32>
    %285 = arith.truncf %284 : vector<32x128xf32> to vector<32x128xbf16>
    %c1_120 = arith.constant 1 : index
    %c0_121 = arith.constant 0 : index
    %c0_122 = arith.constant 0 : index
    %286 = vector.load %arg7[%c1_120, %c0_121, %c0_122] : memref<2x128x128xbf16, #tpu.memory_space<vmem>>, vector<1x128x128xbf16>
    %287 = vector.shape_cast %286 : vector<1x128x128xbf16> to vector<128x128xbf16>
    %cst_123 = arith.constant dense<0.000000e+00> : vector<32x128xf32>
    %288 = tpu.matmul %285, %287, %cst_123 {dimension_numbers = #tpu.dot_dimension_numbers<[1], [0], [0], [1], [0, 0, 1, 1], [], []>} : vector<32x128xbf16>, vector<128x128xbf16>, vector<32x128xf32> -> vector<32x128xf32>
    %c1_124 = arith.constant 1 : index
    %c0_125 = arith.constant 0 : index
    %c0_126 = arith.constant 0 : index
    %289 = vector.load %arg8[%c1_124, %c0_125, %c0_126] : memref<2x1x128xf32, #tpu.memory_space<vmem>>, vector<1x1x128xf32>
    %290 = vector.shape_cast %289 : vector<1x1x128xf32> to vector<1x128xf32>
    %291 = vector.broadcast %290 : vector<1x128xf32> to vector<32x128xf32>
    %292 = arith.addf %288, %291 : vector<32x128xf32>
    %293 = arith.addf %292, %197 : vector<32x128xf32>
    %c1_127 = arith.constant 1 : index
    %c0_128 = arith.constant 0 : index
    %c0_129 = arith.constant 0 : index
    %294 = vector.load %arg9[%c1_127, %c0_128, %c0_129] : memref<2x1x128xf32, #tpu.memory_space<vmem>>, vector<1x1x128xf32>
    %295 = vector.shape_cast %294 : vector<1x1x128xf32> to vector<1x128xf32>
    %c1_130 = arith.constant 1 : index
    %c0_131 = arith.constant 0 : index
    %c0_132 = arith.constant 0 : index
    %296 = vector.load %arg10[%c1_130, %c0_131, %c0_132] : memref<2x1x128xf32, #tpu.memory_space<vmem>>, vector<1x1x128xf32>
    %297 = vector.shape_cast %296 : vector<1x1x128xf32> to vector<1x128xf32>
    %cst_133 = arith.constant dense<0.000000e+00> : vector<32xf32>
    %298 = vector.multi_reduction <add>, %293, %cst_133 [1] : vector<32x128xf32> to vector<32xf32>
    %299 = vector.shape_cast %298 : vector<32xf32> to vector<32x1xf32>
    %cst_134 = arith.constant 1.280000e+02 : f32
    %300 = vector.broadcast %cst_134 : f32 to vector<32x1xf32>
    %301 = arith.divf %299, %300 : vector<32x1xf32>
    %302 = vector.broadcast %301 : vector<32x1xf32> to vector<32x128xf32>
    %303 = arith.subf %293, %302 : vector<32x128xf32>
    %304 = arith.mulf %303, %303 : vector<32x128xf32>
    %cst_135 = arith.constant dense<0.000000e+00> : vector<32xf32>
    %305 = vector.multi_reduction <add>, %304, %cst_135 [1] : vector<32x128xf32> to vector<32xf32>
    %306 = vector.shape_cast %305 : vector<32xf32> to vector<32x1xf32>
    %cst_136 = arith.constant 1.280000e+02 : f32
    %307 = vector.broadcast %cst_136 : f32 to vector<32x1xf32>
    %308 = arith.divf %306, %307 : vector<32x1xf32>
    %cst_137 = arith.constant 9.99999996E-13 : f32
    %309 = vector.broadcast %cst_137 : f32 to vector<32x1xf32>
    %310 = arith.addf %308, %309 : vector<32x1xf32>
    %311 = math.rsqrt %310 : vector<32x1xf32>
    %312 = vector.broadcast %311 : vector<32x1xf32> to vector<32x128xf32>
    %313 = arith.mulf %303, %312 : vector<32x128xf32>
    %314 = vector.broadcast %295 : vector<1x128xf32> to vector<32x128xf32>
    %315 = arith.mulf %313, %314 : vector<32x128xf32>
    %316 = vector.broadcast %297 : vector<1x128xf32> to vector<32x128xf32>
    %317 = arith.addf %315, %316 : vector<32x128xf32>
    %318 = arith.truncf %317 : vector<32x128xf32> to vector<32x128xbf16>
    %c1_138 = arith.constant 1 : index
    %c0_139 = arith.constant 0 : index
    %c0_140 = arith.constant 0 : index
    %319 = vector.load %arg11[%c1_138, %c0_139, %c0_140] : memref<2x128x256xbf16, #tpu.memory_space<vmem>>, vector<1x128x256xbf16>
    %320 = vector.shape_cast %319 : vector<1x128x256xbf16> to vector<128x256xbf16>
    %cst_141 = arith.constant dense<0.000000e+00> : vector<32x256xf32>
    %321 = tpu.matmul %318, %320, %cst_141 {dimension_numbers = #tpu.dot_dimension_numbers<[1], [0], [0], [1], [0, 0, 1, 1], [], []>} : vector<32x128xbf16>, vector<128x256xbf16>, vector<32x256xf32> -> vector<32x256xf32>
    %c1_142 = arith.constant 1 : index
    %c0_143 = arith.constant 0 : index
    %c0_144 = arith.constant 0 : index
    %322 = vector.load %arg12[%c1_142, %c0_143, %c0_144] : memref<2x1x256xf32, #tpu.memory_space<vmem>>, vector<1x1x256xf32>
    %323 = vector.shape_cast %322 : vector<1x1x256xf32> to vector<1x256xf32>
    %324 = vector.broadcast %323 : vector<1x256xf32> to vector<32x256xf32>
    %325 = arith.addf %321, %324 : vector<32x256xf32>
    %cst_145 = arith.constant 5.000000e-01 : f32
    %326 = vector.broadcast %cst_145 : f32 to vector<32x256xf32>
    %327 = arith.mulf %326, %325 : vector<32x256xf32>
    %cst_146 = arith.constant 4.471500e-02 : f32
    %328 = vector.broadcast %cst_146 : f32 to vector<32x256xf32>
    %329 = arith.mulf %328, %325 : vector<32x256xf32>
    %330 = arith.mulf %329, %325 : vector<32x256xf32>
    %331 = arith.mulf %330, %325 : vector<32x256xf32>
    %332 = arith.addf %325, %331 : vector<32x256xf32>
    %cst_147 = arith.constant 0.797884583 : f32
    %333 = vector.broadcast %cst_147 : f32 to vector<32x256xf32>
    %334 = arith.mulf %333, %332 : vector<32x256xf32>
    %335 = math.tanh %334 : vector<32x256xf32>
    %cst_148 = arith.constant 1.000000e+00 : f32
    %336 = vector.broadcast %cst_148 : f32 to vector<32x256xf32>
    %337 = arith.addf %336, %335 : vector<32x256xf32>
    %338 = arith.mulf %327, %337 : vector<32x256xf32>
    %339 = arith.truncf %338 : vector<32x256xf32> to vector<32x256xbf16>
    %c1_149 = arith.constant 1 : index
    %c0_150 = arith.constant 0 : index
    %c0_151 = arith.constant 0 : index
    %340 = vector.load %arg13[%c1_149, %c0_150, %c0_151] : memref<2x256x128xbf16, #tpu.memory_space<vmem>>, vector<1x256x128xbf16>
    %341 = vector.shape_cast %340 : vector<1x256x128xbf16> to vector<256x128xbf16>
    %cst_152 = arith.constant dense<0.000000e+00> : vector<32x128xf32>
    %342 = tpu.matmul %339, %341, %cst_152 {dimension_numbers = #tpu.dot_dimension_numbers<[1], [0], [0], [1], [0, 0, 1, 1], [], []>} : vector<32x256xbf16>, vector<256x128xbf16>, vector<32x128xf32> -> vector<32x128xf32>
    %c1_153 = arith.constant 1 : index
    %c0_154 = arith.constant 0 : index
    %c0_155 = arith.constant 0 : index
    %343 = vector.load %arg14[%c1_153, %c0_154, %c0_155] : memref<2x1x128xf32, #tpu.memory_space<vmem>>, vector<1x1x128xf32>
    %344 = vector.shape_cast %343 : vector<1x1x128xf32> to vector<1x128xf32>
    %345 = vector.broadcast %344 : vector<1x128xf32> to vector<32x128xf32>
    %346 = arith.addf %342, %345 : vector<32x128xf32>
    %347 = arith.addf %346, %317 : vector<32x128xf32>
    %c1_156 = arith.constant 1 : index
    %c0_157 = arith.constant 0 : index
    %c0_158 = arith.constant 0 : index
    %348 = vector.load %arg15[%c1_156, %c0_157, %c0_158] : memref<2x1x128xf32, #tpu.memory_space<vmem>>, vector<1x1x128xf32>
    %349 = vector.shape_cast %348 : vector<1x1x128xf32> to vector<1x128xf32>
    %c1_159 = arith.constant 1 : index
    %c0_160 = arith.constant 0 : index
    %c0_161 = arith.constant 0 : index
    %350 = vector.load %arg16[%c1_159, %c0_160, %c0_161] : memref<2x1x128xf32, #tpu.memory_space<vmem>>, vector<1x1x128xf32>
    %351 = vector.shape_cast %350 : vector<1x1x128xf32> to vector<1x128xf32>
    %cst_162 = arith.constant dense<0.000000e+00> : vector<32xf32>
    %352 = vector.multi_reduction <add>, %347, %cst_162 [1] : vector<32x128xf32> to vector<32xf32>
    %353 = vector.shape_cast %352 : vector<32xf32> to vector<32x1xf32>
    %cst_163 = arith.constant 1.280000e+02 : f32
    %354 = vector.broadcast %cst_163 : f32 to vector<32x1xf32>
    %355 = arith.divf %353, %354 : vector<32x1xf32>
    %356 = vector.broadcast %355 : vector<32x1xf32> to vector<32x128xf32>
    %357 = arith.subf %347, %356 : vector<32x128xf32>
    %358 = arith.mulf %357, %357 : vector<32x128xf32>
    %cst_164 = arith.constant dense<0.000000e+00> : vector<32xf32>
    %359 = vector.multi_reduction <add>, %358, %cst_164 [1] : vector<32x128xf32> to vector<32xf32>
    %360 = vector.shape_cast %359 : vector<32xf32> to vector<32x1xf32>
    %cst_165 = arith.constant 1.280000e+02 : f32
    %361 = vector.broadcast %cst_165 : f32 to vector<32x1xf32>
    %362 = arith.divf %360, %361 : vector<32x1xf32>
    %cst_166 = arith.constant 9.99999996E-13 : f32
    %363 = vector.broadcast %cst_166 : f32 to vector<32x1xf32>
    %364 = arith.addf %362, %363 : vector<32x1xf32>
    %365 = math.rsqrt %364 : vector<32x1xf32>
    %366 = vector.broadcast %365 : vector<32x1xf32> to vector<32x128xf32>
    %367 = arith.mulf %357, %366 : vector<32x128xf32>
    %368 = vector.broadcast %349 : vector<1x128xf32> to vector<32x128xf32>
    %369 = arith.mulf %367, %368 : vector<32x128xf32>
    %370 = vector.broadcast %351 : vector<1x128xf32> to vector<32x128xf32>
    %371 = arith.addf %369, %370 : vector<32x128xf32>
    %c0_167 = arith.constant 0 : index
    %c0_168 = arith.constant 0 : index
    %372 = vector.load %arg17[%c0_167, %c0_168] : memref<32x128xf32, #tpu.memory_space<vmem>>, vector<32x128xf32>
    tpu.vector_store %arg17[%c0_167, %c0_168], %371 {strides = array<i32>} : memref<32x128xf32, #tpu.memory_space<vmem>>, vector<32x128xf32>,
    return
  }
  func.func @transform_0(%arg0: i32) -> (i32, i32) {
    %c0_i32 = arith.constant 0 : i32
    %c0_i32_0 = arith.constant 0 : i32
    %c0_i32_1 = arith.constant 0 : i32
    return %c0_i32, %c0_i32_0 : i32, i32
  }
  func.func @transform_1(%arg0: i32) -> (i32, i32) {
    %c0_i32 = arith.constant 0 : i32
    %c0_i32_0 = arith.constant 0 : i32
    %c0_i32_1 = arith.constant 0 : i32
    return %c0_i32, %c0_i32_0 : i32, i32
  }
  func.func @transform_2(%arg0: i32) -> (i32, i32) {
    %c0_i32 = arith.constant 0 : i32
    %c0_i32_0 = arith.constant 0 : i32
    %c0_i32_1 = arith.constant 0 : i32
    return %c0_i32, %c0_i32_0 : i32, i32
  }
  func.func @transform_3(%arg0: i32) -> (i32, i32) {
    %c0_i32 = arith.constant 0 : i32
    %c0_i32_0 = arith.constant 0 : i32
    %c0_i32_1 = arith.constant 0 : i32
    return %c0_i32, %c0_i32_0 : i32, i32
  }
  func.func @transform_4(%arg0: i32) -> (i32, i32, i32) {
    %c0_i32 = arith.constant 0 : i32
    %c0_i32_0 = arith.constant 0 : i32
    %c0_i32_1 = arith.constant 0 : i32
    %c0_i32_2 = arith.constant 0 : i32
    return %c0_i32, %c0_i32_0, %c0_i32_1 : i32, i32, i32
  }
  func.func @transform_5(%arg0: i32) -> (i32, i32, i32) {
    %c0_i32 = arith.constant 0 : i32
    %c0_i32_0 = arith.constant 0 : i32
    %c0_i32_1 = arith.constant 0 : i32
    %c0_i32_2 = arith.constant 0 : i32
    return %c0_i32, %c0_i32_0, %c0_i32_1 : i32, i32, i32
  }
  func.func @transform_6(%arg0: i32) -> (i32, i32, i32) {
    %c0_i32 = arith.constant 0 : i32
    %c0_i32_0 = arith.constant 0 : i32
    %c0_i32_1 = arith.constant 0 : i32
    %c0_i32_2 = arith.constant 0 : i32
    return %c0_i32, %c0_i32_0, %c0_i32_1 : i32, i32, i32
  }
  func.func @transform_7(%arg0: i32) -> (i32, i32, i32) {
    %c0_i32 = arith.constant 0 : i32
    %c0_i32_0 = arith.constant 0 : i32
    %c0_i32_1 = arith.constant 0 : i32
    %c0_i32_2 = arith.constant 0 : i32
    return %c0_i32, %c0_i32_0, %c0_i32_1 : i32, i32, i32
  }
  func.func @transform_8(%arg0: i32) -> (i32, i32, i32) {
    %c0_i32 = arith.constant 0 : i32
    %c0_i32_0 = arith.constant 0 : i32
    %c0_i32_1 = arith.constant 0 : i32
    %c0_i32_2 = arith.constant 0 : i32
    return %c0_i32, %c0_i32_0, %c0_i32_1 : i32, i32, i32
  }
  func.func @transform_9(%arg0: i32) -> (i32, i32, i32) {
    %c0_i32 = arith.constant 0 : i32
    %c0_i32_0 = arith.constant 0 : i32
    %c0_i32_1 = arith.constant 0 : i32
    %c0_i32_2 = arith.constant 0 : i32
    return %c0_i32, %c0_i32_0, %c0_i32_1 : i32, i32, i32
  }
  func.func @transform_10(%arg0: i32) -> (i32, i32, i32) {
    %c0_i32 = arith.constant 0 : i32
    %c0_i32_0 = arith.constant 0 : i32
    %c0_i32_1 = arith.constant 0 : i32
    %c0_i32_2 = arith.constant 0 : i32
    return %c0_i32, %c0_i32_0, %c0_i32_1 : i32, i32, i32
  }
  func.func @transform_11(%arg0: i32) -> (i32, i32, i32) {
    %c0_i32 = arith.constant 0 : i32
    %c0_i32_0 = arith.constant 0 : i32
    %c0_i32_1 = arith.constant 0 : i32
    %c0_i32_2 = arith.constant 0 : i32
    return %c0_i32, %c0_i32_0, %c0_i32_1 : i32, i32, i32
  }
  func.func @transform_12(%arg0: i32) -> (i32, i32, i32) {
    %c0_i32 = arith.constant 0 : i32
    %c0_i32_0 = arith.constant 0 : i32
    %c0_i32_1 = arith.constant 0 : i32
    %c0_i32_2 = arith.constant 0 : i32
    return %c0_i32, %c0_i32_0, %c0_i32_1 : i32, i32, i32
  }
  func.func @transform_13(%arg0: i32) -> (i32, i32, i32) {
    %c0_i32 = arith.constant 0 : i32
    %c0_i32_0 = arith.constant 0 : i32
    %c0_i32_1 = arith.constant 0 : i32
    %c0_i32_2 = arith.constant 0 : i32
    return %c0_i32, %c0_i32_0, %c0_i32_1 : i32, i32, i32
  }
  func.func @transform_14(%arg0: i32) -> (i32, i32, i32) {
    %c0_i32 = arith.constant 0 : i32
    %c0_i32_0 = arith.constant 0 : i32
    %c0_i32_1 = arith.constant 0 : i32
    %c0_i32_2 = arith.constant 0 : i32
    return %c0_i32, %c0_i32_0, %c0_i32_1 : i32, i32, i32
  }
  func.func @transform_15(%arg0: i32) -> (i32, i32, i32) {
    %c0_i32 = arith.constant 0 : i32
    %c0_i32_0 = arith.constant 0 : i32
    %c0_i32_1 = arith.constant 0 : i32
    %c0_i32_2 = arith.constant 0 : i32
    return %c0_i32, %c0_i32_0, %c0_i32_1 : i32, i32, i32
  }
  func.func @transform_16(%arg0: i32) -> (i32, i32) {
    %c0_i32 = arith.constant 0 : i32
    %c0_i32_0 = arith.constant 0 : i32
    %c0_i32_1 = arith.constant 0 : i32
    return %c0_i32, %c0_i32_0 : i32, i32
  }
}

</mosaic_0001>

<bundles_post_ra>
// kernel: distilbert_forward.1
= control target key start
LH: loop header
LB: loop body
LE: loop exit
PB: predicated region body
PF: predicated region fallthrough
CT: control target
= control target key end

     0   :  { %s5709_s0 = inlined_call_operand.vmem [shape: f32[32,128], index: 0, kind: input, shape index: {}]   ;;  %s5710_s1 = inlined_call_operand.vmem [shape: f32[32,32], index: 1, kind: input, shape index: {}]   ;;  %s5711_s2 = inlined_call_operand.vmem [shape: f32[1,128], index: 2, kind: input, shape index: {}]   ;;  %s5712_s3 = inlined_call_operand.vmem [shape: f32[1,128], index: 3, kind: input, shape index: {}]   ;;  %s5713_s4 = inlined_call_operand.vmem [shape: bf16[2,128,384], index: 4, kind: input, shape index: {}]   ;;  %s5714_s5 = inlined_call_operand.vmem [shape: f32[2,1,384], index: 5, kind: input, shape index: {}]   ;;  %s5715_s6 = inlined_call_operand.vmem [shape: bf16[2,128,128], index: 6, kind: input, shape index: {}]   ;;  %s5716_s7 = inlined_call_operand.vmem [shape: f32[2,1,128], index: 7, kind: input, shape index: {}]   ;;  %s5717_s8 = inlined_call_operand.vmem [shape: f32[2,1,128], index: 8, kind: input, shape index: {}]   ;;  %s5718_s9 = inlined_call_operand.vmem [shape: f32[2,1,128], index: 9, kind: input, shape index: {}]   ;;  %s5719_s10 = inlined_call_operand.hbm [shape: bf16[2,128,256], index: 10, kind: input, shape index: {}]   ;;  %s5720_s11 = inlined_call_operand.vmem [shape: f32[2,1,256], index: 11, kind: input, shape index: {}]   ;;  %s5721_s12 = inlined_call_operand.hbm [shape: bf16[2,256,128], index: 12, kind: input, shape index: {}]   ;;  %s5722_s13 = inlined_call_operand.vmem [shape: f32[2,1,128], index: 13, kind: input, shape index: {}]   ;;  %s5723_s14 = inlined_call_operand.vmem [shape: f32[2,1,128], index: 14, kind: input, shape index: {}]   ;;  %s5724_s15 = inlined_call_operand.vmem [shape: f32[2,1,128], index: 15, kind: input, shape index: {}]   ;;  %s5725_s16 = inlined_call_operand.vmem [shape: f32[32,128], index: 16, kind: output, shape index: {}]  }
   0x1   :  { %5727 = sst [smem:[#allocation9_spill]] %s5709_s0 }
   0x2   :  { %21 = vsyncpa [#allocation4], 0 }
   0x3   :  { %22 = vsyncpa [#allocation6], 0  ;;  %s4690_s21 = smov [#allocation3]   ;;  %s4642_s25 = scalar_lea.hbm %s5719_s10, 4096 }
   0x4   :  { %s48_s22 = sshll.u32 %s4690_s21, 4  ;;  %p4643_p0 = scmp.ne.s32.totalorder %s5719_s10, %s4642_s25  ;;  %s49_s22 = int_to_ptr.vmem [resolvable:$true] %s48_s22 }
   0x5   :  { %p4646_p1 = scmp.lt.u32.totalorder %s4642_s25, %s5719_s10 }
   0x7   :  { %p4648_p2 = pnand %p4646_p1, %p4643_p0 }
   0x9   :  { %4651 = shalt.err (!%p4648_p2)
}
   0xa   :  { %s4652_s30 = scalar_lea.vmem %s49_s22, 4096  ;;  %p4657_p4 = scmp.lt.s32.totalorder %s49_s22, %s49_s22 }
   0xb   :  { %p4653_p3 = scmp.ne.s32.totalorder %s49_s22, %s4652_s30  ;;  %p4658_p5 = scmp.lt.s32.totalorder %s4652_s30, %s4652_s30 }
   0xd   :  { %p4659_p6 = por %p4658_p5, %p4657_p4 }
   0xf   :  { %p4660_p7 = pnand %p4659_p6, %p4653_p3 }
  0x11   :  { %4663 = shalt.err (!%p4660_p7)
}
  0x12   :  { %s4691_s0 = smov 128   ;;  %s4692_s17 = smov 8  }
  0x13   :  { %54 = dma.hbm_to_vmem [thread:$0]  %s5719_s10, 4096, %s49_s22, [#allocation4], %s4691_s0, %s4691_s0, %s4692_s17  }
  0x14   :  { %s4693_s20 = smov [#allocation5]   ;;  %s4664_s25 = scalar_lea.hbm %s5721_s12, 4096 }
  0x15   :  { %s62_s21 = sshll.u32 %s4693_s20, 4  ;;  %p4665_p8 = scmp.ne.s32.totalorder %s5721_s12, %s4664_s25  ;;  %s63_s21 = int_to_ptr.vmem [resolvable:$true] %s62_s21 }
  0x16   :  { %p4668_p9 = scmp.lt.u32.totalorder %s4664_s25, %s5721_s12 }
  0x18   :  { %p4670_p10 = pnand %p4668_p9, %p4665_p8 }
  0x1a   :  { %4673 = shalt.err (!%p4670_p10)
}
  0x1b   :  { %s4674_s30 = scalar_lea.vmem %s63_s21, 4096  ;;  %p4679_p12 = scmp.lt.s32.totalorder %s63_s21, %s63_s21 }
  0x1c   :  { %p4675_p11 = scmp.ne.s32.totalorder %s63_s21, %s4674_s30  ;;  %p4680_p13 = scmp.lt.s32.totalorder %s4674_s30, %s4674_s30 }
  0x1e   :  { %p4681_p0 = por %p4680_p13, %p4679_p12 }
  0x20   :  { %p4682_p1 = pnand %p4681_p0, %p4675_p11 }
  0x22   :  { %4685 = shalt.err (!%p4682_p1)
}
  0x23   :  { %s4694_s10 = smov 64   ;;  %s4695_s22 = smov 4  }
  0x24   :  { %68 = dma.hbm_to_vmem [thread:$0]  %s5721_s12, 4096, %s63_s21, [#allocation6], %s4694_s10, %s4694_s10, %s4695_s22  }
  0x25   :  { %4686 = dma.done.wait [#allocation4], 4096  }
  0x26   :  { %4687 = vsyncadd [#allocation4], 4294963200 }
  0x27   :  { %4688 = dma.done.wait [#allocation6], 4096  }
  0x28   :  { %4689 = vsyncadd [#allocation6], 4294963200  ;;  %s5728_s20 = sld [smem:[#allocation9_spill]]  ;;  %v4278_v4 = vld [vmem:[%s5713_s4 + $0x4] ss:$12 sps:$4 sm:$0xff]   ;;  %v4696_v39 = vmov 0  }
  0x29   :  { %v4280_v5 = vld [vmem:[%s5713_s4] ss:$12 sps:$4 sm:$0xff]   ;;  %v4281_v6 = vld [vmem:[%s5713_s4 + $0x1c] ss:$12 sps:$4 sm:$0xff]   ;;  %336 = vmatprep.subr.bf16.mxu0 %v4278_v4  ;;  %v4284_v24 = vld [vmem:[%s5713_s4 + $0x18] ss:$12 sps:$4 sm:$0xff]   ;;  %368 = vmatprep.mubr.bf16.mxu0 %v4696_v39 }
  0x2a   :  { %v4283_v7 = vld [vmem:[%s5713_s4 + $0x8] ss:$12 sps:$4 sm:$0xff]   ;;  %337 = vmatpush1.bf16.msra.mxu0 %v4280_v5  ;;  %v4287_v26 = vld [vmem:[%s5713_s4 + $0x20] ss:$12 sps:$4 sm:$0xff]   ;;  %v4288_v27 = vld [vmem:[%s5713_s4 + $0x30] ss:$12 sps:$4 sm:$0xff]  }
  0x2b   :  { %4045 = vmatprep.subr.bf16.mxu1 %v4283_v7  ;;  %338 = vmatprep.subr.bf16.mxu0 %v4281_v6  ;;  %v4285_v25 = vld [vmem:[%s5713_s4 + $0x34] ss:$12 sps:$4 sm:$0xff]   ;;  %v4289_v28 = vld [vmem:[%s5713_s4 + $0x4c] ss:$12 sps:$4 sm:$0xff]   ;;  %v4293_v31 = vld [vmem:[%s5713_s4 + $0x64] ss:$12 sps:$4 sm:$0xff]  }
  0x2c   :  { %4046 = vmatpush3.bf16.msra.mxu1 %v4283_v7  ;;  %v4291_v29 = vld [vmem:[%s5713_s4 + $0x38] ss:$12 sps:$4 sm:$0xff]   ;;  %v4292_v30 = vld [vmem:[%s5713_s4 + $0x48] ss:$12 sps:$4 sm:$0xff]   ;;  %v4295_v32 = vld [vmem:[%s5713_s4 + $0x50] ss:$12 sps:$4 sm:$0xff]  }
  0x2d   :  { %4047 = vmatprep.subr.bf16.mxu1 %v4287_v26  ;;  %v4296_v33 = vld [vmem:[%s5713_s4 + $0x60] ss:$12 sps:$4 sm:$0xff]   ;;  %v4297_v34 = vld [vmem:[%s5713_s4 + $0x7c] ss:$12 sps:$4 sm:$0xff]   ;;  %v4300_v36 = vld [vmem:[%s5713_s4 + $0x78] ss:$12 sps:$4 sm:$0xff]  }
  0x2e   :  { %v86_v0 = vld [vmem:[%s5728_s20] sm:$0xff]  ;;  %v88_v1 = vld [vmem:[%s5728_s20 + $0x10] sm:$0xff]  ;;  %v87_v2 = vld [vmem:[%s5728_s20 + $0x8] sm:$0xff]  ;;  %339 = vmatpush1.bf16.msra.mxu0 %v4284_v24  ;;  %vm444_vm0 = vcmask 261120   ;;  %s4697_s25 = smov 96   ;;  %s4698_s26 = smov 32  }
  0x2f   :  { %92 = vadd.xlane.f32.xlu0 %v86_v0  ;;  %96 = vadd.xlane.f32.xlu1 %v88_v1  ;;  %v89_v3 = vld [vmem:[%s5728_s20 + $0x18] sm:$0xff]  ;;  %v4299_v35 = vld [vmem:[%s5713_s4 + $0x68] ss:$12 sps:$4 sm:$0xff]   ;;  %v4303_v38 = vld [vmem:[%s5713_s4 + $0x80] ss:$12 sps:$4 sm:$0xff]   ;;  %vm809_vm1 = vcmask 523520  }
  0x30   :  { %340 = vmatprep.subr.bf16.mxu0 %v4285_v25  ;;  %4048 = vmatpush3.bf16.msra.mxu1 %v4287_v26  ;;  %v4301_v37 = vld [vmem:[%s5713_s4 + $0x94] ss:$12 sps:$4 sm:$0xff]   ;;  %v4304_v40 = vld [vmem:[%s5713_s4 + $0x90] ss:$12 sps:$4 sm:$0xff]   ;;  %v4305_v41 = vld [vmem:[%s5713_s4 + $0xac] ss:$12 sps:$4 sm:$0xff]  }
  0x31   :  { %4049 = vmatprep.subr.bf16.mxu1 %v4291_v29  ;;  %v4307_v42 = vld [vmem:[%s5713_s4 + $0x98] ss:$12 sps:$4 sm:$0xff]   ;;  %v4308_v43 = vld [vmem:[%s5713_s4 + $0xa8] ss:$12 sps:$4 sm:$0xff]   ;;  %v4309_v44 = vld [vmem:[%s5713_s4 + $0xb0] ss:$12 sps:$4 sm:$0xff]  }
  0x32   :  { %341 = vmatpush1.bf16.msra.mxu0 %v4288_v27  ;;  %v3655_v59 = vld [vmem:[%s5711_s2] ss:$0 sm:$0xff]  ;;  %vm1006_vm2 = vcmask 785920   ;;  %vm1203_vm3 = vcmask 1048320  }
  0x33   :  { %94 = vadd.xlane.f32.xlu0 %v87_v2  ;;  %98 = vadd.xlane.f32.xlu1 %v89_v3 }
  0x34   :  { %342 = vmatprep.subr.bf16.mxu0 %v4289_v28  ;;  %4050 = vmatpush3.bf16.msra.mxu1 %v4291_v29 }
  0x35   :  { %4051 = vmatprep.subr.bf16.mxu1 %v4295_v32 }
  0x36   :  { %343 = vmatpush1.bf16.msra.mxu0 %v4292_v30 }
  0x37   :  { %344 = vmatprep.subr.bf16.mxu0 %v4293_v31 }
  0x38   :  { %4052 = vmatpush3.bf16.msra.mxu1 %v4295_v32 }
  0x39   :  { %4053 = vmatprep.subr.bf16.mxu1 %v4299_v35 }
  0x3a   :  { %345 = vmatpush1.bf16.msra.mxu0 %v4296_v33 }
  0x3b   :  { %346 = vmatprep.subr.bf16.mxu0 %v4297_v34 }
  0x3c   :  { %4054 = vmatpush3.bf16.msra.mxu1 %v4299_v35 }
  0x3d   :  { %4055 = vmatprep.subr.bf16.mxu1 %v4303_v38 }
  0x3e   :  { %347 = vmatpush1.bf16.msra.mxu0 %v4300_v36 }
  0x3f   :  { %348 = vmatprep.subr.bf16.mxu0 %v4301_v37 }
  0x40   :  { %4056 = vmatpush3.bf16.msra.mxu1 %v4303_v38 }
  0x41   :  { %4057 = vmatprep.subr.bf16.mxu1 %v4307_v42 }
  0x42   :  { %349 = vmatpush1.bf16.msra.mxu0 %v4304_v40 }
  0x43   :  { %350 = vmatprep.subr.bf16.mxu0 %v4305_v41 }
  0x44   :  { %4058 = vmatpush3.bf16.msra.mxu1 %v4307_v42 }
  0x45   :  { %4059 = vmatprep.subr.bf16.mxu1 %v4309_v44 }
  0x46   :  { %351 = vmatpush1.bf16.msra.mxu0 %v4308_v43 }
  0x48   :  { %4060 = vmatpush3.bf16.msra.mxu1 %v4309_v44 }
  0xbc   :  { %v93_v8 = vpop.xlane.xlu0 %92  ;;  %v97_v9 = vpop.xlane.xlu1 %96 }
  0xbd   :  { %v101_v10 = vmul.f32 0.0078125, %v93_v8  ;;  %v103_v11 = vmul.f32 0.0078125, %v97_v9 }
  0xbf   :  { %v4834_v12 = vsub.f32 %v86_v0, %v101_v10  ;;  %v4836_v13 = vsub.f32 %v88_v1, %v103_v11  ;;  %v3656_v0 = vld [vmem:[%s5712_s3] ss:$0 sm:$0xff] }
  0xc0   :  { %v95_v14 = vpop.xlane.xlu0 %94  ;;  %v99_v15 = vpop.xlane.xlu1 %98 }
  0xc1   :  { %v102_v16 = vmul.f32 0.0078125, %v95_v14  ;;  %v109_v17 = vmul.f32 %v4834_v12, %v4834_v12  ;;  %v104_v18 = vmul.f32 0.0078125, %v99_v15  ;;  %v111_v19 = vmul.f32 %v4836_v13, %v4836_v13 }
  0xc3   :  { %113 = vadd.xlane.f32.xlu0 %v109_v17  ;;  %v4842_v20 = vsub.f32 %v87_v2, %v102_v16  ;;  %v4844_v21 = vsub.f32 %v89_v3, %v104_v18  ;;  %v191_v16 = vld [vmem:[%s5714_s5] sm:$0x7] }
  0xc5   :  { %v110_v22 = vmul.f32 %v4842_v20, %v4842_v20  ;;  %v112_v23 = vmul.f32 %v4844_v21, %v4844_v21 }
  0xc7   :  { %117 = vadd.xlane.f32.xlu0 %v111_v19  ;;  %115 = vadd.xlane.f32.xlu1 %v110_v22 }
  0xcb   :  { %119 = vadd.xlane.f32.xlu1 %v112_v23 }
 0x150   :  { %v114_v45 = vpop.xlane.xlu0 %113 }
 0x151   :  { %v121_v46 = vmul.f32 0.0078125, %v114_v45 }
 0x153   :  { %v125_v47 = vadd.f32 1e-12, %v121_v46 }
 0x154   :  { %v116_v48 = vpop.xlane.xlu1 %115  ;;  %v118_v49 = vpop.xlane.xlu0 %117 }
 0x155   :  { %4438 = vrsqrt.f32 %v125_v47  ;;  %v122_v50 = vmul.f32 0.0078125, %v116_v48  ;;  %v123_v51 = vmul.f32 0.0078125, %v118_v49 }
 0x157   :  { %v126_v52 = vadd.f32 1e-12, %v122_v50  ;;  %v127_v53 = vadd.f32 1e-12, %v123_v51 }
 0x158   :  { %v120_v54 = vpop.xlane.xlu1 %119 }
 0x159   :  { %4440 = vrsqrt.f32 %v126_v52  ;;  %v124_v55 = vmul.f32 0.0078125, %v120_v54 }
 0x15a   :  { %4442 = vrsqrt.f32 %v127_v53 }
 0x15b   :  { %v128_v56 = vadd.f32 1e-12, %v124_v55  ;;  %v4981_v55 = vld [vmem:[%s5710_s1] sm:$0xff] }
 0x15d   :  { %4444 = vrsqrt.f32 %v128_v56 }
 0x15f   :  { %v4439_v57 = vpop.eup %4438 }
 0x160   :  { %v133_v58 = vmul.f32 %v4439_v57, %v4834_v12  ;;  %v4986_v57 = vld [vmem:[%s5710_s1 + $0x10] sm:$0xff] }
 0x162   :  { %v143_v63 = vmul.f32 %v3655_v59, %v133_v58 }
 0x163   :  { %v4441_v60 = vpop.eup %4440 }
 0x164   :  { %v4443_v61 = vpop.eup %4442  ;;  %v134_v62 = vmul.f32 %v4441_v60, %v4842_v20  ;;  %v4920_v4 = vadd.f32 %v3656_v0, %v143_v63 }
 0x165   :  { %v135_v1 = vmul.f32 %v4443_v61, %v4836_v13  ;;  %v193_v13 = vlaneseq }
 0x166   :  { %v144_v2 = vmul.f32 %v3655_v59, %v134_v62  ;;  %v4997_v62 = vld [vmem:[%s5710_s1 + $0x18] sm:$0xff] }
 0x167   :  { %v4445_v3 = vpop.eup %4444  ;;  %v145_v7 = vmul.f32 %v3655_v59, %v135_v1  ;;  %v4934_v14 = vshrl.u32 %v193_v13, 7 }
 0x168   :  { %v4922_v5 = vadd.f32 %v3656_v0, %v144_v2  ;;  %v136_v6 = vmul.f32 %v4445_v3, %v4844_v21 }
 0x169   :  { %v4927_v10 = vadd.f32 %v3656_v0, %v145_v7  ;;  %v4937_v15 = vsub.s32 0, %v4934_v14  ;;  %v4943_v17 = vsub.s32 1, %v4934_v14  ;;  %v203_v19 = vsub.s32 2, %v4934_v14 }
 0x16a   :  { %v157_v8 = vpack.c.bf16 %v4922_v5, %v4920_v4  ;;  %v146_v9 = vmul.f32 %v3655_v59, %v136_v6  ;;  %v4991_v59 = vld [vmem:[%s5710_s1 + $0x8] sm:$0xff] }
 0x16b   :  { %v196_v18 = vrot.slane %v191_v16, %v4937_v15  ;;  %v200_v21 = vrot.slane %v191_v16, %v4943_v17  ;;  %v204_v27 = vrot.slane %v191_v16, %v203_v19 }
 0x16c   :  { %369 = vmatmul.mubr.bf16.vlgmr.msra.gmra.mrb[0].mxu0 %v157_v8  ;;  %4061 = vmatprep.mubr.bf16.mxu1 %v157_v8  ;;  %v4929_v11 = vadd.f32 %v3656_v0, %v146_v9 }
 0x16d   :  { %378 = vmatprep.mubr.bf16.mxu0 %v4696_v39 }
 0x16e   :  { %v158_v12 = vpack.c.bf16 %v4929_v11, %v4927_v10 }
 0x170   :  { %4062 = vmatmul.mubr.bf16.vlgmr.msra.gmra.mrb[0].mxu1 %v158_v12 }
 0x174   :  { %379 = vmatmul.mubr.bf16.gmra.mrb[4].mxu0 %v158_v12 }
 0x23f   :  { %v370_v20 = vpop.f32.mrb[0].mxu0 }
 0x240   :  { %v372_v22 = vpop.f32.mrb[1].mxu0  ;;  %v371_v24 = vadd.f32 %v370_v20, %v196_v18 }
 0x241   :  { %v374_v23 = vpop.f32.mrb[2].mxu0  ;;  %v373_v28 = vadd.f32 %v372_v22, %v200_v21 }
 0x242   :  { %v375_v25 = vadd.f32 %v374_v23, %v196_v18  ;;  %v376_v26 = vpop.f32.mrb[3].mxu0 }
 0x243   :  { %v377_v29 = vadd.f32 %v376_v26, %v200_v21  ;;  %v4063_v30 = vpop.f32.mrb[0].mxu1 }
 0x244   :  { %v4950_v31 = vpack.c.bf16 %v375_v25, %v371_v24  ;;  %v423_v32 = vpop.f32.mrb[1].mxu1  ;;  %v432_v35 = vadd.f32 %v4063_v30, %v204_v27 }
 0x245   :  { %v4952_v33 = vpack.c.bf16 %v377_v29, %v373_v28  ;;  %v4064_v34 = vpop.f32.mrb[2].mxu1  ;;  %v424_v38 = vadd.f32 %v423_v32, %v204_v27 }
 0x246   :  { %v435_v36 = vadd.f32 %v4064_v34, %v204_v27  ;;  %v426_v37 = vpop.f32.mrb[3].mxu1  ;;  %4069 = vmatprep.mubr.msk.bf16.mxu0 %vm444_vm0, %v4950_v31 }
 0x247   :  { %v427_v40 = vadd.f32 %v426_v37, %v204_v27  ;;  %v380_v41 = vpop.f32.mrb[4].mxu0  ;;  %4253 = vmatprep.subr.msk.bf16.mxu0 %vm444_vm0, %v4952_v33  ;;  %v452_v42 = vsel %vm444_vm0, %v4952_v33, 0 }
 0x248   :  { %v4960_v43 = vpack.c.bf16 %v435_v36, %v432_v35  ;;  %v382_v44 = vpop.f32.mrb[5].mxu0  ;;  %4066 = vmatpush3.bf16.xpose.msra.mxu0 %v452_v42  ;;  %v381_v47 = vadd.f32 %v380_v41, %v196_v18 }
 0x249   :  { %v4962_v45 = vpack.c.bf16 %v427_v40, %v424_v38  ;;  %v384_v46 = vpop.f32.mrb[6].mxu0  ;;  %v383_v50 = vadd.f32 %v382_v44, %v200_v21 }
 0x24a   :  { %v385_v48 = vadd.f32 %v384_v46, %v196_v18  ;;  %v386_v49 = vpop.f32.mrb[7].mxu0 }
 0x24b   :  { %v387_v51 = vadd.f32 %v386_v49, %v200_v21  ;;  %4073 = vmatprep.subr.bf16.mxu1 %v4962_v45 }
 0x24c   :  { %v4965_v52 = vpack.c.bf16 %v385_v48, %v381_v47  ;;  %4074 = vmatpush3.bf16.msra.mxu1 %v4962_v45 }
 0x24d   :  { %v4968_v53 = vpack.c.bf16 %v387_v51, %v383_v50  ;;  %4075 = vmatprep.subr.bf16.mxu1 %v4960_v43 }
 0x24f   :  { %4254 = vmatprep.subr.msk.bf16.mxu0 %vm444_vm0, %v4968_v53  ;;  %v455_v54 = vsel %vm444_vm0, %v4968_v53, 0 }
 0x250   :  { %4068 = vmatpush3.bf16.xpose.msra.mxu0 %v455_v54  ;;  %4076 = vmatpush3.bf16.msra.mxu1 %v4960_v43 }
 0x257   :  { %4070 = vmatmul.mubr.msk.bf16.vlgmr.msra.gmra.mrb[8].mxu0 %vm444_vm0, %v4965_v52 }
 0x32a   :  { %v4071_v56 = vpop.f32.mrb[8].mxu0 }
 0x32b   :  { %v491_v58 = vpop.f32.mrb[9].mxu0  ;;  %v500_v0 = vadd.f32 %v4071_v56, %v4986_v57 }
 0x32c   :  { %v492_v60 = vadd.f32 %v491_v58, %v4981_v55  ;;  %v4072_v61 = vpop.f32.mrb[10].mxu0 }
 0x32d   :  { %v494_v63 = vpop.f32.mrb[11].mxu0  ;;  %v503_v3 = vadd.f32 %v4072_v61, %v4997_v62  ;;  %v512_v7 = vsel %vm444_vm0, %v500_v0, -inf }
 0x32e   :  { %v495_v1 = vadd.f32 %v494_v63, %v4991_v59  ;;  %v506_v2 = vsel %vm444_vm0, %v492_v60, -inf }
 0x32f   :  { %507 = vmax.xlane.f32.xlu0 %v506_v2  ;;  %v515_v8 = vsel %vm444_vm0, %v503_v3, -inf }
 0x330   :  { %v509_v6 = vsel %vm444_vm0, %v495_v1, -inf }
 0x331   :  { %510 = vmax.xlane.f32.xlu1 %v509_v6 }
 0x333   :  { %513 = vmax.xlane.f32.xlu0 %v512_v7 }
 0x335   :  { %516 = vmax.xlane.f32.xlu1 %v515_v8 }
 0x3bc   :  { %v508_v9 = vpop.xlane.xlu0 %507 }
 0x3bd   :  { %v518_v12 = vsub.f32 %v492_v60, %v508_v9 }
 0x3be   :  { %v511_v13 = vpop.xlane.xlu1 %510 }
 0x3bf   :  { %v519_v16 = vsub.f32 %v495_v1, %v511_v13  ;;  %v522_v22 = vmul.f32 1.442695, %v518_v12 }
 0x3c0   :  { %v514_v18 = vpop.xlane.xlu0 %513 }
 0x3c1   :  { %v524_v20 = vmul.f32 1.442695, %v519_v16  ;;  %v520_v21 = vsub.f32 %v500_v0, %v514_v18 }
 0x3c2   :  { %v517_v23 = vpop.xlane.xlu1 %516 }
 0x3c3   :  { %4446 = vpow2.f32 %v524_v20  ;;  %v526_v24 = vmul.f32 1.442695, %v520_v21  ;;  %v521_v25 = vsub.f32 %v503_v3, %v517_v23 }
 0x3c5   :  { %4448 = vpow2.f32 %v526_v24  ;;  %v528_v26 = vmul.f32 1.442695, %v521_v25 }
 0x3c6   :  { %4450 = vpow2.f32 %v522_v22 }
 0x3c7   :  { %4452 = vpow2.f32 %v528_v26 }
 0x3cd   :  { %v4447_v27 = vpop.eup %4446 }
 0x3ce   :  { %v533_v28 = vsel %vm444_vm0, %v4447_v27, 0.0 }
 0x3cf   :  { %v4449_v29 = vpop.eup %4448  ;;  %534 = vadd.xlane.f32.xlu1 %v533_v28 }
 0x3d0   :  { %v4451_v30 = vpop.eup %4450  ;;  %v536_v32 = vsel %vm444_vm0, %v4449_v29, 0.0 }
 0x3d1   :  { %v4453_v34 = vpop.eup %4452  ;;  %537 = vadd.xlane.f32.xlu0 %v536_v32  ;;  %v530_v36 = vsel %vm444_vm0, %v4451_v30, 0.0 }
 0x3d2   :  { %v539_v35 = vsel %vm444_vm0, %v4453_v34, 0.0 }
 0x3d3   :  { %540 = vadd.xlane.f32.xlu1 %v539_v35 }
 0x3d5   :  { %531 = vadd.xlane.f32.xlu0 %v530_v36 }
 0x3e4   :  { %621 = vrot.lane.b32.xlu1 %v4968_v53, %s4697_s25 }
 0x3e8   :  { %613 = vrot.lane.b32.xlu1 %v4950_v31, %s4697_s25 }
 0x3eb   :  { %619 = vrot.lane.b32.xlu0 %v4952_v33, %s4697_s25 }
 0x3ec   :  { %818 = vrot.lane.b32.xlu1 %v4952_v33, %s4694_s10 }
 0x3ef   :  { %615 = vrot.lane.b32.xlu0 %v4965_v52, %s4697_s25 }
 0x3f0   :  { %820 = vrot.lane.b32.xlu1 %v4968_v53, %s4694_s10 }
 0x3f3   :  { %814 = vrot.lane.b32.xlu0 %v4950_v31, %s4694_s10 }
 0x3f4   :  { %816 = vrot.lane.b32.xlu1 %v4965_v52, %s4694_s10 }
 0x45c   :  { %v535_v37 = vpop.xlane.xlu1 %534 }
 0x45d   :  { %4454 = vrcp.f32 %v535_v37 }
 0x45e   :  { %v538_v38 = vpop.xlane.xlu0 %537 }
 0x460   :  { %v541_v40 = vpop.xlane.xlu1 %540 }
 0x461   :  { %4456 = vrcp.f32 %v541_v40 }
 0x462   :  { %4458 = vrcp.f32 %v538_v38  ;;  %v532_v41 = vpop.xlane.xlu0 %531 }
 0x463   :  { %4460 = vrcp.f32 %v532_v41 }
 0x464   :  { %v622_v50 = vpop.permute.xlu1 %621 }
 0x465   :  { %v633_v0 = vsel %vm444_vm0, %v622_v50, 0 }
 0x466   :  { %v620_v42 = vpop.permute.xlu0 %619 }
 0x467   :  { %4255 = vmatprep.subr.msk.bf16.mxu1 %vm444_vm0, %v620_v42  ;;  %v4455_v44 = vpop.eup %4454  ;;  %v630_v63 = vsel %vm444_vm0, %v620_v42, 0 }
 0x468   :  { %v547_v54 = vmul.f32 %v4455_v44, %v4447_v27  ;;  %v614_v61 = vpop.permute.xlu1 %613 }
 0x46a   :  { %v616_v2 = vpop.permute.xlu0 %615 }
 0x46b   :  { %v4457_v46 = vpop.eup %4456 }
 0x46c   :  { %v4459_v47 = vpop.eup %4458  ;;  %v549_v49 = vmul.f32 %v4457_v46, %v4453_v34  ;;  %v819_v1 = vpop.permute.xlu1 %818 }
 0x46d   :  { %v4461_v48 = vpop.eup %4460  ;;  %v548_v56 = vmul.f32 %v4459_v47, %v4449_v29  ;;  %v829_v6 = vsel %vm444_vm0, %v819_v1, 0 }
 0x46e   :  { %v546_v51 = vmul.f32 %v4461_v48, %v4451_v30  ;;  %v815_v3 = vpop.permute.xlu0 %814 }
 0x46f   :  { %v551_v60 = vpack.c.bf16 %v549_v49, %v548_v56 }
 0x470   :  { %v550_v58 = vpack.c.bf16 %v547_v54, %v546_v51  ;;  %v821_v7 = vpop.permute.xlu1 %820 }
 0x471   :  { %v832_v8 = vsel %vm444_vm0, %v821_v7, 0 }
 0x472   :  { %4077 = vmatprep.mubr.msk.bf16.mxu1 %vm444_vm0, %v550_v58 }
 0x473   :  { %4078 = vmatmul.mubr.msk.bf16.vlgmr.msra.gmra.mrb[4].mxu1 %vm444_vm0, %v551_v60 }
 0x474   :  { %4082 = vmatpush3.bf16.xpose.msra.mxu1 %v630_v63  ;;  %4085 = vmatprep.mubr.msk.bf16.mxu1 %vm444_vm0, %v614_v61  ;;  %v817_v9 = vpop.permute.xlu1 %816 }
 0x475   :  { %4256 = vmatprep.subr.msk.bf16.mxu1 %vm444_vm0, %v622_v50 }
 0x47c   :  { %4084 = vmatpush3.bf16.xpose.msra.mxu1 %v633_v0 }
 0x47d   :  { %4257 = vmatprep.subr.msk.bf16.mxu1 %vm444_vm0, %v819_v1 }
 0x483   :  { %4086 = vmatmul.mubr.msk.bf16.vlgmr.msra.gmra.mrb[8].mxu1 %vm444_vm0, %v616_v2 }
 0x484   :  { %4098 = vmatpush3.bf16.xpose.msra.mxu1 %v829_v6  ;;  %4101 = vmatprep.mubr.msk.bf16.mxu1 %vm444_vm0, %v815_v3 }
 0x485   :  { %4258 = vmatprep.subr.msk.bf16.mxu1 %vm444_vm0, %v821_v7 }
 0x48c   :  { %4100 = vmatpush3.bf16.xpose.msra.mxu1 %v832_v8 }
 0x493   :  { %4102 = vmatmul.mubr.msk.bf16.vlgmr.msra.gmra.mrb[12].mxu1 %vm444_vm0, %v817_v9 }
 0x546   :  { %v4079_v12 = vpop.f32.mrb[4].mxu1 }
 0x547   :  { %609 = vst.msk [vmem:[#allocation2 + $0x10] sm:$0xff] %vm444_vm0, %v4079_v12  ;;  %v592_v13 = vpop.f32.mrb[5].mxu1 }
 0x548   :  { %607 = vst.msk [vmem:[#allocation2] sm:$0xff] %vm444_vm0, %v592_v13  ;;  %v4080_v16 = vpop.f32.mrb[6].mxu1 }
 0x549   :  { %610 = vst.msk [vmem:[#allocation2 + $0x18] sm:$0xff] %vm444_vm0, %v4080_v16  ;;  %v595_v18 = vpop.f32.mrb[7].mxu1 }
 0x54a   :  { %608 = vst.msk [vmem:[#allocation2 + $0x8] sm:$0xff] %vm444_vm0, %v595_v18 }
 0x556   :  { %v4087_v20 = vpop.f32.mrb[8].mxu1 }
 0x557   :  { %v669_v21 = vpop.f32.mrb[9].mxu1  ;;  %v5070_v6 = vadd.f32 %v4087_v20, %v4986_v57 }
 0x558   :  { %v4088_v22 = vpop.f32.mrb[10].mxu1  ;;  %v670_v3 = vadd.f32 %v669_v21, %v4981_v55 }
 0x559   :  { %v672_v23 = vpop.f32.mrb[11].mxu1 }
 0x55a   :  { %v684_v7 = vsel %vm444_vm0, %v670_v3, -inf  ;;  %v673_v8 = vadd.f32 %v672_v23, %v4991_v59 }
 0x566   :  { %v4103_v24 = vpop.f32.mrb[12].mxu1 }
 0x567   :  { %v868_v25 = vpop.f32.mrb[13].mxu1  ;;  %v877_v29 = vadd.f32 %v4103_v24, %v4986_v57 }
 0x568   :  { %v869_v26 = vadd.f32 %v868_v25, %v4981_v55  ;;  %v4104_v27 = vpop.f32.mrb[14].mxu1 }
 0x569   :  { %v871_v28 = vpop.f32.mrb[15].mxu1  ;;  %v880_v35 = vadd.f32 %v4104_v27, %v4997_v62  ;;  %v889_v36 = vsel %vm444_vm0, %v877_v29, -inf }
 0x56a   :  { %v872_v30 = vadd.f32 %v871_v28, %v4991_v59  ;;  %v883_v32 = vsel %vm444_vm0, %v869_v26, -inf }
 0x56b   :  { %884 = vmax.xlane.f32.xlu0 %v883_v32  ;;  %v892_v37 = vsel %vm444_vm0, %v880_v35, -inf }
 0x56c   :  { %v886_v34 = vsel %vm444_vm0, %v872_v30, -inf }
 0x56d   :  { %887 = vmax.xlane.f32.xlu1 %v886_v34 }
 0x56f   :  { %890 = vmax.xlane.f32.xlu0 %v889_v36 }
 0x573   :  { %893 = vmax.xlane.f32.xlu0 %v892_v37 }
 0x57e   :  { %931 = vrot.lane.b32.xlu1 %v4960_v43, %s4694_s10 }
 0x5f8   :  { %v885_v38 = vpop.xlane.xlu0 %884 }
 0x5f9   :  { %v895_v40 = vsub.f32 %v869_v26, %v885_v38 }
 0x5fa   :  { %v888_v41 = vpop.xlane.xlu1 %887 }
 0x5fb   :  { %v899_v46 = vmul.f32 1.442695, %v895_v40  ;;  %v896_v47 = vsub.f32 %v872_v30, %v888_v41 }
 0x5fc   :  { %v891_v42 = vpop.xlane.xlu0 %890 }
 0x5fd   :  { %v897_v44 = vsub.f32 %v877_v29, %v891_v42  ;;  %v901_v51 = vmul.f32 1.442695, %v896_v47 }
 0x5fe   :  { %v932_v9 = vpop.permute.xlu1 %931 }
 0x5ff   :  { %v903_v48 = vmul.f32 1.442695, %v897_v44 }
 0x600   :  { %v894_v49 = vpop.xlane.xlu0 %893 }
 0x601   :  { %4462 = vpow2.f32 %v903_v48  ;;  %v898_v50 = vsub.f32 %v880_v35, %v894_v49 }
 0x602   :  { %4464 = vpow2.f32 %v899_v46 }
 0x603   :  { %v905_v54 = vmul.f32 1.442695, %v898_v50 }
 0x605   :  { %4466 = vpow2.f32 %v905_v54 }
 0x606   :  { %4468 = vpow2.f32 %v901_v51 }
 0x60b   :  { %v4463_v56 = vpop.eup %4462 }
 0x60c   :  { %v913_v58 = vsel %vm444_vm0, %v4463_v56, 0.0  ;;  %v4465_v60 = vpop.eup %4464 }
 0x60d   :  { %914 = vadd.xlane.f32.xlu0 %v913_v58  ;;  %v907_v63 = vsel %vm444_vm0, %v4465_v60, 0.0 }
 0x60f   :  { %v4467_v61 = vpop.eup %4466 }
 0x610   :  { %v916_v0 = vsel %vm444_vm0, %v4467_v61, 0.0  ;;  %v4469_v1 = vpop.eup %4468 }
 0x611   :  { %908 = vadd.xlane.f32.xlu0 %v907_v63  ;;  %917 = vadd.xlane.f32.xlu1 %v916_v0  ;;  %v910_v2 = vsel %vm444_vm0, %v4469_v1, 0.0 }
 0x615   :  { %911 = vadd.xlane.f32.xlu1 %v910_v2 }
 0x626   :  { %1015 = vrot.lane.b32.xlu1 %v4952_v33, %s4698_s26  ;;  %v5074_v33 = vadd.f32 %v4088_v22, %v4997_v62 }
 0x627   :  { %929 = vrot.lane.b32.xlu0 %v4962_v45, %s4694_s10 }
 0x62a   :  { %1017 = vrot.lane.b32.xlu1 %v4968_v53, %s4698_s26  ;;  %v690_v53 = vsel %vm444_vm0, %v5070_v6, -inf }
 0x62b   :  { %1011 = vrot.lane.b32.xlu0 %v4950_v31, %s4698_s26  ;;  %v693_v31 = vsel %vm444_vm0, %v5074_v33, -inf }
 0x62e   :  { %1013 = vrot.lane.b32.xlu1 %v4965_v52, %s4698_s26  ;;  %v687_v52 = vsel %vm444_vm0, %v673_v8, -inf }
 0x64a   :  { %685 = vmax.xlane.f32.xlu0 %v684_v7 }
 0x64e   :  { %691 = vmax.xlane.f32.xlu0 %v690_v53 }
 0x652   :  { %694 = vmax.xlane.f32.xlu0 %v693_v31  ;;  %688 = vmax.xlane.f32.xlu1 %v687_v52 }
 0x69a   :  { %v915_v12 = vpop.xlane.xlu0 %914 }
 0x69e   :  { %v918_v13 = vpop.xlane.xlu1 %917  ;;  %v909_v16 = vpop.xlane.xlu0 %908 }
 0x69f   :  { %4470 = vrcp.f32 %v918_v13 }
 0x6a0   :  { %4472 = vrcp.f32 %v909_v16 }
 0x6a1   :  { %4474 = vrcp.f32 %v915_v12 }
 0x6a2   :  { %v912_v18 = vpop.xlane.xlu1 %911  ;;  %v930_v20 = vpop.permute.xlu0 %929 }
 0x6a3   :  { %4476 = vrcp.f32 %v912_v18  ;;  %4105 = vmatprep.subr.bf16.mxu1 %v930_v20 }
 0x6a4   :  { %4106 = vmatpush3.bf16.msra.mxu1 %v930_v20 }
 0x6a5   :  { %4107 = vmatprep.subr.bf16.mxu1 %v932_v9 }
 0x6a6   :  { %v1016_v21 = vpop.permute.xlu1 %1015  ;;  %v1012_v34 = vpop.permute.xlu0 %1011 }
 0x6a7   :  { %v1026_v35 = vsel %vm444_vm0, %v1016_v21, 0 }
 0x6a8   :  { %4108 = vmatpush3.bf16.msra.mxu1 %v932_v9 }
 0x6a9   :  { %4259 = vmatprep.subr.msk.bf16.mxu1 %vm444_vm0, %v1016_v21  ;;  %v4471_v22 = vpop.eup %4470 }
 0x6aa   :  { %v4473_v23 = vpop.eup %4472  ;;  %v926_v26 = vmul.f32 %v4471_v22, %v4467_v61  ;;  %v1018_v36 = vpop.permute.xlu1 %1017 }
 0x6ab   :  { %v4475_v24 = vpop.eup %4474  ;;  %v923_v27 = vmul.f32 %v4473_v23, %v4465_v60  ;;  %v1029_v37 = vsel %vm444_vm0, %v1018_v36, 0 }
 0x6ac   :  { %v925_v29 = vmul.f32 %v4475_v24, %v4463_v56 }
 0x6ad   :  { %v4477_v25 = vpop.eup %4476 }
 0x6ae   :  { %v924_v28 = vmul.f32 %v4477_v25, %v4469_v1  ;;  %v928_v32 = vpack.c.bf16 %v926_v26, %v925_v29  ;;  %v1014_v38 = vpop.permute.xlu1 %1013 }
 0x6b0   :  { %v927_v30 = vpack.c.bf16 %v924_v28, %v923_v27 }
 0x6b2   :  { %4109 = vmatprep.mubr.msk.bf16.mxu1 %vm444_vm0, %v927_v30 }
 0x6b3   :  { %4110 = vmatmul.mubr.msk.bf16.vlgmr.msra.gmra.mrb[16].mxu1 %vm444_vm0, %v928_v32 }
 0x6b4   :  { %4114 = vmatpush3.bf16.xpose.msra.mxu1 %v1026_v35  ;;  %4117 = vmatprep.mubr.msk.bf16.mxu1 %vm444_vm0, %v1012_v34 }
 0x6b5   :  { %4260 = vmatprep.subr.msk.bf16.mxu1 %vm444_vm0, %v1018_v36 }
 0x6bc   :  { %4116 = vmatpush3.bf16.xpose.msra.mxu1 %v1029_v37 }
 0x6c3   :  { %4118 = vmatmul.mubr.msk.bf16.vlgmr.msra.gmra.mrb[20].mxu1 %vm444_vm0, %v1014_v38 }
 0x6c4   :  { %1546 = vmatprep.mubr.bf16.mxu1 %v4696_v39 }
 0x6d7   :  { %v686_v40 = vpop.xlane.xlu0 %685 }
 0x6d8   :  { %v696_v49 = vsub.f32 %v670_v3, %v686_v40 }
 0x6da   :  { %v700_v54 = vmul.f32 1.442695, %v696_v49 }
 0x6db   :  { %v692_v47 = vpop.xlane.xlu0 %691 }
 0x6dc   :  { %v698_v56 = vsub.f32 %v5070_v6, %v692_v47  ;;  %4478 = vpow2.f32 %v700_v54 }
 0x6de   :  { %v704_v61 = vmul.f32 1.442695, %v698_v56 }
 0x6df   :  { %v689_v48 = vpop.xlane.xlu1 %688  ;;  %v695_v51 = vpop.xlane.xlu0 %694 }
 0x6e0   :  { %v697_v50 = vsub.f32 %v673_v8, %v689_v48  ;;  %v699_v60 = vsub.f32 %v5074_v33, %v695_v51 }
 0x6e2   :  { %v702_v58 = vmul.f32 1.442695, %v697_v50  ;;  %v706_v0 = vmul.f32 1.442695, %v699_v60 }
 0x6e4   :  { %4480 = vpow2.f32 %v702_v58 }
 0x6e5   :  { %4482 = vpow2.f32 %v704_v61 }
 0x6e6   :  { %4484 = vpow2.f32 %v706_v0  ;;  %v4479_v9 = vpop.eup %4478 }
 0x6ee   :  { %v4481_v12 = vpop.eup %4480 }
 0x6ef   :  { %v711_v13 = vsel %vm444_vm0, %v4481_v12, 0.0 }
 0x786   :  { %v5091_v41 = vpop.f32.mrb[16].mxu1 }
 0x787   :  { %v5093_v42 = vpop.f32.mrb[17].mxu1 }
 0x788   :  { %v5095_v44 = vpop.f32.mrb[18].mxu1 }
 0x789   :  { %v5097_v46 = vpop.f32.mrb[19].mxu1 }
 0x796   :  { %v4119_v63 = vpop.f32.mrb[20].mxu1 }
 0x797   :  { %v1065_v1 = vpop.f32.mrb[21].mxu1  ;;  %v1074_v3 = vadd.f32 %v4119_v63, %v4986_v57  ;;  %v708_v57 = vsel %vm444_vm0, %v4479_v9, 0.0 }
 0x798   :  { %v1066_v2 = vadd.f32 %v1065_v1, %v4981_v55  ;;  %v4120_v7 = vpop.f32.mrb[22].mxu1 }
 0x799   :  { %v1068_v53 = vpop.f32.mrb[23].mxu1  ;;  %v1077_v33 = vadd.f32 %v4120_v7, %v4997_v62  ;;  %v1086_v52 = vsel %vm444_vm0, %v1074_v3, -inf }
 0x79a   :  { %v1069_v8 = vadd.f32 %v1068_v53, %v4991_v59  ;;  %v1080_v6 = vsel %vm444_vm0, %v1066_v2, -inf  ;;  %v5110_v59 = vpop.eup %4482 }
 0x79b   :  { %1081 = vmax.xlane.f32.xlu0 %v1080_v6  ;;  %v1089_v55 = vsel %vm444_vm0, %v1077_v33, -inf  ;;  %v5113_v16 = vpop.eup %4484  ;;  %v714_v62 = vsel %vm444_vm0, %v5110_v59, 0.0 }
 0x79c   :  { %v1083_v31 = vsel %vm444_vm0, %v1069_v8, -inf  ;;  %v717_v18 = vsel %vm444_vm0, %v5113_v16, 0.0 }
 0x79d   :  { %1084 = vmax.xlane.f32.xlu1 %v1083_v31 }
 0x79f   :  { %1087 = vmax.xlane.f32.xlu0 %v1086_v52 }
 0x7a1   :  { %1090 = vmax.xlane.f32.xlu1 %v1089_v55 }
 0x7a3   :  { %709 = vadd.xlane.f32.xlu0 %v708_v57 }
 0x7a5   :  { %712 = vadd.xlane.f32.xlu1 %v711_v13 }
 0x7a7   :  { %715 = vadd.xlane.f32.xlu0 %v714_v62 }
 0x7a9   :  { %718 = vadd.xlane.f32.xlu1 %v717_v18 }
 0x7ba   :  { %734 = vrot.lane.b32.xlu1 %v4960_v43, %s4697_s25 }
 0x7be   :  { %1126 = vrot.lane.b32.xlu1 %v4962_v45, %s4698_s26 }
 0x828   :  { %v1082_v20 = vpop.xlane.xlu0 %1081 }
 0x829   :  { %v1092_v21 = vsub.f32 %v1066_v2, %v1082_v20 }
 0x82a   :  { %v1085_v22 = vpop.xlane.xlu1 %1084 }
 0x82b   :  { %v1096_v23 = vmul.f32 1.442695, %v1092_v21  ;;  %v1093_v25 = vsub.f32 %v1069_v8, %v1085_v22  ;;  %v4310_v21 = vld [vmem:[%s5715_s6] sm:$0xff]   ;;  %v4311_v22 = vld [vmem:[%s5715_s6 + $0x8] sm:$0xff]  }
 0x82c   :  { %v1088_v24 = vpop.xlane.xlu0 %1087 }
 0x82d   :  { %v1094_v26 = vsub.f32 %v1074_v3, %v1088_v24  ;;  %4486 = vpow2.f32 %v1096_v23  ;;  %v1098_v32 = vmul.f32 1.442695, %v1093_v25  ;;  %v4312_v23 = vld [vmem:[%s5715_s6 + $0x10] sm:$0xff]   ;;  %v4313_v25 = vld [vmem:[%s5715_s6 + $0x18] sm:$0xff]  }
 0x82e   :  { %v1091_v27 = vpop.xlane.xlu1 %1090 }
 0x82f   :  { %v1100_v28 = vmul.f32 1.442695, %v1094_v26  ;;  %v1095_v29 = vsub.f32 %v1077_v33, %v1091_v27 }
 0x830   :  { %v710_v30 = vpop.xlane.xlu0 %709 }
 0x831   :  { %4488 = vpow2.f32 %v1100_v28  ;;  %v1102_v34 = vmul.f32 1.442695, %v1095_v29  ;;  %v4314_v29 = vld [vmem:[%s5715_s6 + $0x20] sm:$0xff]  }
 0x832   :  { %4490 = vrcp.f32 %v710_v30  ;;  %v713_v35 = vpop.xlane.xlu1 %712 }
 0x833   :  { %4492 = vpow2.f32 %v1102_v34 }
 0x834   :  { %4494 = vrcp.f32 %v713_v35  ;;  %v716_v0 = vpop.xlane.xlu0 %715 }
 0x835   :  { %4496 = vpow2.f32 %v1098_v32  ;;  %v4315_v32 = vld [vmem:[%s5715_s6 + $0x28] sm:$0xff]  }
 0x836   :  { %v719_v61 = vpop.xlane.xlu1 %718 }
 0x837   :  { %v4487_v36 = vpop.eup %4486  ;;  %4498 = vrcp.f32 %v719_v61 }
 0x838   :  { %v1104_v56 = vsel %vm444_vm0, %v4487_v36, 0.0  ;;  %4500 = vrcp.f32 %v716_v0 }
 0x83a   :  { %v735_v63 = vpop.permute.xlu1 %734 }
 0x83b   :  { %v4489_v37 = vpop.eup %4488 }
 0x83c   :  { %v4491_v38 = vpop.eup %4490  ;;  %v1110_v40 = vsel %vm444_vm0, %v4489_v37, 0.0 }
 0x83d   :  { %v4493_v47 = vpop.eup %4492  ;;  %1111 = vadd.xlane.f32.xlu0 %v1110_v40  ;;  %v724_v51 = vmul.f32 %v4491_v38, %v4479_v9  ;;  %v4317_v38 = vld [vmem:[%s5715_s6 + $0x38] sm:$0xff]  }
 0x83e   :  { %v4495_v48 = vpop.eup %4494  ;;  %v1113_v49 = vsel %vm444_vm0, %v4493_v47, 0.0  ;;  %v1127_v1 = vpop.permute.xlu1 %1126 }
 0x83f   :  { %v4497_v50 = vpop.eup %4496  ;;  %1114 = vadd.xlane.f32.xlu1 %v1113_v49  ;;  %v725_v54 = vmul.f32 %v4495_v48, %v4481_v12 }
 0x840   :  { %v1107_v60 = vsel %vm444_vm0, %v4497_v50, 0.0 }
 0x841   :  { %1105 = vadd.xlane.f32.xlu0 %v1104_v56  ;;  %v728_v58 = vpack.c.bf16 %v725_v54, %v724_v51  ;;  %v4499_v8 = vpop.eup %4498 }
 0x843   :  { %4093 = vmatprep.mubr.msk.bf16.mxu0 %vm444_vm0, %v728_v58  ;;  %1108 = vadd.xlane.f32.xlu1 %v1107_v60 }
 0x854   :  { %1128 = vrot.lane.b32.xlu1 %v4960_v43, %s4698_s26  ;;  %v4501_v43 = vpop.eup %4500 }
 0x855   :  { %v726_v33 = vmul.f32 %v4501_v43, %v5110_v59 }
 0x857   :  { %732 = vrot.lane.b32.xlu0 %v4962_v45, %s4697_s25  ;;  %v727_v45 = vmul.f32 %v4499_v8, %v5113_v16 }
 0x859   :  { %v729_v52 = vpack.c.bf16 %v727_v45, %v726_v33 }
 0x8ca   :  { %v1112_v2 = vpop.xlane.xlu0 %1111 }
 0x8cc   :  { %v1115_v7 = vpop.xlane.xlu1 %1114 }
 0x8ce   :  { %v1106_v53 = vpop.xlane.xlu0 %1105 }
 0x8cf   :  { %4502 = vrcp.f32 %v1106_v53 }
 0x8d0   :  { %4504 = vrcp.f32 %v1115_v7  ;;  %v1109_v3 = vpop.xlane.xlu1 %1108 }
 0x8d1   :  { %4506 = vrcp.f32 %v1109_v3 }
 0x8d2   :  { %4508 = vrcp.f32 %v1112_v2  ;;  %v733_v6 = vpop.permute.xlu0 %732  ;;  %v3697_v2 = vld [vmem:[%s5716_s7] ss:$0 sm:$0xff] }
 0x8d3   :  { %4089 = vmatprep.subr.bf16.mxu0 %v733_v6 }
 0x8d4   :  { %4090 = vmatpush3.bf16.msra.mxu0 %v733_v6  ;;  %v1129_v57 = vpop.permute.xlu1 %1128 }
 0x8d5   :  { %4091 = vmatprep.subr.bf16.mxu0 %v735_v63 }
 0x8d8   :  { %4092 = vmatpush3.bf16.msra.mxu0 %v735_v63 }
 0x8d9   :  { %v4503_v31 = vpop.eup %4502  ;;  %4121 = vmatprep.subr.bf16.mxu0 %v1127_v1 }
 0x8da   :  { %v4505_v9 = vpop.eup %4504  ;;  %v1120_v13 = vmul.f32 %v4503_v31, %v4487_v36 }
 0x8db   :  { %v4507_v55 = vpop.eup %4506  ;;  %4094 = vmatmul.mubr.msk.bf16.vlgmr.msra.gmra.mrb[12].mxu0 %vm444_vm0, %v729_v52  ;;  %v1123_v18 = vmul.f32 %v4505_v9, %v4493_v47 }
 0x8dc   :  { %v4509_v12 = vpop.eup %4508  ;;  %4122 = vmatpush3.bf16.msra.mxu0 %v1127_v1  ;;  %v1121_v62 = vmul.f32 %v4507_v55, %v4497_v50 }
 0x8dd   :  { %4123 = vmatprep.subr.bf16.mxu0 %v1129_v57  ;;  %v1122_v16 = vmul.f32 %v4509_v12, %v4489_v37  ;;  %v4316_v37 = vld [vmem:[%s5715_s6 + $0x30] sm:$0xff]   ;;  %v4318_v12 = vld [vmem:[#allocation3] ss:$8 sps:$4 sm:$0xff]  }
 0x8de   :  { %v1124_v20 = vpack.c.bf16 %v1121_v62, %v1120_v13  ;;  %v4323_v13 = vld [vmem:[#allocation3 + $0x14] ss:$8 sps:$4 sm:$0xff]   ;;  %v4321_v62 = vld [vmem:[#allocation3 + $0x10] ss:$8 sps:$4 sm:$0xff]  }
 0x8df   :  { %v1125_v59 = vpack.c.bf16 %v1123_v18, %v1122_v16 }
 0x8e0   :  { %4124 = vmatpush3.bf16.msra.mxu0 %v1129_v57  ;;  %4125 = vmatprep.mubr.msk.bf16.mxu0 %vm444_vm0, %v1124_v20  ;;  %v4320_v57 = vld [vmem:[#allocation3 + $0x4] ss:$8 sps:$4 sm:$0xff]  }
 0x8e1   :  { %4129 = vmatprep.subr.bf16.mxu0 %v4310_v21  ;;  %1514 = vmatprep.subr.bf16.mxu1 %v4320_v57 }
 0x8e2   :  { %1515 = vmatpush1.bf16.msra.mxu1 %v4318_v12 }
 0x8e3   :  { %4126 = vmatmul.mubr.msk.bf16.vlgmr.msra.gmra.mrb[16].mxu0 %vm444_vm0, %v1125_v59  ;;  %1516 = vmatprep.subr.bf16.mxu1 %v4323_v13 }
 0x8e4   :  { %4130 = vmatpush3.bf16.msra.mxu0 %v4310_v21 }
 0x8e5   :  { %4131 = vmatprep.subr.bf16.mxu0 %v4311_v22 }
 0x8e6   :  { %1517 = vmatpush1.bf16.msra.mxu1 %v4321_v62 }
 0x8e8   :  { %4132 = vmatpush3.bf16.msra.mxu0 %v4311_v22 }
 0x8e9   :  { %4133 = vmatprep.subr.bf16.mxu0 %v4312_v23 }
 0x8ec   :  { %4134 = vmatpush3.bf16.msra.mxu0 %v4312_v23 }
 0x8ed   :  { %4135 = vmatprep.subr.bf16.mxu0 %v4313_v25 }
 0x8f0   :  { %4136 = vmatpush3.bf16.msra.mxu0 %v4313_v25 }
 0x8f1   :  { %4137 = vmatprep.subr.bf16.mxu0 %v4314_v29 }
 0x8f4   :  { %4138 = vmatpush3.bf16.msra.mxu0 %v4314_v29  ;;  %v4326_v29 = vld [vmem:[#allocation3 + $0x24] ss:$8 sps:$4 sm:$0xff]  }
 0x8f5   :  { %4139 = vmatprep.subr.bf16.mxu0 %v4315_v32  ;;  %1518 = vmatprep.subr.bf16.mxu1 %v4326_v29  ;;  %v4357_v29 = vld [vmem:[#allocation5 + $0x38] sm:$0xff]  }
 0x8f8   :  { %4140 = vmatpush3.bf16.msra.mxu0 %v4315_v32  ;;  %v4329_v32 = vld [vmem:[#allocation3 + $0x34] ss:$8 sps:$4 sm:$0xff]  }
 0x8f9   :  { %4141 = vmatprep.subr.bf16.mxu0 %v4316_v37 }
 0x8fc   :  { %4142 = vmatpush3.bf16.msra.mxu0 %v4316_v37  ;;  %v4335_v37 = vld [vmem:[#allocation3 + $0x54] ss:$8 sps:$4 sm:$0xff]  }
 0x8fd   :  { %4143 = vmatprep.subr.bf16.mxu0 %v4317_v38 }
 0x900   :  { %4144 = vmatpush3.bf16.msra.mxu0 %v4317_v38  ;;  %v4333_v38 = vld [vmem:[#allocation3 + $0x50] ss:$8 sps:$4 sm:$0xff]  }
 0x9ae   :  { %v4095_v24 = vpop.f32.mrb[12].mxu0 }
 0x9af   :  { %v778_v26 = vpop.f32.mrb[13].mxu0 }
 0x9b0   :  { %797 = vrot.lane.b32.xlu0 %v778_v26, %s4698_s26  ;;  %v4096_v27 = vpop.f32.mrb[14].mxu0 }
 0x9b1   :  { %v781_v28 = vpop.f32.mrb[15].mxu0 }
 0x9b2   :  { %799 = vrot.lane.b32.xlu1 %v781_v28, %s4698_s26 }
 0x9b4   :  { %801 = vrot.lane.b32.xlu0 %v4095_v24, %s4698_s26 }
 0x9b6   :  { %803 = vrot.lane.b32.xlu1 %v4096_v27, %s4698_s26  ;;  %v4127_v30 = vpop.f32.mrb[16].mxu0 }
 0x9b7   :  { %v1172_v34 = vpop.f32.mrb[17].mxu0 }
 0x9b8   :  { %994 = vrot.lane.b32.xlu0 %v5093_v42, %s4694_s10  ;;  %v4128_v35 = vpop.f32.mrb[18].mxu0 }
 0x9b9   :  { %v1175_v36 = vpop.f32.mrb[19].mxu0 }
 0x9ba   :  { %996 = vrot.lane.b32.xlu1 %v5097_v46, %s4694_s10 }
 0x9bc   :  { %998 = vrot.lane.b32.xlu0 %v5091_v41, %s4694_s10 }
 0x9be   :  { %1000 = vrot.lane.b32.xlu1 %v5095_v44, %s4694_s10 }
 0x9c0   :  { %1191 = vrot.lane.b32.xlu0 %v1172_v34, %s4697_s25  ;;  %v4327_v34 = vld [vmem:[#allocation3 + $0x30] ss:$8 sps:$4 sm:$0xff]  }
 0x9c2   :  { %1193 = vrot.lane.b32.xlu1 %v1175_v36, %s4697_s25  ;;  %v4330_v36 = vld [vmem:[#allocation3 + $0x40] ss:$8 sps:$4 sm:$0xff]  }
 0x9c4   :  { %1195 = vrot.lane.b32.xlu0 %v4127_v30, %s4697_s25  ;;  %v4324_v30 = vld [vmem:[#allocation3 + $0x20] ss:$8 sps:$4 sm:$0xff]  }
 0x9c5   :  { %1519 = vmatpush1.bf16.msra.mxu1 %v4324_v30  ;;  %v1422_v30 = vld [vmem:[%s5720_s11] sm:$0x3] }
 0x9c6   :  { %1197 = vrot.lane.b32.xlu1 %v4128_v35, %s4697_s25  ;;  %1520 = vmatprep.subr.bf16.mxu1 %v4329_v32  ;;  %v4332_v35 = vld [vmem:[#allocation3 + $0x44] ss:$8 sps:$4 sm:$0xff]   ;;  %v1427_v32 = vrot.slane %v1422_v30, %v4937_v15 }
 0x9c9   :  { %1521 = vmatpush1.bf16.msra.mxu1 %v4327_v34  ;;  %v1431_v34 = vrot.slane %v1422_v30, %v4943_v17 }
 0x9ca   :  { %1522 = vmatprep.subr.bf16.mxu1 %v4332_v35 }
 0x9cd   :  { %1523 = vmatpush1.bf16.msra.mxu1 %v4330_v36 }
 0x9ce   :  { %1524 = vmatprep.subr.bf16.mxu1 %v4335_v37 }
 0x9d1   :  { %1525 = vmatpush1.bf16.msra.mxu1 %v4333_v38 }
 0xa22   :  { %v798_v42 = vpop.permute.xlu0 %797 }
 0xa23   :  { %810 = vst.msk [vmem:[#allocation2] sm:$0xff] %vm809_vm1, %v798_v42  ;;  %v4338_v42 = vld [vmem:[#allocation3 + $0x64] ss:$8 sps:$4 sm:$0xff]  }
 0xa24   :  { %v800_v46 = vpop.permute.xlu1 %799  ;;  %1526 = vmatprep.subr.bf16.mxu1 %v4338_v42 }
 0xa25   :  { %811 = vst.msk [vmem:[#allocation2 + $0x8] sm:$0xff] %vm809_vm1, %v800_v46  ;;  %v4336_v46 = vld [vmem:[#allocation3 + $0x60] ss:$8 sps:$4 sm:$0xff]  }
 0xa26   :  { %v802_v41 = vpop.permute.xlu0 %801  ;;  %1527 = vmatpush1.bf16.msra.mxu1 %v4336_v46 }
 0xa27   :  { %812 = vst.msk [vmem:[#allocation2 + $0x10] sm:$0xff] %vm809_vm1, %v802_v41  ;;  %v4341_v41 = vld [vmem:[#allocation3 + $0x74] ss:$8 sps:$4 sm:$0xff]  }
 0xa28   :  { %v804_v44 = vpop.permute.xlu1 %803  ;;  %1528 = vmatprep.subr.bf16.mxu1 %v4341_v41 }
 0xa29   :  { %813 = vst.msk [vmem:[#allocation2 + $0x18] sm:$0xff] %vm809_vm1, %v804_v44  ;;  %v4339_v44 = vld [vmem:[#allocation3 + $0x70] ss:$8 sps:$4 sm:$0xff]  }
 0xa2a   :  { %v995_v40 = vpop.permute.xlu0 %994  ;;  %1529 = vmatpush1.bf16.msra.mxu1 %v4339_v44 }
 0xa2b   :  { %1007 = vst.msk [vmem:[#allocation2] sm:$0xff] %vm1006_vm2, %v995_v40 }
 0xa2c   :  { %v997_v47 = vpop.permute.xlu1 %996 }
 0xa2d   :  { %1008 = vst.msk [vmem:[#allocation2 + $0x8] sm:$0xff] %vm1006_vm2, %v997_v47 }
 0xa2e   :  { %v999_v48 = vpop.permute.xlu0 %998 }
 0xa2f   :  { %1009 = vst.msk [vmem:[#allocation2 + $0x10] sm:$0xff] %vm1006_vm2, %v999_v48 }
 0xa30   :  { %v1001_v49 = vpop.permute.xlu1 %1000 }
 0xa31   :  { %1010 = vst.msk [vmem:[#allocation2 + $0x18] sm:$0xff] %vm1006_vm2, %v1001_v49 }
 0xa32   :  { %v1192_v50 = vpop.permute.xlu0 %1191 }
 0xa33   :  { %1204 = vst.msk [vmem:[#allocation2] sm:$0xff] %vm1203_vm3, %v1192_v50 }
 0xa34   :  { %v1194_v51 = vpop.permute.xlu1 %1193 }
 0xa35   :  { %1205 = vst.msk [vmem:[#allocation2 + $0x8] sm:$0xff] %vm1203_vm3, %v1194_v51 }
 0xa36   :  { %v1196_v54 = vpop.permute.xlu0 %1195 }
 0xa37   :  { %1206 = vst.msk [vmem:[#allocation2 + $0x10] sm:$0xff] %vm1203_vm3, %v1196_v54 }
 0xa38   :  { %v1198_v56 = vpop.permute.xlu1 %1197 }
 0xa39   :  { %1207 = vst.msk [vmem:[#allocation2 + $0x18] sm:$0xff] %vm1203_vm3, %v1198_v56 }
 0xa3a   :  { %v1208_v58 = vld [vmem:[#allocation2] sm:$0xff] }
 0xa3c   :  { %v1209_v60 = vld [vmem:[#allocation2 + $0x8] sm:$0xff] }
 0xa3d   :  { %v1212_v61 = vpack.c.bf16 %v1209_v60, %v1208_v58 }
 0xa3e   :  { %v1210_v63 = vld [vmem:[#allocation2 + $0x10] sm:$0xff] }
 0xa3f   :  { %4145 = vmatprep.mubr.bf16.mxu0 %v1212_v61 }
 0xa40   :  { %v1211_v0 = vld [vmem:[#allocation2 + $0x18] sm:$0xff] }
 0xa41   :  { %v1213_v1 = vpack.c.bf16 %v1211_v0, %v1210_v63 }
 0xa43   :  { %4146 = vmatmul.mubr.bf16.vlgmr.msra.gmra.mrb[20].mxu0 %v1213_v1  ;;  %v3706_v1 = vld [vmem:[%s5717_s8] ss:$0 sm:$0xff] }
 0xb16   :  { %v4147_v7 = vpop.f32.mrb[20].mxu0 }
 0xb17   :  { %v1319_v53 = vpop.f32.mrb[21].mxu0  ;;  %v1328_v43 = vadd.f32 %v4147_v7, %v3697_v2 }
 0xb18   :  { %v1320_v3 = vadd.f32 %v3697_v2, %v1319_v53  ;;  %v4148_v8 = vpop.f32.mrb[22].mxu0 }
 0xb19   :  { %v1322_v6 = vpop.f32.mrb[23].mxu0  ;;  %v1331_v52 = vadd.f32 %v4148_v8, %v3697_v2  ;;  %v1336_v9 = vadd.f32 %v1328_v43, %v4927_v10 }
 0xb1a   :  { %v1323_v45 = vadd.f32 %v3697_v2, %v1322_v6  ;;  %v1334_v33 = vadd.f32 %v1320_v3, %v4920_v4  ;;  %v3707_v6 = vld [vmem:[%s5718_s9] ss:$0 sm:$0xff] }
 0xb1b   :  { %v1337_v55 = vadd.f32 %v1331_v52, %v4929_v11 }
 0xb1c   :  { %1340 = vadd.xlane.f32.xlu0 %v1334_v33  ;;  %v1335_v31 = vadd.f32 %v1323_v45, %v4922_v5 }
 0xb1e   :  { %1342 = vadd.xlane.f32.xlu1 %v1335_v31 }
 0xb20   :  { %1344 = vadd.xlane.f32.xlu0 %v1336_v9 }
 0xb24   :  { %1346 = vadd.xlane.f32.xlu0 %v1337_v55 }
 0xba9   :  { %v1341_v4 = vpop.xlane.xlu0 %1340 }
 0xbaa   :  { %v1348_v18 = vmul.f32 0.0078125, %v1341_v4 }
 0xbab   :  { %v1343_v20 = vpop.xlane.xlu1 %1342 }
 0xbac   :  { %v1352_v5 = vsub.f32 %v1334_v33, %v1348_v18  ;;  %v1349_v16 = vmul.f32 0.0078125, %v1343_v20  ;;  %v4342_v18 = vld [vmem:[#allocation5 + $0x40] sm:$0xff]  }
 0xbad   :  { %v1345_v59 = vpop.xlane.xlu0 %1344  ;;  %v4343_v20 = vld [vmem:[#allocation5] sm:$0xff]   ;;  %3937 = vmatprep.subr.bf16.mxu0 %v4342_v18 }
 0xbae   :  { %v1353_v21 = vsub.f32 %v1335_v31, %v1349_v16  ;;  %v1350_v10 = vmul.f32 0.0078125, %v1345_v59  ;;  %v1356_v22 = vmul.f32 %v1352_v5, %v1352_v5  ;;  %3938 = vmatpush3.bf16.msra.mxu0 %v4343_v20  ;;  %v4345_v16 = vld [vmem:[#allocation5 + $0x8] sm:$0xff]   ;;  %v4346_v59 = vld [vmem:[#allocation5 + $0x50] sm:$0xff]  }
 0xbb0   :  { %v1354_v23 = vsub.f32 %v1336_v9, %v1350_v10  ;;  %1360 = vadd.xlane.f32.xlu0 %v1356_v22  ;;  %v1357_v11 = vmul.f32 %v1353_v21, %v1353_v21  ;;  %v4348_v10 = vld [vmem:[#allocation5 + $0x58] sm:$0xff]  }
 0xbb1   :  { %v1347_v24 = vpop.xlane.xlu0 %1346  ;;  %v4349_v22 = vld [vmem:[#allocation5 + $0x18] sm:$0xff]  }
 0xbb2   :  { %v1351_v25 = vmul.f32 0.0078125, %v1347_v24  ;;  %1362 = vadd.xlane.f32.xlu1 %v1357_v11  ;;  %v1358_v26 = vmul.f32 %v1354_v23, %v1354_v23  ;;  %v4351_v11 = vld [vmem:[#allocation5 + $0x20] sm:$0xff]   ;;  %v4352_v24 = vld [vmem:[#allocation5 + $0x68] sm:$0xff]  }
 0xbb4   :  { %v1355_v27 = vsub.f32 %v1337_v55, %v1351_v25  ;;  %1364 = vadd.xlane.f32.xlu0 %v1358_v26  ;;  %v4353_v25 = vld [vmem:[#allocation5 + $0x28] sm:$0xff]   ;;  %v4354_v26 = vld [vmem:[#allocation5 + $0x70] sm:$0xff]  }
 0xbb6   :  { %v1359_v28 = vmul.f32 %v1355_v27, %v1355_v27 }
 0xbb8   :  { %1366 = vadd.xlane.f32.xlu1 %v1359_v28  ;;  %v4356_v28 = vld [vmem:[#allocation5 + $0x78] sm:$0xff]  }
 0xc3d   :  { %v1361_v40 = vpop.xlane.xlu0 %1360 }
 0xc3e   :  { %v1368_v47 = vmul.f32 0.0078125, %v1361_v40 }
 0xc3f   :  { %v1363_v48 = vpop.xlane.xlu1 %1362 }
 0xc40   :  { %v1372_v49 = vadd.f32 1e-12, %v1368_v47  ;;  %v1369_v50 = vmul.f32 0.0078125, %v1363_v48 }
 0xc41   :  { %v1365_v51 = vpop.xlane.xlu0 %1364 }
 0xc42   :  { %4510 = vrsqrt.f32 %v1372_v49  ;;  %v1373_v54 = vadd.f32 1e-12, %v1369_v50  ;;  %v1370_v56 = vmul.f32 0.0078125, %v1365_v51 }
 0xc44   :  { %4512 = vrsqrt.f32 %v1373_v54  ;;  %v1374_v58 = vadd.f32 1e-12, %v1370_v56 }
 0xc45   :  { %v1367_v60 = vpop.xlane.xlu1 %1366 }
 0xc46   :  { %4514 = vrsqrt.f32 %v1374_v58  ;;  %v1371_v61 = vmul.f32 0.0078125, %v1367_v60 }
 0xc48   :  { %v1375_v63 = vadd.f32 1e-12, %v1371_v61 }
 0xc4a   :  { %4516 = vrsqrt.f32 %v1375_v63 }
 0xc4c   :  { %v4511_v0 = vpop.eup %4510 }
 0xc4d   :  { %v1380_v2 = vmul.f32 %v4511_v0, %v1352_v5  ;;  %v4344_v5 = vld [vmem:[#allocation5 + $0x48] sm:$0xff]  }
 0xc4e   :  { %v4513_v7 = vpop.eup %4512  ;;  %3939 = vmatprep.subr.bf16.mxu0 %v4344_v5 }
 0xc4f   :  { %v1381_v53 = vmul.f32 %v4513_v7, %v1353_v21  ;;  %v1390_v3 = vmul.f32 %v3706_v1, %v1380_v2  ;;  %3940 = vmatpush3.bf16.msra.mxu0 %v4345_v16  ;;  %v4347_v21 = vld [vmem:[#allocation5 + $0x10] sm:$0xff]  }
 0xc50   :  { %v4515_v8 = vpop.eup %4514  ;;  %3941 = vmatprep.subr.bf16.mxu0 %v4346_v59 }
 0xc51   :  { %v1391_v43 = vmul.f32 %v3706_v1, %v1381_v53  ;;  %v5202_v45 = vadd.f32 %v3707_v6, %v1390_v3  ;;  %v1382_v31 = vmul.f32 %v4515_v8, %v1354_v23  ;;  %v4350_v23 = vld [vmem:[#allocation5 + $0x60] sm:$0xff]  }
 0xc53   :  { %v5204_v33 = vadd.f32 %v3707_v6, %v1391_v43  ;;  %v1392_v12 = vmul.f32 %v3706_v1, %v1382_v31  ;;  %3942 = vmatpush3.bf16.msra.mxu0 %v4347_v21 }
 0xc54   :  { %v4517_v52 = vpop.eup %4516  ;;  %3943 = vmatprep.subr.bf16.mxu0 %v4348_v10 }
 0xc55   :  { %v1404_v9 = vpack.c.bf16 %v5204_v33, %v5202_v45  ;;  %v1383_v55 = vmul.f32 %v4517_v52, %v1355_v27  ;;  %v5211_v62 = vadd.f32 %v3707_v6, %v1392_v12  ;;  %v4355_v27 = vld [vmem:[#allocation5 + $0x30] sm:$0xff]  }
 0xc57   :  { %1547 = vmatmul.mubr.bf16.vlgmr.msra.gmra.mrb[24].mxu1 %v1404_v9  ;;  %v1393_v57 = vmul.f32 %v3706_v1, %v1383_v55  ;;  %3944 = vmatpush3.bf16.msra.mxu0 %v4349_v22 }
 0xc58   :  { %1556 = vmatprep.mubr.bf16.mxu1 %v4696_v39  ;;  %3945 = vmatprep.subr.bf16.mxu0 %v4350_v23 }
 0xc59   :  { %v5209_v13 = vadd.f32 %v3707_v6, %v1393_v57 }
 0xc5b   :  { %v1405_v4 = vpack.c.bf16 %v5209_v13, %v5211_v62  ;;  %3946 = vmatpush3.bf16.msra.mxu0 %v4351_v11 }
 0xc5c   :  { %3947 = vmatprep.subr.bf16.mxu0 %v4352_v24 }
 0xc5f   :  { %1557 = vmatmul.mubr.bf16.gmra.mrb[28].mxu1 %v1405_v4  ;;  %3948 = vmatpush3.bf16.msra.mxu0 %v4353_v25 }
 0xc60   :  { %2110 = vmatprep.mubr.bf16.mxu1 %v4696_v39  ;;  %3949 = vmatprep.subr.bf16.mxu0 %v4354_v26 }
 0xc63   :  { %3950 = vmatpush3.bf16.msra.mxu0 %v4355_v27 }
 0xc64   :  { %3951 = vmatprep.subr.bf16.mxu0 %v4356_v28 }
 0xc67   :  { %3952 = vmatpush3.bf16.msra.mxu0 %v4357_v29 }
 0xd2a   :  { %v1548_v35 = vpop.f32.mrb[24].mxu1 }
 0xd2b   :  { %v5221_v36 = vadd.f32 %v1548_v35, %v1427_v32  ;;  %v1550_v37 = vpop.f32.mrb[25].mxu1 }
 0xd2c   :  { %v5223_v38 = vadd.f32 %v1550_v37, %v1431_v34  ;;  %v1552_v42 = vpop.f32.mrb[26].mxu1 }
 0xd2d   :  { %v1575_v46 = vmul.f32 0.044715, %v5221_v36  ;;  %v5226_v41 = vadd.f32 %v1552_v42, %v1427_v32  ;;  %v1554_v44 = vpop.f32.mrb[27].mxu1 }
 0xd2e   :  { %v1576_v40 = vmul.f32 0.044715, %v5223_v38  ;;  %v5229_v47 = vadd.f32 %v1554_v44, %v1431_v34 }
 0xd2f   :  { %v1583_v48 = vmul.f32 %v1575_v46, %v5221_v36  ;;  %v1577_v49 = vmul.f32 0.044715, %v5226_v41 }
 0xd30   :  { %v1584_v50 = vmul.f32 %v1576_v40, %v5223_v38  ;;  %v1578_v51 = vmul.f32 0.044715, %v5229_v47 }
 0xd31   :  { %v1591_v54 = vmul.f32 %v1583_v48, %v5221_v36  ;;  %v1585_v56 = vmul.f32 %v1577_v49, %v5226_v41  ;;  %v1567_v49 = vmul.f32 0.5, %v5221_v36 }
 0xd32   :  { %v1592_v58 = vmul.f32 %v1584_v50, %v5223_v38  ;;  %v1586_v60 = vmul.f32 %v1578_v51, %v5229_v47  ;;  %v1558_v61 = vpop.f32.mrb[28].mxu1  ;;  %v1569_v50 = vmul.f32 0.5, %v5226_v41 }
 0xd33   :  { %v1599_v63 = vadd.f32 %v1591_v54, %v5221_v36  ;;  %v1593_v0 = vmul.f32 %v1585_v56, %v5226_v41  ;;  %v5241_v1 = vadd.f32 %v1558_v61, %v1427_v32  ;;  %v1560_v2 = vpop.f32.mrb[29].mxu1  ;;  %v1568_v54 = vmul.f32 0.5, %v5223_v38 }
 0xd34   :  { %v1594_v7 = vmul.f32 %v1586_v60, %v5229_v47  ;;  %v5244_v53 = vadd.f32 %v1560_v2, %v1431_v34  ;;  %v1562_v3 = vpop.f32.mrb[30].mxu1  ;;  %v1600_v8 = vadd.f32 %v1592_v58, %v5223_v38  ;;  %v1570_v56 = vmul.f32 0.5, %v5229_v47 }
 0xd35   :  { %v1607_v6 = vmul.f32 0.7978846, %v1599_v63  ;;  %v1601_v43 = vadd.f32 %v1593_v0, %v5226_v41  ;;  %v1579_v31 = vmul.f32 0.044715, %v5241_v1  ;;  %v1563_v52 = vadd.f32 %v1562_v3, %v1427_v32  ;;  %v1564_v9 = vpop.f32.mrb[31].mxu1 }
 0xd36   :  { %v1580_v55 = vmul.f32 0.044715, %v5244_v53  ;;  %v1565_v12 = vadd.f32 %v1564_v9, %v1431_v34  ;;  %v1602_v57 = vadd.f32 %v1594_v7, %v5229_v47  ;;  %v1608_v4 = vmul.f32 0.7978846, %v1600_v8 }
 0xd37   :  { %4518 = vtanh.f32 %v1607_v6  ;;  %v1609_v18 = vmul.f32 0.7978846, %v1601_v43  ;;  %v1587_v20 = vmul.f32 %v1579_v31, %v5241_v1  ;;  %v1581_v5 = vmul.f32 0.044715, %v1563_v52 }
 0xd38   :  { %v1588_v16 = vmul.f32 %v1580_v55, %v5244_v53  ;;  %v1582_v59 = vmul.f32 0.044715, %v1565_v12  ;;  %v1610_v21 = vmul.f32 0.7978846, %v1602_v57  ;;  %4520 = vtanh.f32 %v1608_v4 }
 0xd39   :  { %4522 = vtanh.f32 %v1609_v18  ;;  %v1595_v10 = vmul.f32 %v1587_v20, %v5241_v1  ;;  %v1589_v22 = vmul.f32 %v1581_v5, %v1563_v52  ;;  %v1571_v41 = vmul.f32 0.5, %v5241_v1 }
 0xd3a   :  { %v1596_v23 = vmul.f32 %v1588_v16, %v5244_v53  ;;  %v1590_v11 = vmul.f32 %v1582_v59, %v1565_v12  ;;  %4524 = vtanh.f32 %v1610_v21  ;;  %v1573_v38 = vmul.f32 0.5, %v1563_v52 }
 0xd3b   :  { %v1597_v24 = vmul.f32 %v1589_v22, %v1563_v52  ;;  %v1603_v25 = vadd.f32 %v1595_v10, %v5241_v1  ;;  %v1572_v47 = vmul.f32 0.5, %v5244_v53  ;;  %v1574_v55 = vmul.f32 0.5, %v1565_v12  ;;  %v3724_v10 = vld [vmem:[%s5722_s13] ss:$0 sm:$0xff] }
 0xd3c   :  { %v1598_v26 = vmul.f32 %v1590_v11, %v1565_v12  ;;  %v1604_v27 = vadd.f32 %v1596_v23, %v5244_v53 }
 0xd3d   :  { %v1605_v28 = vadd.f32 %v1597_v24, %v1563_v52  ;;  %v1611_v29 = vmul.f32 0.7978846, %v1603_v25 }
 0xd3e   :  { %v1606_v30 = vadd.f32 %v1598_v26, %v1565_v12  ;;  %v1612_v32 = vmul.f32 0.7978846, %v1604_v27 }
 0xd3f   :  { %v1613_v34 = vmul.f32 0.7978846, %v1605_v28  ;;  %4526 = vtanh.f32 %v1611_v29 }
 0xd40   :  { %v1614_v35 = vmul.f32 0.7978846, %v1606_v30  ;;  %4528 = vtanh.f32 %v1612_v32 }
 0xd41   :  { %v4519_v37 = vpop.eup %4518  ;;  %4530 = vtanh.f32 %v1613_v34 }
 0xd42   :  { %v4521_v42 = vpop.eup %4520  ;;  %v1623_v46 = vadd.f32 1.0, %v4519_v37  ;;  %4532 = vtanh.f32 %v1614_v35 }
 0xd43   :  { %v4523_v44 = vpop.eup %4522  ;;  %v1624_v40 = vadd.f32 1.0, %v4521_v42 }
 0xd44   :  { %v4525_v48 = vpop.eup %4524  ;;  %v1625_v51 = vadd.f32 1.0, %v4523_v44  ;;  %v1631_v60 = vmul.f32 %v1623_v46, %v1567_v49  ;;  %v4363_v46 = vld [vmem:[%s5713_s4 + $0xdc] ss:$12 sps:$4 sm:$0xff]  }
 0xd45   :  { %v1626_v58 = vadd.f32 1.0, %v4525_v48  ;;  %v1632_v63 = vmul.f32 %v1624_v40, %v1568_v54 }
 0xd46   :  { %v1633_v61 = vmul.f32 %v1625_v51, %v1569_v50 }
 0xd47   :  { %v1634_v0 = vmul.f32 %v1626_v58, %v1570_v56 }
 0xd48   :  { %v1639_v2 = vpack.c.bf16 %v1633_v61, %v1631_v60 }
 0xd49   :  { %v4527_v7 = vpop.eup %4526  ;;  %v1640_v3 = vpack.c.bf16 %v1634_v0, %v1632_v63 }
 0xd4a   :  { %v4529_v8 = vpop.eup %4528  ;;  %v1627_v6 = vadd.f32 1.0, %v4527_v7 }
 0xd4b   :  { %v4531_v43 = vpop.eup %4530  ;;  %1810 = vmatprep.mubr.bf16.mxu0 %v1640_v3  ;;  %v1628_v36 = vadd.f32 1.0, %v4529_v8  ;;  %v4366_v3 = vld [vmem:[%s5713_s4 + $0xf4] ss:$12 sps:$4 sm:$0xff]  }
 0xd4c   :  { %v4533_v31 = vpop.eup %4532  ;;  %1811 = vmatmul.mubr.bf16.vlgmr.msra.gmra.mrb[24].mxu0 %v1639_v2  ;;  %v1629_v9 = vadd.f32 1.0, %v4531_v43  ;;  %v1635_v4 = vmul.f32 %v1627_v6, %v1571_v41  ;;  %v4367_v8 = vld [vmem:[%s5713_s4 + $0xc8] ss:$12 sps:$4 sm:$0xff]   ;;  %v4364_v6 = vld [vmem:[%s5713_s4 + $0xf0] ss:$12 sps:$4 sm:$0xff]  }
 0xd4d   :  { %v1630_v57 = vadd.f32 1.0, %v4533_v31  ;;  %v1636_v20 = vmul.f32 %v1628_v36, %v1572_v47  ;;  %4149 = vmatprep.subr.bf16.mxu0 %v4367_v8  ;;  %v4370_v43 = vld [vmem:[%s5713_s4 + $0x10c] ss:$12 sps:$4 sm:$0xff]   ;;  %v4368_v31 = vld [vmem:[%s5713_s4 + $0x108] ss:$12 sps:$4 sm:$0xff]  }
 0xd4e   :  { %v1637_v18 = vmul.f32 %v1629_v9, %v1573_v38  ;;  %4150 = vmatpush3.bf16.msra.mxu0 %v4367_v8  ;;  %v4371_v36 = vld [vmem:[%s5713_s4 + $0xe0] ss:$12 sps:$4 sm:$0xff]   ;;  %v4374_v41 = vld [vmem:[%s5713_s4 + $0x124] ss:$12 sps:$4 sm:$0xff]   ;;  %v4378_v47 = vld [vmem:[%s5713_s4 + $0x13c] ss:$12 sps:$4 sm:$0xff]  }
 0xd4f   :  { %v1638_v5 = vmul.f32 %v1630_v57, %v1574_v55  ;;  %4151 = vmatprep.subr.bf16.mxu0 %v4371_v36  ;;  %v4375_v38 = vld [vmem:[%s5713_s4 + $0xf8] ss:$12 sps:$4 sm:$0xff]   ;;  %v4372_v9 = vld [vmem:[%s5713_s4 + $0x120] ss:$12 sps:$4 sm:$0xff]   ;;  %v4379_v55 = vld [vmem:[%s5713_s4 + $0x110] ss:$12 sps:$4 sm:$0xff]  }
 0xd50   :  { %v1641_v16 = vpack.c.bf16 %v1637_v18, %v1635_v4  ;;  %v4376_v57 = vld [vmem:[%s5713_s4 + $0x138] ss:$12 sps:$4 sm:$0xff]   ;;  %v4382_v4 = vld [vmem:[%s5713_s4 + $0x154] ss:$12 sps:$4 sm:$0xff]  }
 0xd51   :  { %v1642_v59 = vpack.c.bf16 %v1638_v5, %v1636_v20  ;;  %v4383_v18 = vld [vmem:[%s5713_s4 + $0x128] ss:$12 sps:$4 sm:$0xff]   ;;  %v4380_v20 = vld [vmem:[%s5713_s4 + $0x150] ss:$12 sps:$4 sm:$0xff]   ;;  %v4386_v5 = vld [vmem:[%s5713_s4 + $0x16c] ss:$12 sps:$4 sm:$0xff]  }
 0xd52   :  { %4152 = vmatpush3.bf16.msra.mxu0 %v4371_v36 }
 0xd53   :  { %1818 = vmatprep.mubr.bf16.mxu0 %v1642_v59  ;;  %4153 = vmatprep.subr.bf16.mxu0 %v4375_v38  ;;  %v4384_v59 = vld [vmem:[%s5713_s4 + $0x168] ss:$12 sps:$4 sm:$0xff]  }
 0xd54   :  { %1819 = vmatmul.mubr.bf16.gmra.mrb[28].mxu0 %v1641_v16  ;;  %v4387_v16 = vld [vmem:[%s5713_s4 + $0x140] ss:$12 sps:$4 sm:$0xff]  }
 0xd56   :  { %4154 = vmatpush3.bf16.msra.mxu0 %v4375_v38 }
 0xd57   :  { %4155 = vmatprep.subr.bf16.mxu0 %v4379_v55 }
 0xd5a   :  { %4156 = vmatpush3.bf16.msra.mxu0 %v4379_v55 }
 0xd5b   :  { %4157 = vmatprep.subr.bf16.mxu0 %v4383_v18 }
 0xd5e   :  { %4158 = vmatpush3.bf16.msra.mxu0 %v4383_v18 }
 0xd5f   :  { %4159 = vmatprep.subr.bf16.mxu0 %v4387_v16 }
 0xd62   :  { %4160 = vmatpush3.bf16.msra.mxu0 %v4387_v16 }
 0xe1f   :  { %v3953_v21 = vpop.f32.mrb[24].mxu0 }
 0xe20   :  { %v3954_v1 = vpop.f32.mrb[25].mxu0 }
 0xe21   :  { %v3955_v52 = vadd.f32 %v3954_v1, %v3953_v21  ;;  %v3956_v22 = vpop.f32.mrb[26].mxu0  ;;  %v4388_v21 = vld [vmem:[%s5713_s4 + $0x158] ss:$12 sps:$4 sm:$0xff]  }
 0xe22   :  { %v3957_v23 = vpop.f32.mrb[27].mxu0  ;;  %4161 = vmatprep.subr.bf16.mxu0 %v4388_v21 }
 0xe23   :  { %v1813_v53 = vadd.f32 %v3955_v52, %v3724_v10  ;;  %v3958_v12 = vadd.f32 %v3957_v23, %v3956_v22  ;;  %4162 = vmatpush3.bf16.msra.mxu0 %v4388_v21 }
 0xe25   :  { %v1816_v11 = vadd.f32 %v3958_v12, %v3724_v10  ;;  %v1827_v24 = vadd.f32 %v1813_v53, %v5202_v45  ;;  %v4358_v45 = vld [vmem:[%s5713_s4 + $0xc0] ss:$12 sps:$4 sm:$0xff]  }
 0xe27   :  { %1833 = vadd.xlane.f32.xlu0 %v1827_v24  ;;  %v3959_v25 = vpop.f32.mrb[28].mxu0  ;;  %v1828_v26 = vadd.f32 %v1816_v11, %v5204_v33  ;;  %v4360_v33 = vld [vmem:[%s5713_s4 + $0xc4] ss:$12 sps:$4 sm:$0xff]  }
 0xe28   :  { %v3960_v27 = vpop.f32.mrb[29].mxu0  ;;  %2078 = vmatprep.subr.bf16.mxu1 %v4360_v33 }
 0xe29   :  { %v3961_v28 = vadd.f32 %v3960_v27, %v3959_v25  ;;  %1835 = vadd.xlane.f32.xlu1 %v1828_v26  ;;  %v3962_v29 = vpop.f32.mrb[30].mxu0  ;;  %2079 = vmatpush1.bf16.msra.mxu1 %v4358_v45 }
 0xe2a   :  { %v3963_v30 = vpop.f32.mrb[31].mxu0  ;;  %2080 = vmatprep.subr.bf16.mxu1 %v4363_v46 }
 0xe2b   :  { %v1821_v32 = vadd.f32 %v3961_v28, %v3724_v10  ;;  %v3964_v34 = vadd.f32 %v3963_v30, %v3962_v29  ;;  %v3741_v30 = vld [vmem:[%s5723_s14] ss:$0 sm:$0xff] }
 0xe2d   :  { %v1824_v35 = vadd.f32 %v3964_v34, %v3724_v10  ;;  %v1829_v37 = vadd.f32 %v1821_v32, %v5211_v62  ;;  %v4361_v62 = vld [vmem:[%s5713_s4 + $0xd8] ss:$12 sps:$4 sm:$0xff]   ;;  %v4389_v10 = vld [vmem:[%s5713_s4 + $0x170] ss:$12 sps:$4 sm:$0xff]  }
 0xe2e   :  { %2081 = vmatpush1.bf16.msra.mxu1 %v4361_v62  ;;  %4163 = vmatprep.subr.bf16.mxu0 %v4389_v10 }
 0xe2f   :  { %1837 = vadd.xlane.f32.xlu0 %v1829_v37  ;;  %v1830_v42 = vadd.f32 %v1824_v35, %v5209_v13  ;;  %2082 = vmatprep.subr.bf16.mxu1 %v4366_v3 }
 0xe30   :  { %4164 = vmatpush3.bf16.msra.mxu0 %v4389_v10 }
 0xe31   :  { %1839 = vadd.xlane.f32.xlu1 %v1830_v42 }
 0xe32   :  { %2083 = vmatpush1.bf16.msra.mxu1 %v4364_v6 }
 0xe33   :  { %2084 = vmatprep.subr.bf16.mxu1 %v4370_v43 }
 0xe36   :  { %2085 = vmatpush1.bf16.msra.mxu1 %v4368_v31 }
 0xe37   :  { %2086 = vmatprep.subr.bf16.mxu1 %v4374_v41 }
 0xe3a   :  { %2087 = vmatpush1.bf16.msra.mxu1 %v4372_v9 }
 0xe3b   :  { %2088 = vmatprep.subr.bf16.mxu1 %v4378_v47 }
 0xe3e   :  { %2089 = vmatpush1.bf16.msra.mxu1 %v4376_v57 }
 0xe3f   :  { %2090 = vmatprep.subr.bf16.mxu1 %v4382_v4 }
 0xe42   :  { %2091 = vmatpush1.bf16.msra.mxu1 %v4380_v20 }
 0xe43   :  { %2092 = vmatprep.subr.bf16.mxu1 %v4386_v5 }
 0xe46   :  { %2093 = vmatpush1.bf16.msra.mxu1 %v4384_v59 }
 0xeb4   :  { %v1834_v13 = vpop.xlane.xlu0 %1833 }
 0xeb5   :  { %v1841_v44 = vmul.f32 0.0078125, %v1834_v13 }
 0xeb6   :  { %v1836_v40 = vpop.xlane.xlu1 %1835 }
 0xeb7   :  { %v5282_v48 = vsub.f32 %v1827_v24, %v1841_v44  ;;  %v1842_v49 = vmul.f32 0.0078125, %v1836_v40 }
 0xeb9   :  { %v5284_v50 = vsub.f32 %v1828_v26, %v1842_v49  ;;  %v1849_v51 = vmul.f32 %v5282_v48, %v5282_v48 }
 0xebb   :  { %1853 = vadd.xlane.f32.xlu0 %v1849_v51  ;;  %v1850_v54 = vmul.f32 %v5284_v50, %v5284_v50 }
 0xebc   :  { %v1838_v56 = vpop.xlane.xlu0 %1837 }
 0xebd   :  { %v1843_v58 = vmul.f32 0.0078125, %v1838_v56  ;;  %1855 = vadd.xlane.f32.xlu1 %v1850_v54 }
 0xebe   :  { %v1840_v60 = vpop.xlane.xlu1 %1839 }
 0xebf   :  { %v5290_v61 = vsub.f32 %v1829_v37, %v1843_v58  ;;  %v1844_v63 = vmul.f32 0.0078125, %v1840_v60  ;;  %v3775_v58 = vld [vmem:[%s5714_s5 + $0x3] sm:$0x7] }
 0xec0   :  { %v1938_v60 = vrot.slane %v3775_v58, %v4937_v15  ;;  %v1946_v41 = vrot.slane %v3775_v58, %v203_v19 }
 0xec1   :  { %v5292_v0 = vsub.f32 %v1830_v42, %v1844_v63  ;;  %v1851_v2 = vmul.f32 %v5290_v61, %v5290_v61  ;;  %v3742_v42 = vld [vmem:[%s5724_s15] ss:$0 sm:$0xff]  ;;  %v1942_v63 = vrot.slane %v3775_v58, %v4943_v17 }
 0xec3   :  { %1857 = vadd.xlane.f32.xlu0 %v1851_v2  ;;  %v1852_v7 = vmul.f32 %v5292_v0, %v5292_v0 }
 0xec5   :  { %1859 = vadd.xlane.f32.xlu1 %v1852_v7 }
 0xf48   :  { %v1854_v1 = vpop.xlane.xlu0 %1853 }
 0xf49   :  { %v1861_v52 = vmul.f32 0.0078125, %v1854_v1 }
 0xf4a   :  { %v1856_v22 = vpop.xlane.xlu1 %1855 }
 0xf4b   :  { %v1865_v23 = vadd.f32 1e-12, %v1861_v52  ;;  %v1862_v53 = vmul.f32 0.0078125, %v1856_v22 }
 0xf4d   :  { %4534 = vrsqrt.f32 %v1865_v23  ;;  %v1866_v12 = vadd.f32 1e-12, %v1862_v53 }
 0xf4f   :  { %4536 = vrsqrt.f32 %v1866_v12 }
 0xf50   :  { %v1858_v11 = vpop.xlane.xlu0 %1857 }
 0xf51   :  { %v1863_v24 = vmul.f32 0.0078125, %v1858_v11 }
 0xf52   :  { %v1860_v25 = vpop.xlane.xlu1 %1859 }
 0xf53   :  { %v1867_v26 = vadd.f32 1e-12, %v1863_v24  ;;  %v1864_v27 = vmul.f32 0.0078125, %v1860_v25 }
 0xf55   :  { %4538 = vrsqrt.f32 %v1867_v26  ;;  %v1868_v28 = vadd.f32 1e-12, %v1864_v27  ;;  %v5419_v26 = vld [vmem:[%s5710_s1] sm:$0xff] }
 0xf57   :  { %v4535_v29 = vpop.eup %4534  ;;  %4540 = vrsqrt.f32 %v1868_v28 }
 0xf58   :  { %v1873_v32 = vmul.f32 %v4535_v29, %v5282_v48 }
 0xf59   :  { %v4537_v34 = vpop.eup %4536 }
 0xf5a   :  { %v1883_v35 = vmul.f32 %v3741_v30, %v1873_v32  ;;  %v1874_v37 = vmul.f32 %v4537_v34, %v5284_v50  ;;  %v5431_v34 = vld [vmem:[%s5710_s1 + $0x8] sm:$0xff] }
 0xf5c   :  { %v1884_v45 = vmul.f32 %v3741_v30, %v1874_v37  ;;  %v5366_v33 = vadd.f32 %v3742_v42, %v1883_v35 }
 0xf5e   :  { %v5368_v46 = vadd.f32 %v3742_v42, %v1884_v45 }
 0xf5f   :  { %v4539_v62 = vpop.eup %4538 }
 0xf60   :  { %v1897_v13 = vpack.c.bf16 %v5368_v46, %v5366_v33  ;;  %v1875_v44 = vmul.f32 %v4539_v62, %v5290_v61 }
 0xf61   :  { %v4541_v40 = vpop.eup %4540 }
 0xf62   :  { %2111 = vmatmul.mubr.bf16.vlgmr.msra.gmra.mrb[32].mxu1 %v1897_v13  ;;  %4165 = vmatprep.mubr.bf16.mxu0 %v1897_v13  ;;  %v1876_v48 = vmul.f32 %v4541_v40, %v5292_v0  ;;  %v1885_v49 = vmul.f32 %v3741_v30, %v1875_v44 }
 0xf63   :  { %2120 = vmatprep.mubr.bf16.mxu1 %v4696_v39 }
 0xf64   :  { %v1886_v50 = vmul.f32 %v3741_v30, %v1876_v48  ;;  %v5375_v51 = vadd.f32 %v3742_v42, %v1885_v49  ;;  %v5425_v30 = vld [vmem:[%s5710_s1 + $0x10] sm:$0xff] }
 0xf66   :  { %v5377_v54 = vadd.f32 %v3742_v42, %v1886_v50  ;;  %v5438_v42 = vld [vmem:[%s5710_s1 + $0x18] sm:$0xff] }
 0xf68   :  { %v1898_v56 = vpack.c.bf16 %v5377_v54, %v5375_v51 }
 0xf6a   :  { %2121 = vmatmul.mubr.bf16.gmra.mrb[36].mxu1 %v1898_v56  ;;  %4166 = vmatmul.mubr.bf16.vlgmr.msra.gmra.mrb[32].mxu0 %v1898_v56 }
0x1035   :  { %v2112_v61 = vpop.f32.mrb[32].mxu1 }
0x1036   :  { %v2114_v0 = vpop.f32.mrb[33].mxu1  ;;  %v2113_v7 = vadd.f32 %v2112_v61, %v1938_v60 }
0x1037   :  { %v2116_v2 = vpop.f32.mrb[34].mxu1  ;;  %v2115_v6 = vadd.f32 %v2114_v0, %v1942_v63 }
0x1038   :  { %v2117_v3 = vadd.f32 %v2116_v2, %v1938_v60  ;;  %v2118_v8 = vpop.f32.mrb[35].mxu1 }
0x1039   :  { %v2119_v43 = vadd.f32 %v2118_v8, %v1942_v63 }
0x103a   :  { %v5386_v36 = vpack.c.bf16 %v2117_v3, %v2113_v7 }
0x103b   :  { %v5388_v31 = vpack.c.bf16 %v2119_v43, %v2115_v6 }
0x103c   :  { %4173 = vmatprep.mubr.msk.bf16.mxu1 %vm444_vm0, %v5386_v36 }
0x103d   :  { %v2122_v38 = vpop.f32.mrb[36].mxu1  ;;  %v4167_v9 = vpop.f32.mrb[32].mxu0  ;;  %4261 = vmatprep.subr.msk.bf16.mxu1 %vm444_vm0, %v5388_v31  ;;  %v2193_v47 = vsel %vm444_vm0, %v5388_v31, 0 }
0x103e   :  { %v2124_v55 = vpop.f32.mrb[37].mxu1  ;;  %v2165_v57 = vpop.f32.mrb[33].mxu0  ;;  %4170 = vmatpush3.bf16.xpose.msra.mxu1 %v2193_v47  ;;  %v2123_v20 = vadd.f32 %v2122_v38, %v1938_v60  ;;  %v2174_v5 = vadd.f32 %v4167_v9, %v1946_v41 }
0x103f   :  { %v2126_v4 = vpop.f32.mrb[38].mxu1  ;;  %v4168_v18 = vpop.f32.mrb[34].mxu0  ;;  %v2125_v19 = vadd.f32 %v2124_v55, %v1942_v63  ;;  %v2166_v10 = vadd.f32 %v2165_v57, %v1946_v41 }
0x1040   :  { %v2127_v16 = vadd.f32 %v2126_v4, %v1938_v60  ;;  %v2177_v59 = vadd.f32 %v4168_v18, %v1946_v41  ;;  %v2128_v21 = vpop.f32.mrb[39].mxu1  ;;  %v2168_v14 = vpop.f32.mrb[35].mxu0 }
0x1041   :  { %v2129_v1 = vadd.f32 %v2128_v21, %v1942_v63  ;;  %v2169_v52 = vadd.f32 %v2168_v14, %v1946_v41 }
0x1042   :  { %v5398_v22 = vpack.c.bf16 %v2127_v16, %v2123_v20  ;;  %v5400_v23 = vpack.c.bf16 %v2177_v59, %v2174_v5 }
0x1043   :  { %v5402_v53 = vpack.c.bf16 %v2129_v1, %v2125_v19  ;;  %v5404_v12 = vpack.c.bf16 %v2169_v52, %v2166_v10 }
0x1045   :  { %4262 = vmatprep.subr.msk.bf16.mxu1 %vm444_vm0, %v5402_v53  ;;  %v2196_v11 = vsel %vm444_vm0, %v5402_v53, 0 }
0x1046   :  { %4172 = vmatpush3.bf16.xpose.msra.mxu1 %v2196_v11 }
0x1047   :  { %4177 = vmatprep.subr.bf16.mxu1 %v5404_v12 }
0x104d   :  { %4174 = vmatmul.mubr.msk.bf16.vlgmr.msra.gmra.mrb[40].mxu1 %vm444_vm0, %v5398_v22 }
0x104e   :  { %4178 = vmatpush3.bf16.msra.mxu1 %v5404_v12 }
0x104f   :  { %4179 = vmatprep.subr.bf16.mxu1 %v5400_v23 }
0x1052   :  { %4180 = vmatpush3.bf16.msra.mxu1 %v5400_v23 }
0x1120   :  { %v4175_v24 = vpop.f32.mrb[40].mxu1 }
0x1121   :  { %v2232_v25 = vpop.f32.mrb[41].mxu1  ;;  %v2241_v32 = vadd.f32 %v5425_v30, %v4175_v24 }
0x1122   :  { %v2233_v27 = vadd.f32 %v5419_v26, %v2232_v25  ;;  %v4176_v28 = vpop.f32.mrb[42].mxu1 }
0x1123   :  { %v2235_v29 = vpop.f32.mrb[43].mxu1  ;;  %v2244_v45 = vadd.f32 %v5438_v42, %v4176_v28  ;;  %v2253_v13 = vsel %vm444_vm0, %v2241_v32, -inf }
0x1124   :  { %v2236_v35 = vadd.f32 %v5431_v34, %v2235_v29  ;;  %v2247_v37 = vsel %vm444_vm0, %v2233_v27, -inf }
0x1125   :  { %2248 = vmax.xlane.f32.xlu0 %v2247_v37  ;;  %v2256_v44 = vsel %vm444_vm0, %v2244_v45, -inf }
0x1126   :  { %v2250_v62 = vsel %vm444_vm0, %v2236_v35, -inf }
0x1127   :  { %2251 = vmax.xlane.f32.xlu1 %v2250_v62 }
0x1129   :  { %2254 = vmax.xlane.f32.xlu0 %v2253_v13 }
0x112b   :  { %2257 = vmax.xlane.f32.xlu1 %v2256_v44 }
0x11b2   :  { %v2249_v40 = vpop.xlane.xlu0 %2248 }
0x11b3   :  { %v2259_v48 = vsub.f32 %v2233_v27, %v2249_v40 }
0x11b4   :  { %v2252_v49 = vpop.xlane.xlu1 %2251 }
0x11b5   :  { %v2260_v50 = vsub.f32 %v2236_v35, %v2252_v49  ;;  %v2263_v61 = vmul.f32 1.442695, %v2259_v48 }
0x11b6   :  { %v2255_v56 = vpop.xlane.xlu0 %2254 }
0x11b7   :  { %v2265_v58 = vmul.f32 1.442695, %v2260_v50  ;;  %v2261_v60 = vsub.f32 %v2241_v32, %v2255_v56 }
0x11b8   :  { %v2258_v63 = vpop.xlane.xlu1 %2257 }
0x11b9   :  { %4542 = vpow2.f32 %v2265_v58  ;;  %v2267_v0 = vmul.f32 1.442695, %v2261_v60  ;;  %v2262_v2 = vsub.f32 %v2244_v45, %v2258_v63 }
0x11bb   :  { %4544 = vpow2.f32 %v2267_v0  ;;  %v2269_v7 = vmul.f32 1.442695, %v2262_v2 }
0x11bc   :  { %4546 = vpow2.f32 %v2263_v61 }
0x11bd   :  { %4548 = vpow2.f32 %v2269_v7 }
0x11c3   :  { %v4543_v3 = vpop.eup %4542 }
0x11c4   :  { %v2274_v8 = vsel %vm444_vm0, %v4543_v3, 0.0 }
0x11c5   :  { %v4545_v6 = vpop.eup %4544  ;;  %2275 = vadd.xlane.f32.xlu1 %v2274_v8 }
0x11c6   :  { %v4547_v43 = vpop.eup %4546  ;;  %v2277_v41 = vsel %vm444_vm0, %v4545_v6, 0.0 }
0x11c7   :  { %v4549_v38 = vpop.eup %4548  ;;  %2278 = vadd.xlane.f32.xlu0 %v2277_v41  ;;  %v2271_v47 = vsel %vm444_vm0, %v4547_v43, 0.0 }
0x11c8   :  { %v2280_v9 = vsel %vm444_vm0, %v4549_v38, 0.0 }
0x11c9   :  { %2281 = vadd.xlane.f32.xlu1 %v2280_v9 }
0x11cb   :  { %2272 = vadd.xlane.f32.xlu0 %v2271_v47 }
0x11da   :  { %2362 = vrot.lane.b32.xlu1 %v5402_v53, %s4697_s25 }
0x11de   :  { %2354 = vrot.lane.b32.xlu1 %v5386_v36, %s4697_s25 }
0x11e1   :  { %2360 = vrot.lane.b32.xlu0 %v5388_v31, %s4697_s25 }
0x11e2   :  { %2356 = vrot.lane.b32.xlu1 %v5398_v22, %s4697_s25 }
0x1252   :  { %v2276_v55 = vpop.xlane.xlu1 %2275 }
0x1253   :  { %4550 = vrcp.f32 %v2276_v55 }
0x1254   :  { %v2279_v57 = vpop.xlane.xlu0 %2278 }
0x1256   :  { %v2282_v4 = vpop.xlane.xlu1 %2281 }
0x1257   :  { %4552 = vrcp.f32 %v2282_v4 }
0x1258   :  { %4554 = vrcp.f32 %v2279_v57  ;;  %v2273_v18 = vpop.xlane.xlu0 %2272 }
0x1259   :  { %4556 = vrcp.f32 %v2273_v18 }
0x125a   :  { %v2363_v19 = vpop.permute.xlu1 %2362 }
0x125b   :  { %v2374_v28 = vsel %vm444_vm0, %v2363_v19, 0 }
0x125c   :  { %v2361_v20 = vpop.permute.xlu0 %2360 }
0x125d   :  { %4263 = vmatprep.subr.msk.bf16.mxu1 %vm444_vm0, %v2361_v20  ;;  %v4551_v5 = vpop.eup %4550  ;;  %v2371_v25 = vsel %vm444_vm0, %v2361_v20, 0 }
0x125e   :  { %v2288_v1 = vmul.f32 %v4551_v5, %v4543_v3  ;;  %v2355_v27 = vpop.permute.xlu1 %2354 }
0x1261   :  { %v4553_v16 = vpop.eup %4552 }
0x1262   :  { %v4555_v59 = vpop.eup %4554  ;;  %v2290_v14 = vmul.f32 %v4553_v16, %v4549_v38  ;;  %v2357_v29 = vpop.permute.xlu1 %2356 }
0x1263   :  { %v4557_v21 = vpop.eup %4556  ;;  %v2289_v52 = vmul.f32 %v4555_v59, %v4545_v6 }
0x1264   :  { %v2287_v10 = vmul.f32 %v4557_v21, %v4547_v43 }
0x1265   :  { %v2292_v24 = vpack.c.bf16 %v2290_v14, %v2289_v52 }
0x1266   :  { %v2291_v11 = vpack.c.bf16 %v2288_v1, %v2287_v10 }
0x1268   :  { %4181 = vmatprep.mubr.msk.bf16.mxu1 %vm444_vm0, %v2291_v11 }
0x1269   :  { %4182 = vmatmul.mubr.msk.bf16.vlgmr.msra.gmra.mrb[44].mxu1 %vm444_vm0, %v2292_v24 }
0x126a   :  { %4186 = vmatpush3.bf16.xpose.msra.mxu1 %v2371_v25  ;;  %4189 = vmatprep.mubr.msk.bf16.mxu1 %vm444_vm0, %v2355_v27 }
0x126b   :  { %4264 = vmatprep.subr.msk.bf16.mxu1 %vm444_vm0, %v2363_v19 }
0x1272   :  { %4188 = vmatpush3.bf16.xpose.msra.mxu1 %v2374_v28 }
0x1279   :  { %4190 = vmatmul.mubr.msk.bf16.vlgmr.msra.gmra.mrb[48].mxu1 %vm444_vm0, %v2357_v29 }
0x133c   :  { %v4183_v32 = vpop.f32.mrb[44].mxu1 }
0x133d   :  { %2350 = vst.msk [vmem:[#allocation2 + $0x10] sm:$0xff] %vm444_vm0, %v4183_v32  ;;  %v2333_v35 = vpop.f32.mrb[45].mxu1 }
0x133e   :  { %2348 = vst.msk [vmem:[#allocation2] sm:$0xff] %vm444_vm0, %v2333_v35  ;;  %v4184_v37 = vpop.f32.mrb[46].mxu1 }
0x133f   :  { %2351 = vst.msk [vmem:[#allocation2 + $0x18] sm:$0xff] %vm444_vm0, %v4184_v37  ;;  %v2336_v45 = vpop.f32.mrb[47].mxu1 }
0x1340   :  { %2349 = vst.msk [vmem:[#allocation2 + $0x8] sm:$0xff] %vm444_vm0, %v2336_v45 }
0x134c   :  { %v4191_v62 = vpop.f32.mrb[48].mxu1 }
0x134d   :  { %v2410_v13 = vpop.f32.mrb[49].mxu1  ;;  %v2419_v49 = vadd.f32 %v5425_v30, %v4191_v62 }
0x134e   :  { %v2411_v44 = vadd.f32 %v5419_v26, %v2410_v13  ;;  %v4192_v40 = vpop.f32.mrb[50].mxu1 }
0x134f   :  { %v2413_v48 = vpop.f32.mrb[51].mxu1  ;;  %v2422_v60 = vadd.f32 %v5438_v42, %v4192_v40  ;;  %v2431_v61 = vsel %vm444_vm0, %v2419_v49, -inf }
0x1350   :  { %v2414_v50 = vadd.f32 %v5431_v34, %v2413_v48  ;;  %v2425_v56 = vsel %vm444_vm0, %v2411_v44, -inf }
0x1351   :  { %2426 = vmax.xlane.f32.xlu0 %v2425_v56  ;;  %v2434_v63 = vsel %vm444_vm0, %v2422_v60, -inf }
0x1352   :  { %v2428_v58 = vsel %vm444_vm0, %v2414_v50, -inf }
0x1353   :  { %2429 = vmax.xlane.f32.xlu1 %v2428_v58 }
0x1355   :  { %2432 = vmax.xlane.f32.xlu0 %v2431_v61 }
0x1359   :  { %2435 = vmax.xlane.f32.xlu0 %v2434_v63 }
0x1364   :  { %2475 = vrot.lane.b32.xlu1 %v5400_v23, %s4697_s25 }
0x13de   :  { %v2427_v0 = vpop.xlane.xlu0 %2426 }
0x13df   :  { %v2437_v2 = vsub.f32 %v2411_v44, %v2427_v0 }
0x13e0   :  { %v2430_v7 = vpop.xlane.xlu1 %2429 }
0x13e1   :  { %v2441_v6 = vmul.f32 1.442695, %v2437_v2  ;;  %v2438_v43 = vsub.f32 %v2414_v50, %v2430_v7 }
0x13e2   :  { %v2433_v3 = vpop.xlane.xlu0 %2432 }
0x13e3   :  { %v2439_v8 = vsub.f32 %v2419_v49, %v2433_v3  ;;  %v2443_v47 = vmul.f32 1.442695, %v2438_v43 }
0x13e4   :  { %v2476_v14 = vpop.permute.xlu1 %2475 }
0x13e5   :  { %v2445_v41 = vmul.f32 1.442695, %v2439_v8 }
0x13e6   :  { %v2436_v38 = vpop.xlane.xlu0 %2435 }
0x13e7   :  { %4558 = vpow2.f32 %v2445_v41  ;;  %v2440_v9 = vsub.f32 %v2422_v60, %v2436_v38 }
0x13e8   :  { %4560 = vpow2.f32 %v2441_v6 }
0x13e9   :  { %v2447_v55 = vmul.f32 1.442695, %v2440_v9 }
0x13eb   :  { %4562 = vpow2.f32 %v2447_v55 }
0x13ec   :  { %4564 = vpow2.f32 %v2443_v47 }
0x13f1   :  { %v4559_v57 = vpop.eup %4558 }
0x13f2   :  { %v2455_v4 = vsel %vm444_vm0, %v4559_v57, 0.0  ;;  %v4561_v18 = vpop.eup %4560 }
0x13f3   :  { %2456 = vadd.xlane.f32.xlu0 %v2455_v4  ;;  %v2449_v5 = vsel %vm444_vm0, %v4561_v18, 0.0 }
0x13f5   :  { %v4563_v20 = vpop.eup %4562 }
0x13f6   :  { %v2458_v16 = vsel %vm444_vm0, %v4563_v20, 0.0  ;;  %v4565_v59 = vpop.eup %4564 }
0x13f7   :  { %2450 = vadd.xlane.f32.xlu0 %v2449_v5  ;;  %2459 = vadd.xlane.f32.xlu1 %v2458_v16  ;;  %v2452_v21 = vsel %vm444_vm0, %v4565_v59, 0.0 }
0x13fb   :  { %2453 = vadd.xlane.f32.xlu1 %v2452_v21 }
0x140c   :  { %2558 = vrot.lane.b32.xlu1 %v5388_v31, %s4694_s10 }
0x140d   :  { %2473 = vrot.lane.b32.xlu0 %v5404_v12, %s4697_s25 }
0x1410   :  { %2560 = vrot.lane.b32.xlu1 %v5402_v53, %s4694_s10 }
0x1411   :  { %2554 = vrot.lane.b32.xlu0 %v5386_v36, %s4694_s10 }
0x1414   :  { %2556 = vrot.lane.b32.xlu1 %v5398_v22, %s4694_s10 }
0x1480   :  { %v2457_v19 = vpop.xlane.xlu0 %2456 }
0x1484   :  { %v2460_v10 = vpop.xlane.xlu1 %2459  ;;  %v2451_v1 = vpop.xlane.xlu0 %2450 }
0x1485   :  { %4566 = vrcp.f32 %v2460_v10 }
0x1486   :  { %4568 = vrcp.f32 %v2451_v1 }
0x1487   :  { %4570 = vrcp.f32 %v2457_v19 }
0x1488   :  { %v2454_v52 = vpop.xlane.xlu1 %2453  ;;  %v2474_v11 = vpop.permute.xlu0 %2473 }
0x1489   :  { %4572 = vrcp.f32 %v2454_v52  ;;  %4193 = vmatprep.subr.bf16.mxu0 %v2474_v11 }
0x148a   :  { %4194 = vmatpush3.bf16.msra.mxu0 %v2474_v11 }
0x148b   :  { %4195 = vmatprep.subr.bf16.mxu0 %v2476_v14 }
0x148c   :  { %v2559_v24 = vpop.permute.xlu1 %2558  ;;  %v2555_v40 = vpop.permute.xlu0 %2554 }
0x148d   :  { %v2569_v44 = vsel %vm444_vm0, %v2559_v24, 0 }
0x148e   :  { %4196 = vmatpush3.bf16.msra.mxu0 %v2476_v14 }
0x148f   :  { %4265 = vmatprep.subr.msk.bf16.mxu0 %vm444_vm0, %v2559_v24  ;;  %v4567_v25 = vpop.eup %4566 }
0x1490   :  { %v4569_v27 = vpop.eup %4568  ;;  %v2468_v32 = vmul.f32 %v4567_v25, %v4563_v20  ;;  %v2561_v48 = vpop.permute.xlu1 %2560 }
0x1491   :  { %v4571_v28 = vpop.eup %4570  ;;  %v2465_v35 = vmul.f32 %v4569_v27, %v4561_v18  ;;  %v2572_v49 = vsel %vm444_vm0, %v2561_v48, 0 }
0x1492   :  { %v2467_v45 = vmul.f32 %v4571_v28, %v4559_v57 }
0x1493   :  { %v4573_v29 = vpop.eup %4572 }
0x1494   :  { %v2466_v37 = vmul.f32 %v4573_v29, %v4565_v59  ;;  %v2470_v13 = vpack.c.bf16 %v2468_v32, %v2467_v45  ;;  %v2557_v50 = vpop.permute.xlu1 %2556 }
0x1496   :  { %v2469_v62 = vpack.c.bf16 %v2466_v37, %v2465_v35 }
0x1498   :  { %4197 = vmatprep.mubr.msk.bf16.mxu0 %vm444_vm0, %v2469_v62 }
0x1499   :  { %4198 = vmatmul.mubr.msk.bf16.vlgmr.msra.gmra.mrb[36].mxu0 %vm444_vm0, %v2470_v13 }
0x149a   :  { %4202 = vmatpush3.bf16.xpose.msra.mxu0 %v2569_v44  ;;  %4205 = vmatprep.mubr.msk.bf16.mxu0 %vm444_vm0, %v2555_v40 }
0x149b   :  { %4266 = vmatprep.subr.msk.bf16.mxu0 %vm444_vm0, %v2561_v48 }
0x14a2   :  { %4204 = vmatpush3.bf16.xpose.msra.mxu0 %v2572_v49 }
0x14a9   :  { %4206 = vmatmul.mubr.msk.bf16.vlgmr.msra.gmra.mrb[40].mxu0 %vm444_vm0, %v2557_v50 }
0x156c   :  { %v5500_v56 = vpop.f32.mrb[36].mxu0 }
0x156d   :  { %v5502_v58 = vpop.f32.mrb[37].mxu0 }
0x156e   :  { %v5504_v60 = vpop.f32.mrb[38].mxu0 }
0x156f   :  { %v5506_v61 = vpop.f32.mrb[39].mxu0 }
0x157c   :  { %v4207_v63 = vpop.f32.mrb[40].mxu0 }
0x157d   :  { %v2608_v0 = vpop.f32.mrb[41].mxu0  ;;  %v2617_v8 = vadd.f32 %v5425_v30, %v4207_v63 }
0x157e   :  { %v2609_v2 = vadd.f32 %v5419_v26, %v2608_v0  ;;  %v4208_v7 = vpop.f32.mrb[42].mxu0 }
0x157f   :  { %v2611_v3 = vpop.f32.mrb[43].mxu0  ;;  %v2620_v38 = vadd.f32 %v5438_v42, %v4208_v7  ;;  %v2629_v9 = vsel %vm444_vm0, %v2617_v8, -inf }
0x1580   :  { %v2612_v6 = vadd.f32 %v5431_v34, %v2611_v3  ;;  %v2623_v43 = vsel %vm444_vm0, %v2609_v2, -inf }
0x1581   :  { %2624 = vmax.xlane.f32.xlu0 %v2623_v43  ;;  %v2632_v47 = vsel %vm444_vm0, %v2620_v38, -inf }
0x1582   :  { %v2626_v41 = vsel %vm444_vm0, %v2612_v6, -inf }
0x1583   :  { %2627 = vmax.xlane.f32.xlu1 %v2626_v41 }
0x1585   :  { %2630 = vmax.xlane.f32.xlu0 %v2629_v9 }
0x1589   :  { %2633 = vmax.xlane.f32.xlu0 %v2632_v47 }
0x1594   :  { %2671 = vrot.lane.b32.xlu1 %v5400_v23, %s4694_s10 }
0x160e   :  { %v2625_v55 = vpop.xlane.xlu0 %2624 }
0x160f   :  { %v2635_v57 = vsub.f32 %v2609_v2, %v2625_v55 }
0x1610   :  { %v2628_v4 = vpop.xlane.xlu1 %2627 }
0x1611   :  { %v2639_v5 = vmul.f32 1.442695, %v2635_v57  ;;  %v2636_v16 = vsub.f32 %v2612_v6, %v2628_v4 }
0x1612   :  { %v2631_v18 = vpop.xlane.xlu0 %2630 }
0x1613   :  { %v2637_v20 = vsub.f32 %v2617_v8, %v2631_v18  ;;  %v2641_v19 = vmul.f32 1.442695, %v2636_v16 }
0x1614   :  { %v2672_v32 = vpop.permute.xlu1 %2671 }
0x1615   :  { %v2643_v59 = vmul.f32 1.442695, %v2637_v20 }
0x1616   :  { %v2634_v21 = vpop.xlane.xlu0 %2633 }
0x1617   :  { %4574 = vpow2.f32 %v2643_v59  ;;  %v2638_v14 = vsub.f32 %v2620_v38, %v2634_v21 }
0x1618   :  { %4576 = vpow2.f32 %v2639_v5 }
0x1619   :  { %v2645_v10 = vmul.f32 1.442695, %v2638_v14 }
0x161b   :  { %4578 = vpow2.f32 %v2645_v10 }
0x161c   :  { %4580 = vpow2.f32 %v2641_v19 }
0x1621   :  { %v4575_v1 = vpop.eup %4574 }
0x1622   :  { %v2653_v52 = vsel %vm444_vm0, %v4575_v1, 0.0  ;;  %v4577_v11 = vpop.eup %4576 }
0x1623   :  { %2654 = vadd.xlane.f32.xlu0 %v2653_v52  ;;  %v2647_v25 = vsel %vm444_vm0, %v4577_v11, 0.0 }
0x1625   :  { %v4579_v24 = vpop.eup %4578 }
0x1626   :  { %v2656_v27 = vsel %vm444_vm0, %v4579_v24, 0.0  ;;  %v4581_v28 = vpop.eup %4580 }
0x1627   :  { %2648 = vadd.xlane.f32.xlu0 %v2647_v25  ;;  %2657 = vadd.xlane.f32.xlu1 %v2656_v27  ;;  %v2650_v29 = vsel %vm444_vm0, %v4581_v28, 0.0 }
0x162b   :  { %2651 = vadd.xlane.f32.xlu1 %v2650_v29 }
0x163c   :  { %2754 = vrot.lane.b32.xlu1 %v5388_v31, %s4698_s26 }
0x163d   :  { %2669 = vrot.lane.b32.xlu0 %v5404_v12, %s4694_s10 }
0x1640   :  { %2756 = vrot.lane.b32.xlu1 %v5402_v53, %s4698_s26 }
0x1641   :  { %2750 = vrot.lane.b32.xlu0 %v5386_v36, %s4698_s26 }
0x1644   :  { %2752 = vrot.lane.b32.xlu1 %v5398_v22, %s4698_s26 }
0x16b0   :  { %v2655_v35 = vpop.xlane.xlu0 %2654 }
0x16b4   :  { %v2658_v37 = vpop.xlane.xlu1 %2657  ;;  %v2649_v45 = vpop.xlane.xlu0 %2648 }
0x16b5   :  { %4582 = vrcp.f32 %v2658_v37 }
0x16b6   :  { %4584 = vrcp.f32 %v2649_v45 }
0x16b7   :  { %4586 = vrcp.f32 %v2655_v35 }
0x16b8   :  { %v2652_v31 = vpop.xlane.xlu1 %2651  ;;  %v2670_v62 = vpop.permute.xlu0 %2669 }
0x16b9   :  { %4588 = vrcp.f32 %v2652_v31  ;;  %4209 = vmatprep.subr.bf16.mxu1 %v2670_v62 }
0x16ba   :  { %4210 = vmatpush3.bf16.msra.mxu1 %v2670_v62 }
0x16bb   :  { %4211 = vmatprep.subr.bf16.mxu1 %v2672_v32 }
0x16bc   :  { %v2755_v53 = vpop.permute.xlu1 %2754  ;;  %v2751_v7 = vpop.permute.xlu0 %2750 }
0x16bd   :  { %v2765_v2 = vsel %vm444_vm0, %v2755_v53, 0 }
0x16be   :  { %4212 = vmatpush3.bf16.msra.mxu1 %v2672_v32 }
0x16bf   :  { %4267 = vmatprep.subr.msk.bf16.mxu1 %vm444_vm0, %v2755_v53  ;;  %v4583_v36 = vpop.eup %4582 }
0x16c0   :  { %v4585_v13 = vpop.eup %4584  ;;  %v2666_v40 = vmul.f32 %v4583_v36, %v4579_v24  ;;  %v2757_v3 = vpop.permute.xlu1 %2756 }
0x16c1   :  { %v4587_v22 = vpop.eup %4586  ;;  %v2663_v48 = vmul.f32 %v4585_v13, %v4577_v11  ;;  %v2768_v8 = vsel %vm444_vm0, %v2757_v3, 0 }
0x16c2   :  { %v2665_v50 = vmul.f32 %v4587_v22, %v4575_v1 }
0x16c3   :  { %v4589_v44 = vpop.eup %4588 }
0x16c4   :  { %v2664_v49 = vmul.f32 %v4589_v44, %v4581_v28  ;;  %v2668_v0 = vpack.c.bf16 %v2666_v40, %v2665_v50  ;;  %v2753_v6 = vpop.permute.xlu1 %2752 }
0x16c6   :  { %v2667_v63 = vpack.c.bf16 %v2664_v49, %v2663_v48 }
0x16c8   :  { %4213 = vmatprep.mubr.msk.bf16.mxu1 %vm444_vm0, %v2667_v63 }
0x16c9   :  { %4214 = vmatmul.mubr.msk.bf16.vlgmr.msra.gmra.mrb[52].mxu1 %vm444_vm0, %v2668_v0 }
0x16ca   :  { %4218 = vmatpush3.bf16.xpose.msra.mxu1 %v2765_v2  ;;  %4221 = vmatprep.mubr.msk.bf16.mxu1 %vm444_vm0, %v2751_v7 }
0x16cb   :  { %4268 = vmatprep.subr.msk.bf16.mxu1 %vm444_vm0, %v2757_v3 }
0x16d2   :  { %4220 = vmatpush3.bf16.xpose.msra.mxu1 %v2768_v8 }
0x16d9   :  { %4222 = vmatmul.mubr.msk.bf16.vlgmr.msra.gmra.mrb[56].mxu1 %vm444_vm0, %v2753_v6 }
0x16da   :  { %3290 = vmatprep.mubr.bf16.mxu1 %v4696_v39 }
0x179c   :  { %v4215_v43 = vpop.f32.mrb[52].mxu1 }
0x179d   :  { %v2715_v41 = vpop.f32.mrb[53].mxu1 }
0x179e   :  { %v4216_v38 = vpop.f32.mrb[54].mxu1 }
0x179f   :  { %v2718_v9 = vpop.f32.mrb[55].mxu1 }
0x17ac   :  { %v4223_v47 = vpop.f32.mrb[56].mxu1 }
0x17ad   :  { %v2804_v55 = vpop.f32.mrb[57].mxu1  ;;  %v2813_v20 = vadd.f32 %v5425_v30, %v4223_v47  ;;  %v4391_v47 = vld [vmem:[%s5715_s6 + $0x48] sm:$0xff]  }
0x17ae   :  { %v2805_v57 = vadd.f32 %v5419_v26, %v2804_v55  ;;  %v4224_v4 = vpop.f32.mrb[58].mxu1  ;;  %v4392_v55 = vld [vmem:[%s5715_s6 + $0x50] sm:$0xff]  }
0x17af   :  { %v2807_v18 = vpop.f32.mrb[59].mxu1  ;;  %v2816_v21 = vadd.f32 %v5438_v42, %v4224_v4  ;;  %v2825_v14 = vsel %vm444_vm0, %v2813_v20, -inf  ;;  %v4394_v4 = vld [vmem:[%s5715_s6 + $0x60] sm:$0xff]  }
0x17b0   :  { %v2808_v5 = vadd.f32 %v5431_v34, %v2807_v18  ;;  %v2819_v16 = vsel %vm444_vm0, %v2805_v57, -inf  ;;  %v4395_v18 = vld [vmem:[%s5715_s6 + $0x68] sm:$0xff]  }
0x17b1   :  { %2820 = vmax.xlane.f32.xlu0 %v2819_v16  ;;  %v2828_v19 = vsel %vm444_vm0, %v2816_v21, -inf }
0x17b2   :  { %v2822_v59 = vsel %vm444_vm0, %v2808_v5, -inf }
0x17b3   :  { %2823 = vmax.xlane.f32.xlu1 %v2822_v59 }
0x17b5   :  { %2826 = vmax.xlane.f32.xlu0 %v2825_v14 }
0x17b9   :  { %2829 = vmax.xlane.f32.xlu0 %v2828_v19 }
0x183e   :  { %v2821_v26 = vpop.xlane.xlu0 %2820 }
0x183f   :  { %v2831_v10 = vsub.f32 %v2805_v57, %v2821_v26  ;;  %v4393_v57 = vld [vmem:[%s5715_s6 + $0x58] sm:$0xff]  }
0x1840   :  { %v2824_v1 = vpop.xlane.xlu1 %2823 }
0x1841   :  { %v2835_v34 = vmul.f32 1.442695, %v2831_v10  ;;  %v2832_v11 = vsub.f32 %v2808_v5, %v2824_v1  ;;  %v4397_v5 = vld [vmem:[%s5715_s6 + $0x78] sm:$0xff]  }
0x1842   :  { %v2827_v30 = vpop.xlane.xlu0 %2826 }
0x1843   :  { %v2833_v52 = vsub.f32 %v2813_v20, %v2827_v30  ;;  %v2837_v28 = vmul.f32 1.442695, %v2832_v11  ;;  %v4396_v20 = vld [vmem:[%s5715_s6 + $0x70] sm:$0xff]  }
0x1845   :  { %v2839_v24 = vmul.f32 1.442695, %v2833_v52 }
0x1846   :  { %v2830_v25 = vpop.xlane.xlu0 %2829 }
0x1847   :  { %4590 = vpow2.f32 %v2839_v24  ;;  %v2834_v27 = vsub.f32 %v2816_v21, %v2830_v25 }
0x1848   :  { %4592 = vpow2.f32 %v2835_v34 }
0x1849   :  { %v2841_v42 = vmul.f32 1.442695, %v2834_v27  ;;  %v3833_v27 = vld [vmem:[%s5716_s7 + $0x1] ss:$0 sm:$0xff] }
0x184b   :  { %4594 = vpow2.f32 %v2841_v42 }
0x184c   :  { %4596 = vpow2.f32 %v2837_v28 }
0x1851   :  { %v4591_v29 = vpop.eup %4590 }
0x1852   :  { %v2849_v32 = vsel %vm444_vm0, %v4591_v29, 0.0  ;;  %v4593_v35 = vpop.eup %4592 }
0x1853   :  { %2850 = vadd.xlane.f32.xlu0 %v2849_v32  ;;  %v2843_v45 = vsel %vm444_vm0, %v4593_v35, 0.0 }
0x1855   :  { %v4595_v37 = vpop.eup %4594 }
0x1856   :  { %v2852_v31 = vsel %vm444_vm0, %v4595_v37, 0.0  ;;  %v4597_v62 = vpop.eup %4596 }
0x1857   :  { %2844 = vadd.xlane.f32.xlu0 %v2843_v45  ;;  %2853 = vadd.xlane.f32.xlu1 %v2852_v31  ;;  %v2846_v53 = vsel %vm444_vm0, %v4597_v62, 0.0 }
0x185b   :  { %2847 = vadd.xlane.f32.xlu1 %v2846_v53 }
0x186c   :  { %2867 = vrot.lane.b32.xlu1 %v5400_v23, %s4698_s26 }
0x186d   :  { %2865 = vrot.lane.b32.xlu0 %v5404_v12, %s4698_s26 }
0x1870   :  { %2538 = vrot.lane.b32.xlu1 %v5502_v58, %s4698_s26 }
0x1871   :  { %2542 = vrot.lane.b32.xlu0 %v5500_v56, %s4698_s26 }
0x1874   :  { %2540 = vrot.lane.b32.xlu1 %v5506_v61, %s4698_s26 }
0x1875   :  { %2734 = vrot.lane.b32.xlu0 %v2715_v41, %s4694_s10 }
0x1878   :  { %2544 = vrot.lane.b32.xlu1 %v5504_v60, %s4698_s26 }
0x1879   :  { %2738 = vrot.lane.b32.xlu0 %v4215_v43, %s4694_s10 }
0x187c   :  { %2736 = vrot.lane.b32.xlu1 %v2718_v9, %s4694_s10  ;;  %v4390_v9 = vld [vmem:[%s5715_s6 + $0x40] sm:$0xff]  }
0x1880   :  { %2740 = vrot.lane.b32.xlu1 %v4216_v38, %s4694_s10 }
0x18e0   :  { %v2851_v23 = vpop.xlane.xlu0 %2850 }
0x18e4   :  { %v2854_v12 = vpop.xlane.xlu1 %2853  ;;  %v2845_v58 = vpop.xlane.xlu0 %2844 }
0x18e5   :  { %4598 = vrcp.f32 %v2854_v12 }
0x18e6   :  { %4600 = vrcp.f32 %v2845_v58  ;;  %v4398_v58 = vld [vmem:[#allocation3 + $0x80] ss:$8 sps:$4 sm:$0xff]  }
0x18e7   :  { %4602 = vrcp.f32 %v2851_v23 }
0x18e8   :  { %v2848_v56 = vpop.xlane.xlu1 %2847  ;;  %v2866_v36 = vpop.permute.xlu0 %2865 }
0x18e9   :  { %4604 = vrcp.f32 %v2848_v56  ;;  %4225 = vmatprep.subr.bf16.mxu0 %v2866_v36  ;;  %v4400_v56 = vld [vmem:[#allocation3 + $0x84] ss:$8 sps:$4 sm:$0xff]  }
0x18ea   :  { %4226 = vmatpush3.bf16.msra.mxu0 %v2866_v36  ;;  %v4403_v36 = vld [vmem:[#allocation3 + $0x94] ss:$8 sps:$4 sm:$0xff]   ;;  %3258 = vmatprep.subr.bf16.mxu1 %v4400_v56 }
0x18eb   :  { %3259 = vmatpush1.bf16.msra.mxu1 %v4398_v58 }
0x18ec   :  { %v2868_v61 = vpop.permute.xlu1 %2867  ;;  %v2543_v13 = vpop.permute.xlu0 %2542  ;;  %3260 = vmatprep.subr.bf16.mxu1 %v4403_v36 }
0x18ed   :  { %2552 = vst.msk [vmem:[#allocation2 + $0x10] sm:$0xff] %vm809_vm1, %v2543_v13  ;;  %4227 = vmatprep.subr.bf16.mxu0 %v2868_v61 }
0x18ee   :  { %4228 = vmatpush3.bf16.msra.mxu0 %v2868_v61  ;;  %v4401_v61 = vld [vmem:[#allocation3 + $0x90] ss:$8 sps:$4 sm:$0xff]  }
0x18ef   :  { %v4599_v60 = vpop.eup %4598  ;;  %4233 = vmatprep.subr.bf16.mxu0 %v4390_v9  ;;  %3261 = vmatpush1.bf16.msra.mxu1 %v4401_v61  ;;  %v4422_v61 = vld [vmem:[#allocation5 + $0xc0] sm:$0xff]  }
0x18f0   :  { %v2539_v22 = vpop.permute.xlu1 %2538  ;;  %v2735_v44 = vpop.permute.xlu0 %2734  ;;  %v2862_v50 = vmul.f32 %v4599_v60, %v4595_v37 }
0x18f1   :  { %v4601_v40 = vpop.eup %4600  ;;  %2550 = vst.msk [vmem:[#allocation2] sm:$0xff] %vm809_vm1, %v2539_v22 }
0x18f2   :  { %v4603_v48 = vpop.eup %4602  ;;  %2746 = vst.msk [vmem:[#allocation2] sm:$0xff] %vm1006_vm2, %v2735_v44  ;;  %v2859_v2 = vmul.f32 %v4601_v40, %v4593_v35 }
0x18f3   :  { %v4605_v49 = vpop.eup %4604  ;;  %v2861_v3 = vmul.f32 %v4603_v48, %v4591_v29 }
0x18f4   :  { %v2541_v63 = vpop.permute.xlu1 %2540  ;;  %v2739_v0 = vpop.permute.xlu0 %2738  ;;  %v2860_v7 = vmul.f32 %v4605_v49, %v4597_v62 }
0x18f5   :  { %2551 = vst.msk [vmem:[#allocation2 + $0x8] sm:$0xff] %vm809_vm1, %v2541_v63  ;;  %v2864_v6 = vpack.c.bf16 %v2862_v50, %v2861_v3  ;;  %v4406_v3 = vld [vmem:[#allocation3 + $0xa4] ss:$8 sps:$4 sm:$0xff]  }
0x18f6   :  { %2748 = vst.msk [vmem:[#allocation2 + $0x10] sm:$0xff] %vm1006_vm2, %v2739_v0  ;;  %v2863_v8 = vpack.c.bf16 %v2860_v7, %v2859_v2  ;;  %3262 = vmatprep.subr.bf16.mxu1 %v4406_v3 }
0x18f8   :  { %v2545_v43 = vpop.permute.xlu1 %2544  ;;  %4229 = vmatprep.mubr.msk.bf16.mxu0 %vm444_vm0, %v2863_v8  ;;  %v4404_v8 = vld [vmem:[#allocation3 + $0xa0] ss:$8 sps:$4 sm:$0xff]  }
0x18f9   :  { %2553 = vst.msk [vmem:[#allocation2 + $0x18] sm:$0xff] %vm809_vm1, %v2545_v43  ;;  %4230 = vmatmul.mubr.msk.bf16.vlgmr.msra.gmra.mrb[44].mxu0 %vm444_vm0, %v2864_v6  ;;  %3263 = vmatpush1.bf16.msra.mxu1 %v4404_v8  ;;  %v4409_v6 = vld [vmem:[#allocation3 + $0xb4] ss:$8 sps:$4 sm:$0xff]   ;;  %v4407_v43 = vld [vmem:[#allocation3 + $0xb0] ss:$8 sps:$4 sm:$0xff]  }
0x18fa   :  { %4234 = vmatpush3.bf16.msra.mxu0 %v4390_v9  ;;  %3264 = vmatprep.subr.bf16.mxu1 %v4409_v6  ;;  %v4415_v9 = vld [vmem:[#allocation3 + $0xd4] ss:$8 sps:$4 sm:$0xff]  }
0x18fb   :  { %4235 = vmatprep.subr.bf16.mxu0 %v4391_v47 }
0x18fc   :  { %v2737_v41 = vpop.permute.xlu1 %2736 }
0x18fd   :  { %2747 = vst.msk [vmem:[#allocation2 + $0x8] sm:$0xff] %vm1006_vm2, %v2737_v41  ;;  %3265 = vmatpush1.bf16.msra.mxu1 %v4407_v43  ;;  %v4412_v41 = vld [vmem:[#allocation3 + $0xc4] ss:$8 sps:$4 sm:$0xff]  }
0x18fe   :  { %4236 = vmatpush3.bf16.msra.mxu0 %v4391_v47  ;;  %3266 = vmatprep.subr.bf16.mxu1 %v4412_v41  ;;  %v4413_v47 = vld [vmem:[#allocation3 + $0xd0] ss:$8 sps:$4 sm:$0xff]  }
0x18ff   :  { %4237 = vmatprep.subr.bf16.mxu0 %v4392_v55 }
0x1900   :  { %v2741_v38 = vpop.permute.xlu1 %2740 }
0x1901   :  { %2749 = vst.msk [vmem:[#allocation2 + $0x18] sm:$0xff] %vm1006_vm2, %v2741_v38  ;;  %v4410_v38 = vld [vmem:[#allocation3 + $0xc0] ss:$8 sps:$4 sm:$0xff]  }
0x1902   :  { %4238 = vmatpush3.bf16.msra.mxu0 %v4392_v55  ;;  %3267 = vmatpush1.bf16.msra.mxu1 %v4410_v38  ;;  %v4416_v55 = vld [vmem:[#allocation3 + $0xe0] ss:$8 sps:$4 sm:$0xff]  }
0x1903   :  { %4239 = vmatprep.subr.bf16.mxu0 %v4393_v57  ;;  %3268 = vmatprep.subr.bf16.mxu1 %v4415_v9 }
0x1906   :  { %4240 = vmatpush3.bf16.msra.mxu0 %v4393_v57  ;;  %3269 = vmatpush1.bf16.msra.mxu1 %v4413_v47  ;;  %v4418_v57 = vld [vmem:[#allocation3 + $0xe4] ss:$8 sps:$4 sm:$0xff]  }
0x1907   :  { %4241 = vmatprep.subr.bf16.mxu0 %v4394_v4  ;;  %3270 = vmatprep.subr.bf16.mxu1 %v4418_v57 }
0x190a   :  { %4242 = vmatpush3.bf16.msra.mxu0 %v4394_v4  ;;  %v4421_v4 = vld [vmem:[#allocation3 + $0xf4] ss:$8 sps:$4 sm:$0xff]   ;;  %3271 = vmatpush1.bf16.msra.mxu1 %v4416_v55 }
0x190b   :  { %4243 = vmatprep.subr.bf16.mxu0 %v4395_v18  ;;  %3272 = vmatprep.subr.bf16.mxu1 %v4421_v4 }
0x190e   :  { %4244 = vmatpush3.bf16.msra.mxu0 %v4395_v18  ;;  %v4419_v18 = vld [vmem:[#allocation3 + $0xf0] ss:$8 sps:$4 sm:$0xff]  }
0x190f   :  { %4245 = vmatprep.subr.bf16.mxu0 %v4396_v20  ;;  %3273 = vmatpush1.bf16.msra.mxu1 %v4419_v18 }
0x1912   :  { %4246 = vmatpush3.bf16.msra.mxu0 %v4396_v20 }
0x1913   :  { %4247 = vmatprep.subr.bf16.mxu0 %v4397_v5 }
0x1916   :  { %4248 = vmatpush3.bf16.msra.mxu0 %v4397_v5 }
0x1917   :  { %4017 = vmatprep.subr.bf16.mxu0 %v4422_v61 }
0x19cc   :  { %v4231_v16 = vpop.f32.mrb[44].mxu0 }
0x19cd   :  { %v2911_v59 = vpop.f32.mrb[45].mxu0 }
0x19ce   :  { %2930 = vrot.lane.b32.xlu0 %v2911_v59, %s4697_s25  ;;  %v4232_v21 = vpop.f32.mrb[46].mxu0 }
0x19cf   :  { %v2914_v14 = vpop.f32.mrb[47].mxu0 }
0x19d0   :  { %2932 = vrot.lane.b32.xlu1 %v2914_v14, %s4697_s25 }
0x19d2   :  { %2934 = vrot.lane.b32.xlu0 %v4231_v16, %s4697_s25 }
0x19d4   :  { %2936 = vrot.lane.b32.xlu1 %v4232_v21, %s4697_s25 }
0x1a40   :  { %v2931_v19 = vpop.permute.xlu0 %2930 }
0x1a41   :  { %2942 = vst.msk [vmem:[#allocation2] sm:$0xff] %vm1203_vm3, %v2931_v19 }
0x1a42   :  { %v2933_v26 = vpop.permute.xlu1 %2932 }
0x1a43   :  { %2943 = vst.msk [vmem:[#allocation2 + $0x8] sm:$0xff] %vm1203_vm3, %v2933_v26 }
0x1a44   :  { %v2935_v10 = vpop.permute.xlu0 %2934 }
0x1a45   :  { %2944 = vst.msk [vmem:[#allocation2 + $0x10] sm:$0xff] %vm1203_vm3, %v2935_v10 }
0x1a46   :  { %v2937_v1 = vpop.permute.xlu1 %2936 }
0x1a47   :  { %2945 = vst.msk [vmem:[#allocation2 + $0x18] sm:$0xff] %vm1203_vm3, %v2937_v1 }
0x1a48   :  { %v2946_v30 = vld [vmem:[#allocation2] sm:$0xff] }
0x1a4a   :  { %v2947_v52 = vld [vmem:[#allocation2 + $0x8] sm:$0xff] }
0x1a4b   :  { %v2950_v34 = vpack.c.bf16 %v2947_v52, %v2946_v30 }
0x1a4c   :  { %v2948_v11 = vld [vmem:[#allocation2 + $0x10] sm:$0xff] }
0x1a4d   :  { %4249 = vmatprep.mubr.bf16.mxu0 %v2950_v34 }
0x1a4e   :  { %v2949_v24 = vld [vmem:[#allocation2 + $0x18] sm:$0xff] }
0x1a4f   :  { %v2951_v25 = vpack.c.bf16 %v2949_v24, %v2948_v11  ;;  %v3844_v11 = vld [vmem:[%s5717_s8 + $0x1] ss:$0 sm:$0xff] }
0x1a51   :  { %4250 = vmatmul.mubr.bf16.vlgmr.msra.gmra.mrb[48].mxu0 %v2951_v25 }
0x1b24   :  { %v4251_v28 = vpop.f32.mrb[48].mxu0 }
0x1b25   :  { %v3059_v42 = vpop.f32.mrb[49].mxu0  ;;  %v3068_v37 = vadd.f32 %v4251_v28, %v3833_v27 }
0x1b26   :  { %v3060_v29 = vadd.f32 %v3833_v27, %v3059_v42  ;;  %v4252_v32 = vpop.f32.mrb[50].mxu0 }
0x1b27   :  { %v3062_v35 = vpop.f32.mrb[51].mxu0  ;;  %v3076_v53 = vadd.f32 %v3068_v37, %v5375_v51  ;;  %v3071_v23 = vadd.f32 %v4252_v32, %v3833_v27 }
0x1b28   :  { %v3074_v45 = vadd.f32 %v3060_v29, %v5366_v33  ;;  %v3063_v31 = vadd.f32 %v3833_v27, %v3062_v35  ;;  %v3845_v29 = vld [vmem:[%s5718_s9 + $0x1] ss:$0 sm:$0xff] }
0x1b29   :  { %v3077_v12 = vadd.f32 %v3071_v23, %v5377_v54 }
0x1b2a   :  { %v3075_v62 = vadd.f32 %v3063_v31, %v5368_v46  ;;  %3082 = vadd.xlane.f32.xlu0 %v3074_v45 }
0x1b2c   :  { %3084 = vadd.xlane.f32.xlu1 %v3075_v62 }
0x1b2e   :  { %3086 = vadd.xlane.f32.xlu0 %v3076_v53 }
0x1b32   :  { %3088 = vadd.xlane.f32.xlu0 %v3077_v12 }
0x1bb7   :  { %v3083_v33 = vpop.xlane.xlu0 %3082 }
0x1bb8   :  { %v3090_v13 = vmul.f32 0.0078125, %v3083_v33  ;;  %v4423_v33 = vld [vmem:[#allocation5 + $0x80] sm:$0xff]  }
0x1bb9   :  { %v3085_v46 = vpop.xlane.xlu1 %3084  ;;  %4018 = vmatpush3.bf16.msra.mxu0 %v4423_v33 }
0x1bba   :  { %v3094_v60 = vsub.f32 %v3074_v45, %v3090_v13  ;;  %v3091_v22 = vmul.f32 0.0078125, %v3085_v46  ;;  %v4424_v13 = vld [vmem:[#allocation5 + $0xc8] sm:$0xff]  }
0x1bbb   :  { %v3087_v51 = vpop.xlane.xlu0 %3086  ;;  %v4425_v46 = vld [vmem:[#allocation5 + $0x88] sm:$0xff]   ;;  %4019 = vmatprep.subr.bf16.mxu0 %v4424_v13 }
0x1bbc   :  { %v3095_v44 = vsub.f32 %v3075_v62, %v3091_v22  ;;  %v3092_v40 = vmul.f32 0.0078125, %v3087_v51  ;;  %v3098_v48 = vmul.f32 %v3094_v60, %v3094_v60  ;;  %v4427_v22 = vld [vmem:[#allocation5 + $0x90] sm:$0xff]   ;;  %v4429_v51 = vld [vmem:[#allocation5 + $0x98] sm:$0xff]  }
0x1bbd   :  { %4020 = vmatpush3.bf16.msra.mxu0 %v4425_v46 }
0x1bbe   :  { %v3096_v49 = vsub.f32 %v3076_v53, %v3092_v40  ;;  %3102 = vadd.xlane.f32.xlu0 %v3098_v48  ;;  %v3099_v54 = vmul.f32 %v3095_v44, %v3095_v44  ;;  %v4431_v40 = vld [vmem:[#allocation5 + $0xa0] sm:$0xff]   ;;  %v4432_v48 = vld [vmem:[#allocation5 + $0xe8] sm:$0xff]  }
0x1bbf   :  { %v3089_v50 = vpop.xlane.xlu0 %3088 }
0x1bc0   :  { %v3093_v63 = vmul.f32 0.0078125, %v3089_v50  ;;  %3104 = vadd.xlane.f32.xlu1 %v3099_v54  ;;  %v3100_v0 = vmul.f32 %v3096_v49, %v3096_v49  ;;  %v4434_v54 = vld [vmem:[#allocation5 + $0xf0] sm:$0xff]  }
0x1bc1   :  { %v4435_v50 = vld [vmem:[#allocation5 + $0xb0] sm:$0xff]  }
0x1bc2   :  { %v3097_v2 = vsub.f32 %v3077_v12, %v3093_v63  ;;  %3106 = vadd.xlane.f32.xlu0 %v3100_v0  ;;  %v4436_v63 = vld [vmem:[#allocation5 + $0xf8] sm:$0xff]  }
0x1bc3   :  { %v4437_v0 = vld [vmem:[#allocation5 + $0xb8] sm:$0xff]  }
0x1bc4   :  { %v3101_v7 = vmul.f32 %v3097_v2, %v3097_v2 }
0x1bc6   :  { %3108 = vadd.xlane.f32.xlu1 %v3101_v7 }
0x1c4b   :  { %v3103_v20 = vpop.xlane.xlu0 %3102 }
0x1c4c   :  { %v3110_v5 = vmul.f32 0.0078125, %v3103_v20 }
0x1c4d   :  { %v3105_v16 = vpop.xlane.xlu1 %3104 }
0x1c4e   :  { %v3114_v59 = vadd.f32 1e-12, %v3110_v5  ;;  %v3111_v21 = vmul.f32 0.0078125, %v3105_v16 }
0x1c4f   :  { %v3107_v14 = vpop.xlane.xlu0 %3106 }
0x1c50   :  { %4606 = vrsqrt.f32 %v3114_v59  ;;  %v3115_v19 = vadd.f32 1e-12, %v3111_v21  ;;  %v3112_v26 = vmul.f32 0.0078125, %v3107_v14 }
0x1c52   :  { %4608 = vrsqrt.f32 %v3115_v19  ;;  %v3116_v10 = vadd.f32 1e-12, %v3112_v26 }
0x1c53   :  { %v3109_v1 = vpop.xlane.xlu1 %3108 }
0x1c54   :  { %4610 = vrsqrt.f32 %v3116_v10  ;;  %v3113_v30 = vmul.f32 0.0078125, %v3109_v1 }
0x1c56   :  { %v3117_v52 = vadd.f32 1e-12, %v3113_v30 }
0x1c58   :  { %4612 = vrsqrt.f32 %v3117_v52 }
0x1c5a   :  { %v4607_v34 = vpop.eup %4606 }
0x1c5b   :  { %v3122_v24 = vmul.f32 %v4607_v34, %v3094_v60  ;;  %v4426_v60 = vld [vmem:[#allocation5 + $0xd0] sm:$0xff]  }
0x1c5c   :  { %v4609_v25 = vpop.eup %4608  ;;  %4021 = vmatprep.subr.bf16.mxu0 %v4426_v60 }
0x1c5d   :  { %v3123_v27 = vmul.f32 %v4609_v25, %v3095_v44  ;;  %v3132_v28 = vmul.f32 %v3844_v11, %v3122_v24  ;;  %4022 = vmatpush3.bf16.msra.mxu0 %v4427_v22  ;;  %v4430_v44 = vld [vmem:[#allocation5 + $0xe0] sm:$0xff]  }
0x1c5e   :  { %v4611_v42 = vpop.eup %4610 }
0x1c5f   :  { %v3133_v32 = vmul.f32 %v3844_v11, %v3123_v27  ;;  %v5624_v35 = vadd.f32 %v3845_v29, %v3132_v28  ;;  %v3124_v45 = vmul.f32 %v4611_v42, %v3096_v49  ;;  %v4433_v49 = vld [vmem:[#allocation5 + $0xa8] sm:$0xff]  }
0x1c61   :  { %v5626_v37 = vadd.f32 %v3845_v29, %v3133_v32  ;;  %v3134_v23 = vmul.f32 %v3844_v11, %v3124_v45 }
0x1c62   :  { %v4613_v31 = vpop.eup %4612 }
0x1c63   :  { %v3146_v62 = vpack.c.bf16 %v5626_v37, %v5624_v35  ;;  %v3125_v53 = vmul.f32 %v4613_v31, %v3097_v2  ;;  %v5633_v56 = vadd.f32 %v3845_v29, %v3134_v23  ;;  %v3846_v2 = vld [vmem:[%s5720_s11 + $0x2] sm:$0x3] }
0x1c64   :  { %v3171_v7 = vrot.slane %v3846_v2, %v4937_v15  ;;  %v3175_v3 = vrot.slane %v3846_v2, %v4943_v17 }
0x1c65   :  { %3291 = vmatmul.mubr.bf16.vlgmr.msra.gmra.mrb[60].mxu1 %v3146_v62  ;;  %v3135_v12 = vmul.f32 %v3844_v11, %v3125_v53 }
0x1c66   :  { %3300 = vmatprep.mubr.bf16.mxu1 %v4696_v39  ;;  %v4428_v39 = vld [vmem:[#allocation5 + $0xd8] sm:$0xff]  }
0x1c67   :  { %v5631_v58 = vadd.f32 %v3845_v29, %v3135_v12  ;;  %4023 = vmatprep.subr.bf16.mxu0 %v4428_v39 }
0x1c68   :  { %4024 = vmatpush3.bf16.msra.mxu0 %v4429_v51 }
0x1c69   :  { %v3147_v36 = vpack.c.bf16 %v5631_v58, %v5633_v56  ;;  %4025 = vmatprep.subr.bf16.mxu0 %v4430_v44 }
0x1c6c   :  { %4026 = vmatpush3.bf16.msra.mxu0 %v4431_v40 }
0x1c6d   :  { %3301 = vmatmul.mubr.bf16.gmra.mrb[64].mxu1 %v3147_v36  ;;  %4027 = vmatprep.subr.bf16.mxu0 %v4432_v48 }
0x1c70   :  { %4028 = vmatpush3.bf16.msra.mxu0 %v4433_v49 }
0x1c71   :  { %4029 = vmatprep.subr.bf16.mxu0 %v4434_v54 }
0x1c74   :  { %4030 = vmatpush3.bf16.msra.mxu0 %v4435_v50 }
0x1c75   :  { %4031 = vmatprep.subr.bf16.mxu0 %v4436_v63 }
0x1c78   :  { %4032 = vmatpush3.bf16.msra.mxu0 %v4437_v0 }
0x1d38   :  { %v3292_v8 = vpop.f32.mrb[60].mxu1 }
0x1d39   :  { %v5642_v6 = vadd.f32 %v3292_v8, %v3171_v7  ;;  %v3294_v43 = vpop.f32.mrb[61].mxu1 }
0x1d3a   :  { %v5644_v41 = vadd.f32 %v3294_v43, %v3175_v3  ;;  %v3296_v38 = vpop.f32.mrb[62].mxu1 }
0x1d3b   :  { %v3319_v9 = vmul.f32 0.044715, %v5642_v6  ;;  %v5647_v47 = vadd.f32 %v3296_v38, %v3171_v7  ;;  %v3298_v55 = vpop.f32.mrb[63].mxu1  ;;  %v3311_v38 = vmul.f32 0.5, %v5642_v6 }
0x1d3c   :  { %v3320_v57 = vmul.f32 0.044715, %v5644_v41  ;;  %v5650_v4 = vadd.f32 %v3298_v55, %v3175_v3 }
0x1d3d   :  { %v3327_v15 = vmul.f32 %v3319_v9, %v5642_v6  ;;  %v3321_v17 = vmul.f32 0.044715, %v5647_v47  ;;  %v3313_v9 = vmul.f32 0.5, %v5647_v47 }
0x1d3e   :  { %v3328_v18 = vmul.f32 %v3320_v57, %v5644_v41  ;;  %v3322_v20 = vmul.f32 0.044715, %v5650_v4  ;;  %v3312_v57 = vmul.f32 0.5, %v5644_v41 }
0x1d3f   :  { %v3335_v5 = vmul.f32 %v3327_v15, %v5642_v6  ;;  %v3329_v16 = vmul.f32 %v3321_v17, %v5647_v47  ;;  %v3314_v15 = vmul.f32 0.5, %v5650_v4 }
0x1d40   :  { %v3336_v59 = vmul.f32 %v3328_v18, %v5644_v41  ;;  %v3330_v21 = vmul.f32 %v3322_v20, %v5650_v4  ;;  %v3302_v14 = vpop.f32.mrb[64].mxu1 }
0x1d41   :  { %v3343_v19 = vadd.f32 %v3335_v5, %v5642_v6  ;;  %v3337_v26 = vmul.f32 %v3329_v16, %v5647_v47  ;;  %v5662_v10 = vadd.f32 %v3302_v14, %v3171_v7  ;;  %v3304_v1 = vpop.f32.mrb[65].mxu1 }
0x1d42   :  { %v3338_v30 = vmul.f32 %v3330_v21, %v5650_v4  ;;  %v5665_v52 = vadd.f32 %v3304_v1, %v3175_v3  ;;  %v3306_v34 = vpop.f32.mrb[66].mxu1  ;;  %v3344_v11 = vadd.f32 %v3336_v59, %v5644_v41 }
0x1d43   :  { %v3351_v24 = vmul.f32 0.7978846, %v3343_v19  ;;  %v3345_v25 = vadd.f32 %v3337_v26, %v5647_v47  ;;  %v3323_v27 = vmul.f32 0.044715, %v5662_v10  ;;  %v3307_v28 = vadd.f32 %v3306_v34, %v3171_v7  ;;  %v3308_v42 = vpop.f32.mrb[67].mxu1 }
0x1d44   :  { %v3324_v29 = vmul.f32 0.044715, %v5665_v52  ;;  %v3309_v32 = vadd.f32 %v3308_v42, %v3175_v3  ;;  %v3346_v45 = vadd.f32 %v3338_v30, %v5650_v4  ;;  %v3352_v31 = vmul.f32 0.7978846, %v3344_v11 }
0x1d45   :  { %4614 = vtanh.f32 %v3351_v24  ;;  %v3353_v62 = vmul.f32 0.7978846, %v3345_v25  ;;  %v3331_v53 = vmul.f32 %v3323_v27, %v5662_v10  ;;  %v3325_v23 = vmul.f32 0.044715, %v3307_v28 }
0x1d46   :  { %v3332_v12 = vmul.f32 %v3324_v29, %v5665_v52  ;;  %v3326_v36 = vmul.f32 0.044715, %v3309_v32  ;;  %v3354_v61 = vmul.f32 0.7978846, %v3346_v45  ;;  %4616 = vtanh.f32 %v3352_v31 }
0x1d47   :  { %4618 = vtanh.f32 %v3353_v62  ;;  %v3339_v33 = vmul.f32 %v3331_v53, %v5662_v10  ;;  %v3333_v13 = vmul.f32 %v3325_v23, %v3307_v28  ;;  %v3315_v47 = vmul.f32 0.5, %v5662_v10  ;;  %v3864_v53 = vld [vmem:[%s5722_s13 + $0x1] ss:$0 sm:$0xff] }
0x1d48   :  { %v3340_v46 = vmul.f32 %v3332_v12, %v5665_v52  ;;  %v3334_v60 = vmul.f32 %v3326_v36, %v3309_v32  ;;  %4620 = vtanh.f32 %v3354_v61  ;;  %v3317_v41 = vmul.f32 0.5, %v3307_v28 }
0x1d49   :  { %v3341_v22 = vmul.f32 %v3333_v13, %v3307_v28  ;;  %v3347_v39 = vadd.f32 %v3339_v33, %v5662_v10  ;;  %v3316_v4 = vmul.f32 0.5, %v5665_v52  ;;  %v3318_v11 = vmul.f32 0.5, %v3309_v32 }
0x1d4a   :  { %v3342_v51 = vmul.f32 %v3334_v60, %v3309_v32  ;;  %v3348_v44 = vadd.f32 %v3340_v46, %v5665_v52 }
0x1d4b   :  { %v3349_v40 = vadd.f32 %v3341_v22, %v3307_v28  ;;  %v3355_v48 = vmul.f32 0.7978846, %v3347_v39 }
0x1d4c   :  { %v3350_v49 = vadd.f32 %v3342_v51, %v3309_v32  ;;  %v3356_v54 = vmul.f32 0.7978846, %v3348_v44 }
0x1d4d   :  { %v3357_v50 = vmul.f32 0.7978846, %v3349_v40  ;;  %4622 = vtanh.f32 %v3355_v48 }
0x1d4e   :  { %v3358_v63 = vmul.f32 0.7978846, %v3350_v49  ;;  %4624 = vtanh.f32 %v3356_v54 }
0x1d4f   :  { %v4615_v0 = vpop.eup %4614  ;;  %4626 = vtanh.f32 %v3357_v50 }
0x1d50   :  { %v4617_v2 = vpop.eup %4616  ;;  %v3367_v7 = vadd.f32 1.0, %v4615_v0  ;;  %4628 = vtanh.f32 %v3358_v63 }
0x1d51   :  { %v4619_v3 = vpop.eup %4618  ;;  %v3368_v8 = vadd.f32 1.0, %v4617_v2 }
0x1d52   :  { %v4621_v43 = vpop.eup %4620  ;;  %v3369_v55 = vadd.f32 1.0, %v4619_v3  ;;  %v3375_v18 = vmul.f32 %v3367_v7, %v3311_v38 }
0x1d53   :  { %v3370_v17 = vadd.f32 1.0, %v4621_v43  ;;  %v3376_v5 = vmul.f32 %v3368_v8, %v3312_v57 }
0x1d54   :  { %v3377_v20 = vmul.f32 %v3369_v55, %v3313_v9 }
0x1d55   :  { %v3378_v16 = vmul.f32 %v3370_v17, %v3314_v15 }
0x1d56   :  { %v3383_v59 = vpack.c.bf16 %v3377_v20, %v3375_v18 }
0x1d57   :  { %v4623_v21 = vpop.eup %4622  ;;  %v3384_v14 = vpack.c.bf16 %v3378_v16, %v3376_v5 }
0x1d58   :  { %v4625_v19 = vpop.eup %4624  ;;  %v3371_v26 = vadd.f32 1.0, %v4623_v21 }
0x1d59   :  { %v4627_v1 = vpop.eup %4626  ;;  %3556 = vmatprep.mubr.bf16.mxu0 %v3384_v14  ;;  %v3372_v6 = vadd.f32 1.0, %v4625_v19 }
0x1d5a   :  { %v4629_v30 = vpop.eup %4628  ;;  %3557 = vmatmul.mubr.bf16.vlgmr.msra.gmra.mrb[52].mxu0 %v3383_v59  ;;  %v3373_v34 = vadd.f32 1.0, %v4627_v1  ;;  %v3379_v25 = vmul.f32 %v3371_v26, %v3315_v47 }
0x1d5b   :  { %v3374_v24 = vadd.f32 1.0, %v4629_v30  ;;  %v3380_v42 = vmul.f32 %v3372_v6, %v3316_v4  ;;  %v3883_v6 = vld [vmem:[%s5723_s14 + $0x1] ss:$0 sm:$0xff] }
0x1d5c   :  { %v3381_v27 = vmul.f32 %v3373_v34, %v3317_v41  ;;  %v3884_v41 = vld [vmem:[%s5724_s15 + $0x1] ss:$0 sm:$0xff] }
0x1d5d   :  { %v3382_v29 = vmul.f32 %v3374_v24, %v3318_v11 }
0x1d5e   :  { %v3385_v45 = vpack.c.bf16 %v3381_v27, %v3379_v25 }
0x1d5f   :  { %v3386_v31 = vpack.c.bf16 %v3382_v29, %v3380_v42 }
0x1d61   :  { %3564 = vmatprep.mubr.bf16.mxu0 %v3386_v31 }
0x1d62   :  { %3565 = vmatmul.mubr.bf16.gmra.mrb[56].mxu0 %v3385_v45 }
0x1e2d   :  { %v4033_v62 = vpop.f32.mrb[52].mxu0 }
0x1e2e   :  { %v4034_v10 = vpop.f32.mrb[53].mxu0 }
0x1e2f   :  { %v4035_v28 = vadd.f32 %v4034_v10, %v4033_v62  ;;  %v4036_v23 = vpop.f32.mrb[54].mxu0 }
0x1e30   :  { %v4037_v12 = vpop.f32.mrb[55].mxu0 }
0x1e31   :  { %v3559_v52 = vadd.f32 %v4035_v28, %v3864_v53  ;;  %v4038_v32 = vadd.f32 %v4037_v12, %v4036_v23 }
0x1e33   :  { %v3562_v36 = vadd.f32 %v4038_v32, %v3864_v53  ;;  %v3573_v61 = vadd.f32 %v3559_v52, %v5624_v35 }
0x1e35   :  { %3581 = vadd.xlane.f32.xlu0 %v3573_v61  ;;  %v4039_v33 = vpop.f32.mrb[56].mxu0  ;;  %v3574_v13 = vadd.f32 %v3562_v36, %v5626_v37 }
0x1e36   :  { %v4040_v46 = vpop.f32.mrb[57].mxu0 }
0x1e37   :  { %v4041_v60 = vadd.f32 %v4040_v46, %v4039_v33  ;;  %3583 = vadd.xlane.f32.xlu1 %v3574_v13  ;;  %v4042_v22 = vpop.f32.mrb[58].mxu0 }
0x1e38   :  { %v4043_v39 = vpop.f32.mrb[59].mxu0 }
0x1e39   :  { %v3567_v51 = vadd.f32 %v4041_v60, %v3864_v53  ;;  %v4044_v44 = vadd.f32 %v4043_v39, %v4042_v22 }
0x1e3b   :  { %v3570_v40 = vadd.f32 %v4044_v44, %v3864_v53  ;;  %v3575_v48 = vadd.f32 %v3567_v51, %v5633_v56 }
0x1e3d   :  { %3585 = vadd.xlane.f32.xlu0 %v3575_v48  ;;  %v3576_v49 = vadd.f32 %v3570_v40, %v5631_v58 }
0x1e3f   :  { %3587 = vadd.xlane.f32.xlu1 %v3576_v49 }
0x1ec2   :  { %v3582_v54 = vpop.xlane.xlu0 %3581 }
0x1ec3   :  { %v3589_v35 = vmul.f32 0.0078125, %v3582_v54 }
0x1ec4   :  { %v3584_v50 = vpop.xlane.xlu1 %3583 }
0x1ec5   :  { %v3593_v63 = vsub.f32 %v3573_v61, %v3589_v35  ;;  %v3590_v0 = vmul.f32 0.0078125, %v3584_v50 }
0x1ec7   :  { %v3594_v37 = vsub.f32 %v3574_v13, %v3590_v0  ;;  %v3597_v2 = vmul.f32 %v3593_v63, %v3593_v63 }
0x1ec9   :  { %3601 = vadd.xlane.f32.xlu0 %v3597_v2  ;;  %v3598_v7 = vmul.f32 %v3594_v37, %v3594_v37 }
0x1eca   :  { %v3586_v3 = vpop.xlane.xlu0 %3585 }
0x1ecb   :  { %v3591_v8 = vmul.f32 0.0078125, %v3586_v3  ;;  %3603 = vadd.xlane.f32.xlu1 %v3598_v7 }
0x1ecc   :  { %v3588_v43 = vpop.xlane.xlu1 %3587 }
0x1ecd   :  { %v3595_v38 = vsub.f32 %v3575_v48, %v3591_v8  ;;  %v3592_v9 = vmul.f32 0.0078125, %v3588_v43 }
0x1ecf   :  { %v3596_v56 = vsub.f32 %v3576_v49, %v3592_v9  ;;  %v3599_v55 = vmul.f32 %v3595_v38, %v3595_v38 }
0x1ed1   :  { %3605 = vadd.xlane.f32.xlu0 %v3599_v55  ;;  %v3600_v58 = vmul.f32 %v3596_v56, %v3596_v56 }
0x1ed3   :  { %3607 = vadd.xlane.f32.xlu1 %v3600_v58 }
0x1f56   :  { %v3602_v57 = vpop.xlane.xlu0 %3601 }
0x1f57   :  { %v3609_v15 = vmul.f32 0.0078125, %v3602_v57 }
0x1f58   :  { %v3604_v17 = vpop.xlane.xlu1 %3603 }
0x1f59   :  { %v3613_v18 = vadd.f32 1e-12, %v3609_v15  ;;  %v3610_v20 = vmul.f32 0.0078125, %v3604_v17 }
0x1f5b   :  { %4630 = vrsqrt.f32 %v3613_v18  ;;  %v3614_v5 = vadd.f32 1e-12, %v3610_v20 }
0x1f5d   :  { %4632 = vrsqrt.f32 %v3614_v5 }
0x1f5e   :  { %v3606_v16 = vpop.xlane.xlu0 %3605 }
0x1f5f   :  { %v3611_v59 = vmul.f32 0.0078125, %v3606_v16 }
0x1f60   :  { %v3608_v21 = vpop.xlane.xlu1 %3607 }
0x1f61   :  { %v3615_v14 = vadd.f32 1e-12, %v3611_v59  ;;  %v3612_v19 = vmul.f32 0.0078125, %v3608_v21 }
0x1f63   :  { %4634 = vrsqrt.f32 %v3615_v14  ;;  %v3616_v26 = vadd.f32 1e-12, %v3612_v19 }
0x1f65   :  { %v4631_v1 = vpop.eup %4630  ;;  %4636 = vrsqrt.f32 %v3616_v26 }
0x1f66   :  { %v3621_v30 = vmul.f32 %v4631_v1, %v3593_v63 }
0x1f67   :  { %v4633_v47 = vpop.eup %4632 }
0x1f68   :  { %v3631_v34 = vmul.f32 %v3883_v6, %v3621_v30  ;;  %v3622_v4 = vmul.f32 %v4633_v47, %v3594_v37 }
0x1f6a   :  { %v3641_v11 = vadd.f32 %v3884_v41, %v3631_v34  ;;  %v3632_v24 = vmul.f32 %v3883_v6, %v3622_v4 }
0x1f6c   :  { %3645 = vst [vmem:[%s5725_s16] sm:$0xff] %v3641_v11  ;;  %v3642_v25 = vadd.f32 %v3884_v41, %v3632_v24 }
0x1f6d   :  { %v4635_v27 = vpop.eup %4634 }
0x1f6e   :  { %3646 = vst [vmem:[%s5725_s16 + $0x8] sm:$0xff] %v3642_v25  ;;  %v3623_v42 = vmul.f32 %v4635_v27, %v3595_v38 }
0x1f6f   :  { %v4637_v29 = vpop.eup %4636 }
0x1f70   :  { %v3633_v45 = vmul.f32 %v3883_v6, %v3623_v42  ;;  %v3624_v31 = vmul.f32 %v4637_v29, %v3596_v56 }
0x1f72   :  { %v3643_v62 = vadd.f32 %v3884_v41, %v3633_v45  ;;  %v3634_v53 = vmul.f32 %v3883_v6, %v3624_v31 }
0x1f74   :  { %3647 = vst [vmem:[%s5725_s16 + $0x10] sm:$0xff] %v3643_v62  ;;  %v3644_v10 = vadd.f32 %v3884_v41, %v3634_v53 }
0x1f76   :  { %3648 = vst [vmem:[%s5725_s16 + $0x18] sm:$0xff] %v3644_v10 }
0x1f77   :  { %3653 = vsyncpa [#allocation4], 1 }
0x1f78   :  { %3654 = vsyncpa [#allocation6], 1 }

</bundles_post_ra>
